<compile_context>
chip_gen: v6e
topology: v6e:2x2x1
jax: 0.10.0
libtpu: 0.0.40
codegen_flags: <defaults>
</compile_context>

<pallas_src>
import numpy as np

import jax
import jax.numpy as jnp
from jax import lax
from jax.experimental import pallas as pl
from jax.experimental.pallas import tpu as pltpu

EPS = 1e-5
K = 5      # conv kernel size
PAD = 2    # conv padding ("same")

# MXU operand dtype.  float32 keeps exact-parity numerics with the f32 PyTorch
# reference; set to jnp.bfloat16 on v6e/v7x for ~2x less MXU-operand copy/VMEM
# traffic (all accumulation and elementwise work stays in f32).
MXU_DTYPE = jnp.float32


def _vmem():
    return pl.BlockSpec(memory_space=pltpu.MemorySpace.VMEM)


# ---------------------------------------------------------------------------
# Static geometry: per-image zero-padded images concatenated along the flat
# (lane) axis; flat index = b*Lp + h*Wp + w in padded coordinates.
# ---------------------------------------------------------------------------
def _geom(B, H, W):
    Hp, Wp = H + 2 * PAD, W + 2 * PAD
    Lp = Hp * Wp                               # per-image padded flat length
    Lci = (H - 1) * Wp + W                     # per-image conv-output extent
    Lzi = Lci - (Wp + 1)                       # per-image 2x2 window-start extent
    Lc = (B - 1) * Lp + Lci                    # whole-batch conv-output extent
    Lz = Lc - (Wp + 1)                         # whole-batch window-start extent
    return Hp, Wp, Lp, Lc, Lz, Lci, Lzi


def _valid_mask(B, H, W):
    """(1, Lc) 0/1 mask of valid conv-output flat positions."""
    _, Wp, Lp, Lc, _, _, _ = _geom(B, H, W)
    m = np.zeros((1, Lc), np.float32)
    for b in range(B):
        for h in range(H):
            s = b * Lp + h * Wp
            m[0, s:s + W] = 1.0
    return m


def _pool_repad_gather(H, W):
    """Per-image 0/1 map: (H,W)-stage 2x2-window-start flat position -> next
    stage's zero-padded per-image flat position.  B-independent."""
    _, Wp, _, _, _, _, Lzi = _geom(1, H, W)
    Ho, Wo = H // 2, W // 2
    Wpn = Wo + 2 * PAD
    Hpn = Ho + 2 * PAD
    G = np.zeros((Lzi, Hpn * Wpn), np.float32)
    for ho in range(Ho):
        for wo in range(Wo):
            G[(2 * ho) * Wp + 2 * wo, (ho + PAD) * Wpn + (wo + PAD)] = 1.0
    return G


def _pool_flatten_gather(H, W, C):
    """Per-image 0/1 map: (H,W)-stage 2x2-window-start flat position -> flattened
    fc lane c*Ho*Wo + ho*Wo + wo, replicated for every channel c.  B-independent."""
    _, Wp, _, _, _, _, Lzi = _geom(1, H, W)
    Ho, Wo = H // 2, W // 2
    S = Ho * Wo
    G = np.zeros((Lzi, C * S), np.float32)
    for ho in range(Ho):
        for wo in range(Wo):
            p = (2 * ho) * Wp + 2 * wo
            s = ho * Wo + wo
            G[p, np.arange(C) * S + s] = 1.0
    return G


def _chan_select(C, S):
    """(C, C*S) 0/1 mask selecting, in row c, the lane block [c*S, (c+1)*S)."""
    M = np.zeros((C, C * S), np.float32)
    for c in range(C):
        M[c, c * S:(c + 1) * S] = 1.0
    return M


# ---------------------------------------------------------------------------
# Fused Pallas kernel (whole forward pass)
# ---------------------------------------------------------------------------
def _build_kernel(B, H, W, C1, C2, NC):
    H2, W2 = H // 2, W // 2
    S = (H2 // 2) * (W2 // 2)                  # pooled features per channel
    _, Wp1, Lp1, Lc1, Lz1, _, Lzi1 = _geom(B, H, W)
    _, Wp2, Lp2, Lc2, Lz2, _, Lzi2 = _geom(B, H2, W2)
    inv_n1 = 1.0 / float(B * H * W)
    inv_n2 = 1.0 / float(B * H2 * W2)
    inv_b = 1.0 / float(B)
    f32 = jnp.float32

    def winmax(y, wp, lz):
        # 2x2 window max at every flat window-start position
        return jnp.maximum(jnp.maximum(y[:, 0:lz], y[:, 1:1 + lz]),
                           jnp.maximum(y[:, wp:wp + lz], y[:, wp + 1:wp + 1 + lz]))

    def bn2d(y, mask, inv_n, gamma, beta):
        # one-pass masked batch stats (biased variance, clamped), per channel.
        ym = y * mask
        mu = jnp.sum(ym, axis=1, keepdims=True) * inv_n
        var = jnp.sum(ym * y, axis=1, keepdims=True) * inv_n - mu * mu
        var = jnp.maximum(var, 0.0)
        return (y - mu) * lax.rsqrt(var + EPS) * gamma + beta

    def im2col(xm, wp, lc):
        # 25 lane-shifted copies stacked on sublanes (tap-major, channel-minor)
        return jnp.concatenate(
            [xm[:, kh * wp + kw: kh * wp + kw + lc]
             for kh in range(K) for kw in range(K)], axis=0)

    def kernel(x1_ref, w1_ref, g1_ref, bt1_ref, m1_ref, gp1_ref,
               w2_ref, g2_ref, bt2_ref, m2_ref, gp2_ref, csel_ref,
               wf_ref, gf_ref, btf_ref, o_ref):
        # ---- stage 1: conv1 = in-VMEM im2col + one MXU matmul + BN2d + ReLU ----
        x1 = x1_ref[...].astype(MXU_DTYPE)                         # (1, B*Lp1)
        acc1 = jnp.dot(w1_ref[...], im2col(x1, Wp1, Lc1),
                       preferred_element_type=f32)                 # (C1, Lc1)
        y1 = jnp.maximum(bn2d(acc1, m1_ref[...].astype(f32), inv_n1,
                              g1_ref[...], bt1_ref[...]), 0.0)
        wm1 = winmax(y1, Wp1, Lz1)                                 # (C1, Lz1)

        # ---- maxpool1 subsample + zero re-pad: per-image 0/1 gather (MXU) ------
        gp1 = gp1_ref[...].astype(MXU_DTYPE)                       # (Lzi1, Lp2)
        xf2 = jnp.concatenate(
            [jnp.dot(wm1[:, b * Lp1:b * Lp1 + Lzi1].astype(MXU_DTYPE), gp1,
                     preferred_element_type=f32) for b in range(B)],
            axis=1)                                                # (C1, B*Lp2)

        # ---- stage 2: conv2 = in-VMEM im2col + one MXU matmul + BN2d + ReLU ----
        acc2 = jnp.dot(w2_ref[...], im2col(xf2.astype(MXU_DTYPE), Wp2, Lc2),
                       preferred_element_type=f32)                 # (C2, Lc2)
        y2 = jnp.maximum(bn2d(acc2, m2_ref[...].astype(f32), inv_n2,
                              g2_ref[...], bt2_ref[...]), 0.0)
        wm2 = winmax(y2, Wp2, Lz2)                                 # (C2, Lz2)

        # ---- maxpool2 + NCHW flatten -------------------------------------------
        # Per image: the gather spreads pooled feature (c2, s) to lane c2*S+s in
        # every channel row; the channel-selection mask + ones-matmul collapse the
        # sublane (channel) axis.  MXU/VPU only: no lane/sublane transposes and no
        # chain of tiny lane-slice concats.
        gp2 = gp2_ref[...].astype(MXU_DTYPE)                       # (Lzi2, C2*S)
        csel = csel_ref[...].astype(f32)                           # (C2, C2*S)
        ones_c = jnp.ones((1, C2), f32)
        flat = jnp.concatenate(
            [jnp.dot(ones_c,
                     jnp.dot(wm2[:, b * Lp2:b * Lp2 + Lzi2].astype(MXU_DTYPE), gp2,
                             preferred_element_type=f32) * csel,
                     preferred_element_type=f32)
             for b in range(B)], axis=0)                           # (B, C2*S)

        # ---- fc1 + BN1d (batch stats over the sublane/batch axis) --------------
        fc = jnp.dot(flat.astype(MXU_DTYPE), wf_ref[...],
                     preferred_element_type=f32)                   # (B, NC)
        ones_b = jnp.ones((1, B), f32)
        mu = jnp.dot(ones_b, fc, preferred_element_type=f32) * inv_b
        ex2 = jnp.dot(ones_b, fc * fc, preferred_element_type=f32) * inv_b
        var = jnp.maximum(ex2 - mu * mu, 0.0)
        o_ref[...] = (fc - mu) * lax.rsqrt(var + EPS) * gf_ref[...] + btf_ref[...]

    return kernel


# ---------------------------------------------------------------------------
# Forward pass (CNN_batch.forward)
# ---------------------------------------------------------------------------
@jax.jit
def cnn_batch_forward(x, params):
    B, Cin, H, W = x.shape
    assert Cin == 1 and H % 4 == 0 and W % 4 == 0
    C1 = params["w1"].shape[0]
    C2 = params["w2"].shape[0]
    NC = params["wf"].shape[0]
    H2, W2 = H // 2, W // 2
    S = (H2 // 2) * (W2 // 2)
    assert params["wf"].shape[1] == C2 * S

    _, _, Lp1, Lc1, _, _, Lzi1 = _geom(B, H, W)
    _, _, Lp2, Lc2, _, _, Lzi2 = _geom(B, H2, W2)

    # --- host-side layout plumbing (tiny, pure layout ops) ---
    xpad = jnp.pad(x, ((0, 0), (0, 0), (PAD, PAD), (PAD, PAD)))
    xf1 = xpad.transpose(1, 0, 2, 3).reshape(Cin, B * Lp1).astype(jnp.float32)

    w1c = params["w1"].reshape(C1, Cin * K * K).astype(MXU_DTYPE)              # col = kh*5+kw
    w2m = (params["w2"].transpose(0, 2, 3, 1)
           .reshape(C2, K * K * C1).astype(MXU_DTYPE))                         # col = t*C1+c1
    wfT = params["wf"].T.astype(MXU_DTYPE)                                     # (C2*S, NC), row = c2*S+s

    # 0/1 constants in bf16 (exact) -> half the constant HBM/VMEM traffic.
    m1 = jnp.asarray(_valid_mask(B, H, W), jnp.bfloat16)
    m2 = jnp.asarray(_valid_mask(B, H2, W2), jnp.bfloat16)
    gp1 = jnp.asarray(_pool_repad_gather(H, W), jnp.bfloat16)                  # (Lzi1, Lp2)
    gp2 = jnp.asarray(_pool_flatten_gather(H2, W2, C2), jnp.bfloat16)          # (Lzi2, C2*S)
    csel = jnp.asarray(_chan_select(C2, S), jnp.bfloat16)                      # (C2, C2*S)

    col = lambda v: v.reshape(-1, 1).astype(jnp.float32)
    row = lambda v: v.reshape(1, -1).astype(jnp.float32)

    args = (xf1, w1c, col(params["g1"]), col(params["be1"]), m1, gp1,
            w2m, col(params["g2"]), col(params["be2"]), m2, gp2, csel,
            wfT, row(params["gf"]), row(params["bef"]))

    flops = 2 * (C1 * K * K * Lc1                   # conv1
                 + B * C1 * Lzi1 * Lp2              # pool1 gather
                 + C2 * K * K * C1 * Lc2            # conv2
                 + B * C2 * Lzi2 * C2 * S           # pool2/flatten gather
                 + B * C2 * C2 * S                  # channel collapse
                 + B * C2 * S * NC)                 # fc1
    bytes_accessed = sum(int(a.size) * a.dtype.itemsize for a in args) + B * NC * 4

    kernel = _build_kernel(B, H, W, C1, C2, NC)
    return pl.pallas_call(
        kernel,
        out_shape=jax.ShapeDtypeStruct((B, NC), jnp.float32),
        in_specs=[_vmem()] * len(args),
        out_specs=_vmem(),
        compiler_params=pltpu.CompilerParams(vmem_limit_bytes=32 * 1024 * 1024),
        cost_estimate=pl.CostEstimate(flops=flops, transcendentals=C1 + C2 + NC,
                                      bytes_accessed=bytes_accessed),
    )(*args)


# ---------------------------------------------------------------------------
# Parameter init (deterministic, PyTorch-default-style fan-in uniform)
# ---------------------------------------------------------------------------
def init_params(key, out_1=16, out_2=32, num_classes=10):
    ks = jax.random.split(key, 6)

    def u(k, shape, fan_in):
        bound = 1.0 / jnp.sqrt(fan_in)
        return jax.random.uniform(k, shape, jnp.float32, -bound, bound)

    p = {}
    p["w1"] = u(ks[0], (out_1, 1, 5, 5), 1 * 5 * 5)
    p["b1"] = u(ks[1], (out_1,), 1 * 5 * 5)          # unused: cancels under training-mode BN
    p["g1"] = jnp.ones((out_1,), jnp.float32)
    p["be1"] = jnp.zeros((out_1,), jnp.float32)

    p["w2"] = u(ks[2], (out_2, out_1, 5, 5), out_1 * 5 * 5)
    p["b2"] = u(ks[3], (out_2,), out_1 * 5 * 5)      # unused: cancels under training-mode BN
    p["g2"] = jnp.ones((out_2,), jnp.float32)
    p["be2"] = jnp.zeros((out_2,), jnp.float32)

    feat = out_2 * 4 * 4
    p["wf"] = u(ks[4], (num_classes, feat), feat)
    p["bf"] = u(ks[5], (num_classes,), feat)         # unused: cancels under training-mode BN
    p["gf"] = jnp.ones((num_classes,), jnp.float32)
    p["bef"] = jnp.zeros((num_classes,), jnp.float32)
    return p


if __name__ == "__main__":
    key = jax.random.PRNGKey(0)
    k_x, k_p = jax.random.split(key)

    # fc1 expects out_2*4*4 features => 16x16 spatial input, 1 channel (NCHW).
    x = jax.random.normal(k_x, (2, 1, 16, 16), jnp.float32)
    params = init_params(k_p)

    out = cnn_batch_forward(x, params)
    jax.block_until_ready(out)
    assert out.shape == (2, 10) and out.dtype == jnp.float32
    assert bool(jnp.all(jnp.isfinite(out)))
    print("KERNEL_OK")
</pallas_src>

<mosaic_0001>
module attributes {stable_mosaic.version = 11 : i64} {
  func.func @kernel(%arg0: memref<1x800xf32, #tpu.memory_space<vmem>>, %arg1: memref<16x25xf32, #tpu.memory_space<vmem>>, %arg2: memref<16x1xf32, #tpu.memory_space<vmem>>, %arg3: memref<16x1xf32, #tpu.memory_space<vmem>>, %arg4: memref<1x716xbf16, #tpu.memory_space<vmem>>, %arg5: memref<295x144xbf16, #tpu.memory_space<vmem>>, %arg6: memref<32x400xf32, #tpu.memory_space<vmem>>, %arg7: memref<32x1xf32, #tpu.memory_space<vmem>>, %arg8: memref<32x1xf32, #tpu.memory_space<vmem>>, %arg9: memref<1x236xbf16, #tpu.memory_space<vmem>>, %arg10: memref<79x512xbf16, #tpu.memory_space<vmem>>, %arg11: memref<32x512xbf16, #tpu.memory_space<vmem>>, %arg12: memref<512x10xf32, #tpu.memory_space<vmem>>, %arg13: memref<1x10xf32, #tpu.memory_space<vmem>>, %arg14: memref<1x10xf32, #tpu.memory_space<vmem>>, %arg15: memref<2x10xf32, #tpu.memory_space<vmem>>) attributes {dimension_semantics = [], scalar_prefetch = 0 : i64, scratch_operands = 0 : i64, tpu.core_type = #tpu.core_type<tc>} {
    %c0 = arith.constant 0 : index
    %c0_0 = arith.constant 0 : index
    %0 = vector.load %arg0[%c0, %c0_0] : memref<1x800xf32, #tpu.memory_space<vmem>>, vector<1x800xf32>
    %c0_1 = arith.constant 0 : index
    %c0_2 = arith.constant 0 : index
    %1 = vector.load %arg1[%c0_1, %c0_2] : memref<16x25xf32, #tpu.memory_space<vmem>>, vector<16x25xf32>
    %2 = vector.extract_strided_slice %0 {offsets = [0, 0], sizes = [1, 716], strides = [1, 1]} : vector<1x800xf32> to vector<1x716xf32>
    %3 = vector.extract_strided_slice %0 {offsets = [0, 1], sizes = [1, 716], strides = [1, 1]} : vector<1x800xf32> to vector<1x716xf32>
    %4 = vector.extract_strided_slice %0 {offsets = [0, 2], sizes = [1, 716], strides = [1, 1]} : vector<1x800xf32> to vector<1x716xf32>
    %5 = vector.extract_strided_slice %0 {offsets = [0, 3], sizes = [1, 716], strides = [1, 1]} : vector<1x800xf32> to vector<1x716xf32>
    %6 = vector.extract_strided_slice %0 {offsets = [0, 4], sizes = [1, 716], strides = [1, 1]} : vector<1x800xf32> to vector<1x716xf32>
    %7 = vector.extract_strided_slice %0 {offsets = [0, 20], sizes = [1, 716], strides = [1, 1]} : vector<1x800xf32> to vector<1x716xf32>
    %8 = vector.extract_strided_slice %0 {offsets = [0, 21], sizes = [1, 716], strides = [1, 1]} : vector<1x800xf32> to vector<1x716xf32>
    %9 = vector.extract_strided_slice %0 {offsets = [0, 22], sizes = [1, 716], strides = [1, 1]} : vector<1x800xf32> to vector<1x716xf32>
    %10 = vector.extract_strided_slice %0 {offsets = [0, 23], sizes = [1, 716], strides = [1, 1]} : vector<1x800xf32> to vector<1x716xf32>
    %11 = vector.extract_strided_slice %0 {offsets = [0, 24], sizes = [1, 716], strides = [1, 1]} : vector<1x800xf32> to vector<1x716xf32>
    %12 = vector.extract_strided_slice %0 {offsets = [0, 40], sizes = [1, 716], strides = [1, 1]} : vector<1x800xf32> to vector<1x716xf32>
    %13 = vector.extract_strided_slice %0 {offsets = [0, 41], sizes = [1, 716], strides = [1, 1]} : vector<1x800xf32> to vector<1x716xf32>
    %14 = vector.extract_strided_slice %0 {offsets = [0, 42], sizes = [1, 716], strides = [1, 1]} : vector<1x800xf32> to vector<1x716xf32>
    %15 = vector.extract_strided_slice %0 {offsets = [0, 43], sizes = [1, 716], strides = [1, 1]} : vector<1x800xf32> to vector<1x716xf32>
    %16 = vector.extract_strided_slice %0 {offsets = [0, 44], sizes = [1, 716], strides = [1, 1]} : vector<1x800xf32> to vector<1x716xf32>
    %17 = vector.extract_strided_slice %0 {offsets = [0, 60], sizes = [1, 716], strides = [1, 1]} : vector<1x800xf32> to vector<1x716xf32>
    %18 = vector.extract_strided_slice %0 {offsets = [0, 61], sizes = [1, 716], strides = [1, 1]} : vector<1x800xf32> to vector<1x716xf32>
    %19 = vector.extract_strided_slice %0 {offsets = [0, 62], sizes = [1, 716], strides = [1, 1]} : vector<1x800xf32> to vector<1x716xf32>
    %20 = vector.extract_strided_slice %0 {offsets = [0, 63], sizes = [1, 716], strides = [1, 1]} : vector<1x800xf32> to vector<1x716xf32>
    %21 = vector.extract_strided_slice %0 {offsets = [0, 64], sizes = [1, 716], strides = [1, 1]} : vector<1x800xf32> to vector<1x716xf32>
    %22 = vector.extract_strided_slice %0 {offsets = [0, 80], sizes = [1, 716], strides = [1, 1]} : vector<1x800xf32> to vector<1x716xf32>
    %23 = vector.extract_strided_slice %0 {offsets = [0, 81], sizes = [1, 716], strides = [1, 1]} : vector<1x800xf32> to vector<1x716xf32>
    %24 = vector.extract_strided_slice %0 {offsets = [0, 82], sizes = [1, 716], strides = [1, 1]} : vector<1x800xf32> to vector<1x716xf32>
    %25 = vector.extract_strided_slice %0 {offsets = [0, 83], sizes = [1, 716], strides = [1, 1]} : vector<1x800xf32> to vector<1x716xf32>
    %26 = vector.extract_strided_slice %0 {offsets = [0, 84], sizes = [1, 716], strides = [1, 1]} : vector<1x800xf32> to vector<1x716xf32>
    %27 = tpu.concatenate %2, %3, %4, %5, %6, %7, %8, %9, %10, %11, %12, %13, %14, %15, %16, %17 in 0 : vector<1x716xf32>, vector<1x716xf32>, vector<1x716xf32>, vector<1x716xf32>, vector<1x716xf32>, vector<1x716xf32>, vector<1x716xf32>, vector<1x716xf32>, vector<1x716xf32>, vector<1x716xf32>, vector<1x716xf32>, vector<1x716xf32>, vector<1x716xf32>, vector<1x716xf32>, vector<1x716xf32>, vector<1x716xf32> -> vector<16x716xf32>
    %28 = tpu.concatenate %18, %19, %20, %21, %22, %23, %24, %25, %26 in 0 : vector<1x716xf32>, vector<1x716xf32>, vector<1x716xf32>, vector<1x716xf32>, vector<1x716xf32>, vector<1x716xf32>, vector<1x716xf32>, vector<1x716xf32>, vector<1x716xf32> -> vector<9x716xf32>
    %29 = tpu.concatenate %27, %28 in 0 : vector<16x716xf32>, vector<9x716xf32> -> vector<25x716xf32>
    %cst = arith.constant dense<0.000000e+00> : vector<16x716xf32>
    %30 = tpu.matmul %1, %29, %cst {dimension_numbers = #tpu.dot_dimension_numbers<[1], [0], [0], [1], [0, 0, 1, 1], [], []>} : vector<16x25xf32>, vector<25x716xf32>, vector<16x716xf32> -> vector<16x716xf32>
    %c0_3 = arith.constant 0 : index
    %c0_4 = arith.constant 0 : index
    %31 = vector.load %arg4[%c0_3, %c0_4] : memref<1x716xbf16, #tpu.memory_space<vmem>>, vector<1x716xbf16>
    %32 = arith.extf %31 : vector<1x716xbf16> to vector<1x716xf32>
    %c0_5 = arith.constant 0 : index
    %c0_6 = arith.constant 0 : index
    %33 = vector.load %arg2[%c0_5, %c0_6] : memref<16x1xf32, #tpu.memory_space<vmem>>, vector<16x1xf32>
    %c0_7 = arith.constant 0 : index
    %c0_8 = arith.constant 0 : index
    %34 = vector.load %arg3[%c0_7, %c0_8] : memref<16x1xf32, #tpu.memory_space<vmem>>, vector<16x1xf32>
    %35 = vector.broadcast %32 : vector<1x716xf32> to vector<16x716xf32>
    %36 = arith.mulf %30, %35 : vector<16x716xf32>
    %cst_9 = arith.constant dense<0.000000e+00> : vector<16xf32>
    %37 = vector.multi_reduction <add>, %36, %cst_9 [1] : vector<16x716xf32> to vector<16xf32>
    %38 = vector.shape_cast %37 : vector<16xf32> to vector<16x1xf32>
    %cst_10 = arith.constant 0.001953125 : f32
    %39 = vector.broadcast %cst_10 : f32 to vector<16x1xf32>
    %40 = arith.mulf %38, %39 : vector<16x1xf32>
    %41 = arith.mulf %36, %30 : vector<16x716xf32>
    %cst_11 = arith.constant dense<0.000000e+00> : vector<16xf32>
    %42 = vector.multi_reduction <add>, %41, %cst_11 [1] : vector<16x716xf32> to vector<16xf32>
    %43 = vector.shape_cast %42 : vector<16xf32> to vector<16x1xf32>
    %cst_12 = arith.constant 0.001953125 : f32
    %44 = vector.broadcast %cst_12 : f32 to vector<16x1xf32>
    %45 = arith.mulf %43, %44 : vector<16x1xf32>
    %46 = arith.mulf %40, %40 : vector<16x1xf32>
    %47 = arith.subf %45, %46 : vector<16x1xf32>
    %cst_13 = arith.constant 0.000000e+00 : f32
    %48 = vector.broadcast %cst_13 : f32 to vector<16x1xf32>
    %49 = arith.maximumf %47, %48 : vector<16x1xf32>
    %50 = vector.broadcast %40 : vector<16x1xf32> to vector<16x716xf32>
    %51 = arith.subf %30, %50 : vector<16x716xf32>
    %cst_14 = arith.constant 9.99999974E-6 : f32
    %52 = vector.broadcast %cst_14 : f32 to vector<16x1xf32>
    %53 = arith.addf %49, %52 : vector<16x1xf32>
    %54 = math.rsqrt %53 : vector<16x1xf32>
    %55 = vector.broadcast %54 : vector<16x1xf32> to vector<16x716xf32>
    %56 = arith.mulf %51, %55 : vector<16x716xf32>
    %57 = vector.broadcast %33 : vector<16x1xf32> to vector<16x716xf32>
    %58 = arith.mulf %56, %57 : vector<16x716xf32>
    %59 = vector.broadcast %34 : vector<16x1xf32> to vector<16x716xf32>
    %60 = arith.addf %58, %59 : vector<16x716xf32>
    %cst_15 = arith.constant 0.000000e+00 : f32
    %61 = vector.broadcast %cst_15 : f32 to vector<16x716xf32>
    %62 = arith.maximumf %60, %61 : vector<16x716xf32>
    %63 = vector.extract_strided_slice %62 {offsets = [0, 0], sizes = [16, 695], strides = [1, 1]} : vector<16x716xf32> to vector<16x695xf32>
    %64 = vector.extract_strided_slice %62 {offsets = [0, 1], sizes = [16, 695], strides = [1, 1]} : vector<16x716xf32> to vector<16x695xf32>
    %65 = arith.maximumf %63, %64 : vector<16x695xf32>
    %66 = vector.extract_strided_slice %62 {offsets = [0, 20], sizes = [16, 695], strides = [1, 1]} : vector<16x716xf32> to vector<16x695xf32>
    %67 = vector.extract_strided_slice %62 {offsets = [0, 21], sizes = [16, 695], strides = [1, 1]} : vector<16x716xf32> to vector<16x695xf32>
    %68 = arith.maximumf %66, %67 : vector<16x695xf32>
    %69 = arith.maximumf %65, %68 : vector<16x695xf32>
    %c0_16 = arith.constant 0 : index
    %c0_17 = arith.constant 0 : index
    %70 = vector.load %arg5[%c0_16, %c0_17] : memref<295x144xbf16, #tpu.memory_space<vmem>>, vector<295x144xbf16>
    %71 = arith.extf %70 : vector<295x144xbf16> to vector<295x144xf32>
    %72 = vector.extract_strided_slice %69 {offsets = [0, 0], sizes = [16, 295], strides = [1, 1]} : vector<16x695xf32> to vector<16x295xf32>
    %cst_18 = arith.constant dense<0.000000e+00> : vector<16x144xf32>
    %73 = tpu.matmul %72, %71, %cst_18 {dimension_numbers = #tpu.dot_dimension_numbers<[1], [0], [0], [1], [0, 0, 1, 1], [], []>} : vector<16x295xf32>, vector<295x144xf32>, vector<16x144xf32> -> vector<16x144xf32>
    %74 = vector.extract_strided_slice %69 {offsets = [0, 400], sizes = [16, 295], strides = [1, 1]} : vector<16x695xf32> to vector<16x295xf32>
    %cst_19 = arith.constant dense<0.000000e+00> : vector<16x144xf32>
    %75 = tpu.matmul %74, %71, %cst_19 {dimension_numbers = #tpu.dot_dimension_numbers<[1], [0], [0], [1], [0, 0, 1, 1], [], []>} : vector<16x295xf32>, vector<295x144xf32>, vector<16x144xf32> -> vector<16x144xf32>
    %76 = tpu.concatenate %73, %75 in 1 : vector<16x144xf32>, vector<16x144xf32> -> vector<16x288xf32>
    %c0_20 = arith.constant 0 : index
    %c0_21 = arith.constant 0 : index
    %77 = vector.load %arg6[%c0_20, %c0_21] : memref<32x400xf32, #tpu.memory_space<vmem>>, vector<32x400xf32>
    %78 = vector.extract_strided_slice %76 {offsets = [0, 0], sizes = [16, 236], strides = [1, 1]} : vector<16x288xf32> to vector<16x236xf32>
    %79 = vector.extract_strided_slice %76 {offsets = [0, 1], sizes = [16, 236], strides = [1, 1]} : vector<16x288xf32> to vector<16x236xf32>
    %80 = vector.extract_strided_slice %76 {offsets = [0, 2], sizes = [16, 236], strides = [1, 1]} : vector<16x288xf32> to vector<16x236xf32>
    %81 = vector.extract_strided_slice %76 {offsets = [0, 3], sizes = [16, 236], strides = [1, 1]} : vector<16x288xf32> to vector<16x236xf32>
    %82 = vector.extract_strided_slice %76 {offsets = [0, 4], sizes = [16, 236], strides = [1, 1]} : vector<16x288xf32> to vector<16x236xf32>
    %83 = vector.extract_strided_slice %76 {offsets = [0, 12], sizes = [16, 236], strides = [1, 1]} : vector<16x288xf32> to vector<16x236xf32>
    %84 = vector.extract_strided_slice %76 {offsets = [0, 13], sizes = [16, 236], strides = [1, 1]} : vector<16x288xf32> to vector<16x236xf32>
    %85 = vector.extract_strided_slice %76 {offsets = [0, 14], sizes = [16, 236], strides = [1, 1]} : vector<16x288xf32> to vector<16x236xf32>
    %86 = vector.extract_strided_slice %76 {offsets = [0, 15], sizes = [16, 236], strides = [1, 1]} : vector<16x288xf32> to vector<16x236xf32>
    %87 = vector.extract_strided_slice %76 {offsets = [0, 16], sizes = [16, 236], strides = [1, 1]} : vector<16x288xf32> to vector<16x236xf32>
    %88 = vector.extract_strided_slice %76 {offsets = [0, 24], sizes = [16, 236], strides = [1, 1]} : vector<16x288xf32> to vector<16x236xf32>
    %89 = vector.extract_strided_slice %76 {offsets = [0, 25], sizes = [16, 236], strides = [1, 1]} : vector<16x288xf32> to vector<16x236xf32>
    %90 = vector.extract_strided_slice %76 {offsets = [0, 26], sizes = [16, 236], strides = [1, 1]} : vector<16x288xf32> to vector<16x236xf32>
    %91 = vector.extract_strided_slice %76 {offsets = [0, 27], sizes = [16, 236], strides = [1, 1]} : vector<16x288xf32> to vector<16x236xf32>
    %92 = vector.extract_strided_slice %76 {offsets = [0, 28], sizes = [16, 236], strides = [1, 1]} : vector<16x288xf32> to vector<16x236xf32>
    %93 = vector.extract_strided_slice %76 {offsets = [0, 36], sizes = [16, 236], strides = [1, 1]} : vector<16x288xf32> to vector<16x236xf32>
    %94 = vector.extract_strided_slice %76 {offsets = [0, 37], sizes = [16, 236], strides = [1, 1]} : vector<16x288xf32> to vector<16x236xf32>
    %95 = vector.extract_strided_slice %76 {offsets = [0, 38], sizes = [16, 236], strides = [1, 1]} : vector<16x288xf32> to vector<16x236xf32>
    %96 = vector.extract_strided_slice %76 {offsets = [0, 39], sizes = [16, 236], strides = [1, 1]} : vector<16x288xf32> to vector<16x236xf32>
    %97 = vector.extract_strided_slice %76 {offsets = [0, 40], sizes = [16, 236], strides = [1, 1]} : vector<16x288xf32> to vector<16x236xf32>
    %98 = vector.extract_strided_slice %76 {offsets = [0, 48], sizes = [16, 236], strides = [1, 1]} : vector<16x288xf32> to vector<16x236xf32>
    %99 = vector.extract_strided_slice %76 {offsets = [0, 49], sizes = [16, 236], strides = [1, 1]} : vector<16x288xf32> to vector<16x236xf32>
    %100 = vector.extract_strided_slice %76 {offsets = [0, 50], sizes = [16, 236], strides = [1, 1]} : vector<16x288xf32> to vector<16x236xf32>
    %101 = vector.extract_strided_slice %76 {offsets = [0, 51], sizes = [16, 236], strides = [1, 1]} : vector<16x288xf32> to vector<16x236xf32>
    %102 = vector.extract_strided_slice %76 {offsets = [0, 52], sizes = [16, 236], strides = [1, 1]} : vector<16x288xf32> to vector<16x236xf32>
    %103 = tpu.concatenate %78, %79, %80, %81, %82, %83, %84, %85, %86, %87, %88, %89, %90, %91, %92, %93 in 0 : vector<16x236xf32>, vector<16x236xf32>, vector<16x236xf32>, vector<16x236xf32>, vector<16x236xf32>, vector<16x236xf32>, vector<16x236xf32>, vector<16x236xf32>, vector<16x236xf32>, vector<16x236xf32>, vector<16x236xf32>, vector<16x236xf32>, vector<16x236xf32>, vector<16x236xf32>, vector<16x236xf32>, vector<16x236xf32> -> vector<256x236xf32>
    %104 = tpu.concatenate %94, %95, %96, %97, %98, %99, %100, %101, %102 in 0 : vector<16x236xf32>, vector<16x236xf32>, vector<16x236xf32>, vector<16x236xf32>, vector<16x236xf32>, vector<16x236xf32>, vector<16x236xf32>, vector<16x236xf32>, vector<16x236xf32> -> vector<144x236xf32>
    %105 = tpu.concatenate %103, %104 in 0 : vector<256x236xf32>, vector<144x236xf32> -> vector<400x236xf32>
    %cst_22 = arith.constant dense<0.000000e+00> : vector<32x236xf32>
    %106 = tpu.matmul %77, %105, %cst_22 {dimension_numbers = #tpu.dot_dimension_numbers<[1], [0], [0], [1], [0, 0, 1, 1], [], []>} : vector<32x400xf32>, vector<400x236xf32>, vector<32x236xf32> -> vector<32x236xf32>
    %c0_23 = arith.constant 0 : index
    %c0_24 = arith.constant 0 : index
    %107 = vector.load %arg9[%c0_23, %c0_24] : memref<1x236xbf16, #tpu.memory_space<vmem>>, vector<1x236xbf16>
    %108 = arith.extf %107 : vector<1x236xbf16> to vector<1x236xf32>
    %c0_25 = arith.constant 0 : index
    %c0_26 = arith.constant 0 : index
    %109 = vector.load %arg7[%c0_25, %c0_26] : memref<32x1xf32, #tpu.memory_space<vmem>>, vector<32x1xf32>
    %c0_27 = arith.constant 0 : index
    %c0_28 = arith.constant 0 : index
    %110 = vector.load %arg8[%c0_27, %c0_28] : memref<32x1xf32, #tpu.memory_space<vmem>>, vector<32x1xf32>
    %111 = vector.broadcast %108 : vector<1x236xf32> to vector<32x236xf32>
    %112 = arith.mulf %106, %111 : vector<32x236xf32>
    %cst_29 = arith.constant dense<0.000000e+00> : vector<32xf32>
    %113 = vector.multi_reduction <add>, %112, %cst_29 [1] : vector<32x236xf32> to vector<32xf32>
    %114 = vector.shape_cast %113 : vector<32xf32> to vector<32x1xf32>
    %cst_30 = arith.constant 7.812500e-03 : f32
    %115 = vector.broadcast %cst_30 : f32 to vector<32x1xf32>
    %116 = arith.mulf %114, %115 : vector<32x1xf32>
    %117 = arith.mulf %112, %106 : vector<32x236xf32>
    %cst_31 = arith.constant dense<0.000000e+00> : vector<32xf32>
    %118 = vector.multi_reduction <add>, %117, %cst_31 [1] : vector<32x236xf32> to vector<32xf32>
    %119 = vector.shape_cast %118 : vector<32xf32> to vector<32x1xf32>
    %cst_32 = arith.constant 7.812500e-03 : f32
    %120 = vector.broadcast %cst_32 : f32 to vector<32x1xf32>
    %121 = arith.mulf %119, %120 : vector<32x1xf32>
    %122 = arith.mulf %116, %116 : vector<32x1xf32>
    %123 = arith.subf %121, %122 : vector<32x1xf32>
    %cst_33 = arith.constant 0.000000e+00 : f32
    %124 = vector.broadcast %cst_33 : f32 to vector<32x1xf32>
    %125 = arith.maximumf %123, %124 : vector<32x1xf32>
    %126 = vector.broadcast %116 : vector<32x1xf32> to vector<32x236xf32>
    %127 = arith.subf %106, %126 : vector<32x236xf32>
    %cst_34 = arith.constant 9.99999974E-6 : f32
    %128 = vector.broadcast %cst_34 : f32 to vector<32x1xf32>
    %129 = arith.addf %125, %128 : vector<32x1xf32>
    %130 = math.rsqrt %129 : vector<32x1xf32>
    %131 = vector.broadcast %130 : vector<32x1xf32> to vector<32x236xf32>
    %132 = arith.mulf %127, %131 : vector<32x236xf32>
    %133 = vector.broadcast %109 : vector<32x1xf32> to vector<32x236xf32>
    %134 = arith.mulf %132, %133 : vector<32x236xf32>
    %135 = vector.broadcast %110 : vector<32x1xf32> to vector<32x236xf32>
    %136 = arith.addf %134, %135 : vector<32x236xf32>
    %cst_35 = arith.constant 0.000000e+00 : f32
    %137 = vector.broadcast %cst_35 : f32 to vector<32x236xf32>
    %138 = arith.maximumf %136, %137 : vector<32x236xf32>
    %139 = vector.extract_strided_slice %138 {offsets = [0, 0], sizes = [32, 223], strides = [1, 1]} : vector<32x236xf32> to vector<32x223xf32>
    %140 = vector.extract_strided_slice %138 {offsets = [0, 1], sizes = [32, 223], strides = [1, 1]} : vector<32x236xf32> to vector<32x223xf32>
    %141 = arith.maximumf %139, %140 : vector<32x223xf32>
    %142 = vector.extract_strided_slice %138 {offsets = [0, 12], sizes = [32, 223], strides = [1, 1]} : vector<32x236xf32> to vector<32x223xf32>
    %143 = vector.extract_strided_slice %138 {offsets = [0, 13], sizes = [32, 223], strides = [1, 1]} : vector<32x236xf32> to vector<32x223xf32>
    %144 = arith.maximumf %142, %143 : vector<32x223xf32>
    %145 = arith.maximumf %141, %144 : vector<32x223xf32>
    %c0_36 = arith.constant 0 : index
    %c0_37 = arith.constant 0 : index
    %146 = vector.load %arg10[%c0_36, %c0_37] : memref<79x512xbf16, #tpu.memory_space<vmem>>, vector<79x512xbf16>
    %147 = arith.extf %146 : vector<79x512xbf16> to vector<79x512xf32>
    %c0_38 = arith.constant 0 : index
    %c0_39 = arith.constant 0 : index
    %148 = vector.load %arg11[%c0_38, %c0_39] : memref<32x512xbf16, #tpu.memory_space<vmem>>, vector<32x512xbf16>
    %149 = arith.extf %148 : vector<32x512xbf16> to vector<32x512xf32>
    %cst_40 = arith.constant 1.000000e+00 : f32
    %150 = vector.broadcast %cst_40 : f32 to vector<1x32xf32>
    %151 = vector.extract_strided_slice %145 {offsets = [0, 0], sizes = [32, 79], strides = [1, 1]} : vector<32x223xf32> to vector<32x79xf32>
    %cst_41 = arith.constant dense<0.000000e+00> : vector<32x512xf32>
    %152 = tpu.matmul %151, %147, %cst_41 {dimension_numbers = #tpu.dot_dimension_numbers<[1], [0], [0], [1], [0, 0, 1, 1], [], []>} : vector<32x79xf32>, vector<79x512xf32>, vector<32x512xf32> -> vector<32x512xf32>
    %153 = arith.mulf %152, %149 : vector<32x512xf32>
    %cst_42 = arith.constant dense<0.000000e+00> : vector<1x512xf32>
    %154 = tpu.matmul %150, %153, %cst_42 {dimension_numbers = #tpu.dot_dimension_numbers<[1], [0], [0], [1], [0, 0, 1, 1], [], []>} : vector<1x32xf32>, vector<32x512xf32>, vector<1x512xf32> -> vector<1x512xf32>
    %155 = vector.extract_strided_slice %145 {offsets = [0, 144], sizes = [32, 79], strides = [1, 1]} : vector<32x223xf32> to vector<32x79xf32>
    %cst_43 = arith.constant dense<0.000000e+00> : vector<32x512xf32>
    %156 = tpu.matmul %155, %147, %cst_43 {dimension_numbers = #tpu.dot_dimension_numbers<[1], [0], [0], [1], [0, 0, 1, 1], [], []>} : vector<32x79xf32>, vector<79x512xf32>, vector<32x512xf32> -> vector<32x512xf32>
    %157 = arith.mulf %156, %149 : vector<32x512xf32>
    %cst_44 = arith.constant dense<0.000000e+00> : vector<1x512xf32>
    %158 = tpu.matmul %150, %157, %cst_44 {dimension_numbers = #tpu.dot_dimension_numbers<[1], [0], [0], [1], [0, 0, 1, 1], [], []>} : vector<1x32xf32>, vector<32x512xf32>, vector<1x512xf32> -> vector<1x512xf32>
    %159 = tpu.concatenate %154, %158 in 0 : vector<1x512xf32>, vector<1x512xf32> -> vector<2x512xf32>
    %c0_45 = arith.constant 0 : index
    %c0_46 = arith.constant 0 : index
    %160 = vector.load %arg12[%c0_45, %c0_46] : memref<512x10xf32, #tpu.memory_space<vmem>>, vector<512x10xf32>
    %cst_47 = arith.constant dense<0.000000e+00> : vector<2x10xf32>
    %161 = tpu.matmul %159, %160, %cst_47 {dimension_numbers = #tpu.dot_dimension_numbers<[1], [0], [0], [1], [0, 0, 1, 1], [], []>} : vector<2x512xf32>, vector<512x10xf32>, vector<2x10xf32> -> vector<2x10xf32>
    %cst_48 = arith.constant 1.000000e+00 : f32
    %162 = vector.broadcast %cst_48 : f32 to vector<1x2xf32>
    %cst_49 = arith.constant dense<0.000000e+00> : vector<1x10xf32>
    %163 = tpu.matmul %162, %161, %cst_49 {dimension_numbers = #tpu.dot_dimension_numbers<[1], [0], [0], [1], [0, 0, 1, 1], [], []>} : vector<1x2xf32>, vector<2x10xf32>, vector<1x10xf32> -> vector<1x10xf32>
    %cst_50 = arith.constant 5.000000e-01 : f32
    %164 = vector.broadcast %cst_50 : f32 to vector<1x10xf32>
    %165 = arith.mulf %163, %164 : vector<1x10xf32>
    %166 = arith.mulf %161, %161 : vector<2x10xf32>
    %cst_51 = arith.constant dense<0.000000e+00> : vector<1x10xf32>
    %167 = tpu.matmul %162, %166, %cst_51 {dimension_numbers = #tpu.dot_dimension_numbers<[1], [0], [0], [1], [0, 0, 1, 1], [], []>} : vector<1x2xf32>, vector<2x10xf32>, vector<1x10xf32> -> vector<1x10xf32>
    %cst_52 = arith.constant 5.000000e-01 : f32
    %168 = vector.broadcast %cst_52 : f32 to vector<1x10xf32>
    %169 = arith.mulf %167, %168 : vector<1x10xf32>
    %170 = arith.mulf %165, %165 : vector<1x10xf32>
    %171 = arith.subf %169, %170 : vector<1x10xf32>
    %cst_53 = arith.constant 0.000000e+00 : f32
    %172 = vector.broadcast %cst_53 : f32 to vector<1x10xf32>
    %173 = arith.maximumf %171, %172 : vector<1x10xf32>
    %174 = vector.broadcast %165 : vector<1x10xf32> to vector<2x10xf32>
    %175 = arith.subf %161, %174 : vector<2x10xf32>
    %cst_54 = arith.constant 9.99999974E-6 : f32
    %176 = vector.broadcast %cst_54 : f32 to vector<1x10xf32>
    %177 = arith.addf %173, %176 : vector<1x10xf32>
    %178 = math.rsqrt %177 : vector<1x10xf32>
    %179 = vector.broadcast %178 : vector<1x10xf32> to vector<2x10xf32>
    %180 = arith.mulf %175, %179 : vector<2x10xf32>
    %c0_55 = arith.constant 0 : index
    %c0_56 = arith.constant 0 : index
    %181 = vector.load %arg13[%c0_55, %c0_56] : memref<1x10xf32, #tpu.memory_space<vmem>>, vector<1x10xf32>
    %182 = vector.broadcast %181 : vector<1x10xf32> to vector<2x10xf32>
    %183 = arith.mulf %180, %182 : vector<2x10xf32>
    %c0_57 = arith.constant 0 : index
    %c0_58 = arith.constant 0 : index
    %184 = vector.load %arg14[%c0_57, %c0_58] : memref<1x10xf32, #tpu.memory_space<vmem>>, vector<1x10xf32>
    %185 = vector.broadcast %184 : vector<1x10xf32> to vector<2x10xf32>
    %186 = arith.addf %183, %185 : vector<2x10xf32>
    %c0_59 = arith.constant 0 : index
    %c0_60 = arith.constant 0 : index
    %187 = vector.load %arg15[%c0_59, %c0_60] : memref<2x10xf32, #tpu.memory_space<vmem>>, vector<2x10xf32>
    tpu.vector_store %arg15[%c0_59, %c0_60], %186 {strides = array<i32>} : memref<2x10xf32, #tpu.memory_space<vmem>>, vector<2x10xf32>,
    return
  }
}

</mosaic_0001>

<bundles_post_ra>
// kernel: cnn_batch_forward.1
= control target key start
LH: loop header
LB: loop body
LE: loop exit
PB: predicated region body
PF: predicated region fallthrough
CT: control target
= control target key end

     0   :  { %v55_v0 = vlaneseq  ;;  %s7711_s0 = inlined_call_operand.vmem [shape: f32[1,800], index: 0, kind: input, shape index: {}]   ;;  %s7712_s1 = inlined_call_operand.vmem [shape: f32[16,25], index: 1, kind: input, shape index: {}]   ;;  %s7713_s2 = inlined_call_operand.vmem [shape: f32[16,1], index: 2, kind: input, shape index: {}]   ;;  %s7714_s3 = inlined_call_operand.vmem [shape: f32[16,1], index: 3, kind: input, shape index: {}]   ;;  %s7715_s4 = inlined_call_operand.vmem [shape: bf16[1,716], index: 4, kind: input, shape index: {}]   ;;  %s7716_s5 = inlined_call_operand.vmem [shape: bf16[295,144], index: 5, kind: input, shape index: {}]   ;;  %s7717_s6 = inlined_call_operand.vmem [shape: f32[32,400], index: 6, kind: input, shape index: {}]   ;;  %s7718_s7 = inlined_call_operand.vmem [shape: f32[32,1], index: 7, kind: input, shape index: {}]   ;;  %s7719_s8 = inlined_call_operand.vmem [shape: f32[32,1], index: 8, kind: input, shape index: {}]   ;;  %s7720_s9 = inlined_call_operand.vmem [shape: bf16[1,236], index: 9, kind: input, shape index: {}]   ;;  %s7721_s10 = inlined_call_operand.vmem [shape: bf16[79,512], index: 10, kind: input, shape index: {}]   ;;  %s7722_s11 = inlined_call_operand.vmem [shape: bf16[32,512], index: 11, kind: input, shape index: {}]   ;;  %s7723_s12 = inlined_call_operand.vmem [shape: f32[512,10], index: 12, kind: input, shape index: {}]   ;;  %s7724_s13 = inlined_call_operand.vmem [shape: f32[1,10], index: 13, kind: input, shape index: {}]   ;;  %s7725_s14 = inlined_call_operand.vmem [shape: f32[1,10], index: 14, kind: input, shape index: {}]   ;;  %s7726_s15 = inlined_call_operand.hbm [shape: f32[2,10], index: 15, kind: output, shape index: {}]  }
   0x1   :  { %20 = vsyncpa [#allocation3], 0  ;;  %v51_v2 = vld [vmem:[%s7711_s0] sm:$0x7f]  ;;  %s4231_s20 = smov 127   ;;  %s4232_s0 = smov 126  }
   0x2   :  { %v4346_v1 = vshrl.u32 %v55_v0, 7  ;;  %s4233_s21 = smov 125   ;;  %s4234_s22 = smov 109   ;;  %vm265_vm0 = vcmask 859136   ;;  %vm7745_vm1 = vcmask 1039360   ;;  %vm452_vm2 = vcmask 1040384  }
   0x3   :  { %s4235_s23 = smov 108   ;;  %s4236_s24 = smov 107   ;;  %vm7739_vm3 = vcmask 1031168   ;;  %vm7740_vm4 = vcmask 1022976   ;;  %vm7744_vm5 = vcmask 883712   ;;  %vm459_vm6 = vcmask 1041408  }
   0x4   :  { %7850 = vst [vmem:[#allocation5_spill] sm:$0xff] %v4346_v1  ;;  %v4352_v3 = vsub.s32 0, %v4346_v1  ;;  %v69_v4 = vsub.s32 3, %v4346_v1  ;;  %v61_v5 = vsub.s32 1, %v4346_v1  ;;  %v4357_v6 = vsub.s32 2, %v4346_v1  ;;  %s4237_s25 = smov 105  }
   0x5   :  { %v7728_v11 = vsub.s32 4, %v4346_v1  ;;  %v77_v13 = vsub.s32 5, %v4346_v1  ;;  %s4238_s26 = smov 106   ;;  %v7727_v15 = vsub.s32 6, %v4346_v1  ;;  %s4239_s27 = smov 104   ;;  %vm466_vm7 = vcmask 1042432  }
   0x6   :  { %7851 = vst [vmem:[#allocation6_spill] sm:$0xff] %v4352_v3  ;;  %7852 = vst [vmem:[#allocation7_spill] sm:$0xff] %v4357_v6  ;;  %v4359_v7 = vrot.slane %v51_v2, %v69_v4  ;;  %v4361_v8 = vrot.slane %v51_v2, %v61_v5  ;;  %v4368_v9 = vrot.slane %v51_v2, %v4357_v6  ;;  %s4240_s28 = smov 88   ;;  %s4241_s29 = smov 87   ;;  %vm573_vm8 = vcmask 891904  }
   0x7   :  { %v4371_v10 = vrot.slane %v51_v2, %v4352_v3  ;;  %v4408_v12 = vrot.slane %v51_v2, %v7728_v11  ;;  %v4415_v14 = vrot.slane %v51_v2, %v77_v13  ;;  %v4452_v16 = vrot.slane %v51_v2, %v7727_v15  ;;  %s4242_s30 = smov 86   ;;  %s4243_s16 = smov 67  }
   0x8   :  { %91 = vrot.lane.b32.xlu1 %v4359_v7, %s4231_s20  ;;  %87 = vrot.lane.b32.xlu0 %v4361_v8, %s4231_s20  ;;  %s4244_s17 = smov 85   ;;  %s4245_s18 = smov 124   ;;  %vm480_vm9 = vcmask 1044480   ;;  %vm241_vm10 = vcmask 867328   ;;  %vm217_vm11 = vcmask 875520   ;;  %vm473_vm12 = vcmask 1043456  }
   0x9   :  { %s4246_s19 = smov 84   ;;  %vm494_vm13 = vcmask 1046528   ;;  %vm487_vm14 = vcmask 1045504   ;;  %vm674_vm15 = vcmask 547840  }
   0xc   :  { %89 = vrot.lane.b32.xlu0 %v4368_v9, %s4231_s20  ;;  %85 = vrot.lane.b32.xlu1 %v4371_v10, %s4231_s20 }
  0x10   :  { %111 = vrot.lane.b32.xlu0 %v4361_v8, %s4232_s0  ;;  %113 = vrot.lane.b32.xlu1 %v4368_v9, %s4232_s0 }
  0x14   :  { %115 = vrot.lane.b32.xlu0 %v4359_v7, %s4232_s0  ;;  %109 = vrot.lane.b32.xlu1 %v4371_v10, %s4232_s0 }
  0x18   :  { %135 = vrot.lane.b32.xlu0 %v4361_v8, %s4233_s21  ;;  %137 = vrot.lane.b32.xlu1 %v4368_v9, %s4233_s21 }
  0x1c   :  { %139 = vrot.lane.b32.xlu0 %v4359_v7, %s4233_s21  ;;  %133 = vrot.lane.b32.xlu1 %v4371_v10, %s4233_s21 }
  0x20   :  { %561 = vrot.lane.b32.xlu0 %v4361_v8, %s4234_s22  ;;  %563 = vrot.lane.b32.xlu1 %v4368_v9, %s4234_s22 }
  0x24   :  { %565 = vrot.lane.b32.xlu0 %v4359_v7, %s4234_s22  ;;  %183 = vrot.lane.b32.xlu1 %v4361_v8, %s4235_s23 }
  0x28   :  { %185 = vrot.lane.b32.xlu0 %v4368_v9, %s4235_s23  ;;  %187 = vrot.lane.b32.xlu1 %v4359_v7, %s4235_s23 }
  0x2c   :  { %559 = vrot.lane.b32.xlu0 %v4371_v10, %s4234_s22  ;;  %93 = vrot.lane.b32.xlu1 %v4408_v12, %s4231_s20 }
  0x30   :  { %95 = vrot.lane.b32.xlu0 %v4415_v14, %s4231_s20  ;;  %181 = vrot.lane.b32.xlu1 %v4371_v10, %s4235_s23 }
  0x34   :  { %207 = vrot.lane.b32.xlu0 %v4361_v8, %s4236_s24  ;;  %209 = vrot.lane.b32.xlu1 %v4368_v9, %s4236_s24 }
  0x38   :  { %211 = vrot.lane.b32.xlu0 %v4359_v7, %s4236_s24  ;;  %255 = vrot.lane.b32.xlu1 %v4361_v8, %s4237_s25 }
  0x3c   :  { %257 = vrot.lane.b32.xlu0 %v4368_v9, %s4237_s25  ;;  %259 = vrot.lane.b32.xlu1 %v4359_v7, %s4237_s25 }
  0x40   :  { %117 = vrot.lane.b32.xlu0 %v4408_v12, %s4232_s0  ;;  %119 = vrot.lane.b32.xlu1 %v4415_v14, %s4232_s0 }
  0x44   :  { %205 = vrot.lane.b32.xlu0 %v4371_v10, %s4236_s24  ;;  %231 = vrot.lane.b32.xlu1 %v4361_v8, %s4238_s26 }
  0x48   :  { %233 = vrot.lane.b32.xlu0 %v4368_v9, %s4238_s26  ;;  %235 = vrot.lane.b32.xlu1 %v4359_v7, %s4238_s26 }
  0x4c   :  { %253 = vrot.lane.b32.xlu0 %v4371_v10, %s4237_s25  ;;  %141 = vrot.lane.b32.xlu1 %v4408_v12, %s4233_s21 }
  0x50   :  { %143 = vrot.lane.b32.xlu0 %v4415_v14, %s4233_s21  ;;  %229 = vrot.lane.b32.xlu1 %v4371_v10, %s4238_s26 }
  0x54   :  { %544 = vrot.lane.b32.xlu0 %v4452_v16, %s4231_s20  ;;  %567 = vrot.lane.b32.xlu1 %v4408_v12, %s4234_s22 }
  0x58   :  { %569 = vrot.lane.b32.xlu0 %v4415_v14, %s4234_s22  ;;  %189 = vrot.lane.b32.xlu1 %v4408_v12, %s4235_s23 }
  0x5c   :  { %191 = vrot.lane.b32.xlu0 %v4415_v14, %s4235_s23  ;;  %549 = vrot.lane.b32.xlu1 %v4452_v16, %s4232_s0 }
  0x60   :  { %213 = vrot.lane.b32.xlu0 %v4408_v12, %s4236_s24  ;;  %215 = vrot.lane.b32.xlu1 %v4415_v14, %s4236_s24 }
  0x64   :  { %261 = vrot.lane.b32.xlu0 %v4408_v12, %s4237_s25  ;;  %263 = vrot.lane.b32.xlu1 %v4415_v14, %s4237_s25 }
  0x68   :  { %554 = vrot.lane.b32.xlu0 %v4452_v16, %s4233_s21  ;;  %237 = vrot.lane.b32.xlu1 %v4408_v12, %s4238_s26 }
  0x6c   :  { %239 = vrot.lane.b32.xlu0 %v4415_v14, %s4238_s26  ;;  %571 = vrot.lane.b32.xlu1 %v4452_v16, %s4234_s22  ;;  %s4247_s22 = smov 68  }
  0x70   :  { %587 = vrot.lane.b32.xlu0 %v4452_v16, %s4235_s23  ;;  %592 = vrot.lane.b32.xlu1 %v4452_v16, %s4236_s24  ;;  %s4261_s24 = smov 91  }
  0x74   :  { %602 = vrot.lane.b32.xlu0 %v4452_v16, %s4237_s25  ;;  %597 = vrot.lane.b32.xlu1 %v4452_v16, %s4238_s26 }
  0x78   :  { %279 = vrot.lane.b32.xlu0 %v4361_v8, %s4239_s27  ;;  %281 = vrot.lane.b32.xlu1 %v4368_v9, %s4239_s27 }
  0x7a   :  { %v4491_v17 = vpop.permute.xlu1 %91  ;;  %v4493_v18 = vpop.permute.xlu0 %87 }
  0x7c   :  { %277 = vrot.lane.b32.xlu0 %v4371_v10, %s4239_s27  ;;  %303 = vrot.lane.b32.xlu1 %v4361_v8, %s4240_s28 }
  0x7e   :  { %v4499_v19 = vpop.permute.xlu0 %89  ;;  %v4501_v20 = vpop.permute.xlu1 %85 }
  0x7f   :  { %v100_v56 = vsel %vm7745_vm1, %v4499_v19, %v4491_v17  ;;  %v99_v63 = vsel %vm7745_vm1, %v4493_v18, %v4499_v19 }
  0x80   :  { %305 = vrot.lane.b32.xlu0 %v4368_v9, %s4240_s28  ;;  %301 = vrot.lane.b32.xlu1 %v4371_v10, %s4240_s28  ;;  %v455_v61 = vsel %vm452_vm2, %v4368_v9, %v100_v56 }
  0x82   :  { %v4507_v21 = vpop.permute.xlu0 %111  ;;  %v4509_v22 = vpop.permute.xlu1 %113 }
  0x83   :  { %v123_v13 = vsel %vm7739_vm3, %v4507_v21, %v4509_v22 }
  0x84   :  { %327 = vrot.lane.b32.xlu0 %v4361_v8, %s4241_s29  ;;  %329 = vrot.lane.b32.xlu1 %v4368_v9, %s4241_s29 }
  0x86   :  { %v4515_v23 = vpop.permute.xlu0 %115  ;;  %v4517_v24 = vpop.permute.xlu1 %109 }
  0x87   :  { %v124_v59 = vsel %vm7739_vm3, %v4509_v22, %v4515_v23  ;;  %v454_v22 = vsel %vm452_vm2, %v4361_v8, %v99_v63 }
  0x88   :  { %325 = vrot.lane.b32.xlu0 %v4371_v10, %s4241_s29  ;;  %351 = vrot.lane.b32.xlu1 %v4361_v8, %s4242_s30  ;;  %v462_v0 = vsel %vm459_vm6, %v455_v61, %v124_v59 }
  0x8a   :  { %v4523_v25 = vpop.permute.xlu0 %135  ;;  %v4525_v26 = vpop.permute.xlu1 %137 }
  0x8c   :  { %353 = vrot.lane.b32.xlu0 %v4368_v9, %s4242_s30 }
  0x8e   :  { %v4529_v27 = vpop.permute.xlu0 %139  ;;  %v4531_v28 = vpop.permute.xlu1 %133 }
  0x8f   :  { %v148_v60 = vsel %vm7740_vm4, %v4525_v26, %v4529_v27 }
  0x92   :  { %v4533_v29 = vpop.permute.xlu0 %561  ;;  %v4535_v30 = vpop.permute.xlu1 %563 }
  0x96   :  { %v4537_v31 = vpop.permute.xlu0 %565  ;;  %v4539_v32 = vpop.permute.xlu1 %183 }
  0x97   :  { %v576_v62 = vsel %vm573_vm8, %v4535_v30, %v4537_v31 }
  0x9a   :  { %v4541_v33 = vpop.permute.xlu0 %185  ;;  %v4543_v34 = vpop.permute.xlu1 %187 }
  0x9b   :  { %v4628_v2 = vsel %vm7744_vm5, %v4541_v33, %v4543_v34  ;;  %v4669_v61 = vsel %vm7744_vm5, %v4539_v32, %v4541_v33 }
  0x9e   :  { %v4545_v35 = vpop.permute.xlu0 %559  ;;  %v4547_v36 = vpop.permute.xlu1 %93 }
  0xa2   :  { %v4549_v37 = vpop.permute.xlu0 %95  ;;  %v4551_v38 = vpop.permute.xlu1 %181 }
  0xa6   :  { %v4553_v39 = vpop.permute.xlu0 %207  ;;  %v4555_v40 = vpop.permute.xlu1 %209 }
  0xaa   :  { %v4557_v41 = vpop.permute.xlu0 %211  ;;  %v256_v42 = vpop.permute.xlu1 %255 }
  0xab   :  { %v4643_v19 = vsel %vm217_vm11, %v4555_v40, %v4557_v41 }
  0xae   :  { %v258_v43 = vpop.permute.xlu0 %257  ;;  %v4559_v44 = vpop.permute.xlu1 %259 }
  0xaf   :  { %v4562_v45 = vsel %vm265_vm0, %v256_v42, %v258_v43  ;;  %v4566_v46 = vsel %vm265_vm0, %v258_v43, %v4559_v44  ;;  %v147_v43 = vsel %vm7740_vm4, %v4523_v25, %v4525_v26  ;;  %v575_v26 = vsel %vm573_vm8, %v4533_v29, %v4535_v30 }
  0xb0   :  { %662 = vrot.lane.b32.xlu1 %v4562_v45, %s4243_s16  ;;  %664 = vrot.lane.b32.xlu0 %v4566_v46, %s4243_s16 }
  0xb2   :  { %v4572_v47 = vpop.permute.xlu0 %117  ;;  %v4574_v48 = vpop.permute.xlu1 %119 }
  0xb3   :  { %v125_v15 = vsel %vm7739_vm3, %v4515_v23, %v4572_v47 }
  0xb4   :  { %349 = vrot.lane.b32.xlu1 %v4371_v10, %s4242_s30  ;;  %375 = vrot.lane.b32.xlu0 %v4361_v8, %s4244_s17 }
  0xb6   :  { %v4580_v49 = vpop.permute.xlu0 %205  ;;  %v4582_v50 = vpop.permute.xlu1 %231 }
  0xb8   :  { %377 = vrot.lane.b32.xlu1 %v4368_v9, %s4244_s17 }
  0xba   :  { %v234_v51 = vpop.permute.xlu0 %233  ;;  %v4586_v52 = vpop.permute.xlu1 %235 }
  0xbb   :  { %v4652_v56 = vsel %vm241_vm10, %v234_v51, %v4586_v52 }
  0xbc   :  { %159 = vrot.lane.b32.xlu1 %v4361_v8, %s4245_s18 }
  0xbe   :  { %v254_v53 = vpop.permute.xlu0 %253  ;;  %v4590_v54 = vpop.permute.xlu1 %141 }
  0xbf   :  { %v4593_v55 = vsel %vm265_vm0, %v254_v53, %v256_v42  ;;  %v4638_v42 = vsel %vm466_vm7, %v462_v0, %v148_v60  ;;  %v461_v60 = vsel %vm459_vm6, %v454_v22, %v123_v13  ;;  %v4691_v22 = vsel %vm241_vm10, %v4582_v50, %v234_v51 }
  0xc0   :  { %283 = vrot.lane.b32.xlu1 %v4359_v7, %s4239_s27  ;;  %660 = vrot.lane.b32.xlu0 %v4593_v55, %s4243_s16  ;;  %v613_v53 = vsel %vm473_vm12, %v4638_v42, %v576_v62  ;;  %v4678_v30 = vsel %vm466_vm7, %v461_v60, %v147_v43 }
  0xc1   :  { %v620_v59 = vsel %vm480_vm9, %v613_v53, %v4628_v2  ;;  %v4683_v53 = vsel %vm217_vm11, %v4553_v39, %v4555_v40  ;;  %v612_v33 = vsel %vm473_vm12, %v4678_v30, %v575_v26 }
  0xc2   :  { %v4602_v57 = vpop.permute.xlu0 %143  ;;  %v4604_v58 = vpop.permute.xlu1 %229  ;;  %v627_v63 = vsel %vm487_vm14, %v620_v59, %v4643_v19  ;;  %v619_v43 = vsel %vm480_vm9, %v612_v33, %v4669_v61 }
  0xc3   :  { %v634_v13 = vsel %vm494_vm13, %v627_v63, %v4652_v56  ;;  %v626_v60 = vsel %vm487_vm14, %v619_v43, %v4683_v53 }
  0xc4   :  { %373 = vrot.lane.b32.xlu1 %v4371_v10, %s4244_s17  ;;  %161 = vrot.lane.b32.xlu0 %v4368_v9, %s4245_s18  ;;  %v633_v26 = vsel %vm494_vm13, %v626_v60, %v4691_v22  ;;  %v122_v60 = vsel %vm7739_vm3, %v4517_v24, %v4507_v21  ;;  %v4741_v24 = vsel %vm7744_vm5, %v4551_v38, %v4539_v32 }
  0xc5   :  { %v4760_v32 = vsel %vm241_vm10, %v4604_v58, %v4582_v50 }
  0xc6   :  { %v4630_v4 = vpop.permute.xlu0 %544  ;;  %v4632_v5 = vpop.permute.xlu1 %567 }
  0xc7   :  { %v546_v38 = vsel %vm7745_vm1, %v4549_v37, %v4630_v4 }
  0xc8   :  { %401 = vrot.lane.b32.xlu1 %v4368_v9, %s4246_s19  ;;  %285 = vrot.lane.b32.xlu0 %v4408_v12, %s4239_s27 }
  0xca   :  { %v4671_v62 = vpop.permute.xlu0 %569  ;;  %v4673_v0 = vpop.permute.xlu1 %189 }
  0xcc   :  { %399 = vrot.lane.b32.xlu0 %v4361_v8, %s4246_s19  ;;  %650 = vrot.lane.b32.xlu1 %v634_v13, %s4243_s16  ;;  %v98_v13 = vsel %vm7745_vm1, %v4501_v20, %v4493_v18  ;;  %v574_v20 = vsel %vm573_vm8, %v4545_v35, %v4533_v29 }
  0xcd   :  { %v453_v18 = vsel %vm452_vm2, %v4371_v10, %v98_v13  ;;  %v4753_v13 = vsel %vm217_vm11, %v4580_v49, %v4553_v39 }
  0xce   :  { %v4698_v40 = vpop.permute.xlu0 %191  ;;  %v4700_v59 = vpop.permute.xlu1 %549  ;;  %v460_v21 = vsel %vm459_vm6, %v453_v18, %v122_v60 }
  0xcf   :  { %7853 = vst [vmem:[#allocation8_spill] sm:$0xff] %v4698_v40  ;;  %v551_v39 = vsel %vm7739_vm3, %v4574_v48, %v4700_v59 }
  0xd0   :  { %648 = vrot.lane.b32.xlu0 %v633_v26, %s4243_s16  ;;  %307 = vrot.lane.b32.xlu1 %v4359_v7, %s4240_s28  ;;  %v146_v26 = vsel %vm7740_vm4, %v4531_v28, %v4523_v25 }
  0xd2   :  { %v4709_v51 = vpop.permute.xlu0 %213  ;;  %v4711_v63 = vpop.permute.xlu1 %215 }
  0xd3   :  { %7854 = vst [vmem:[#allocation9_spill] sm:$0xff] %v4711_v63 }
  0xd4   :  { %157 = vrot.lane.b32.xlu0 %v4371_v10, %s4245_s18  ;;  %397 = vrot.lane.b32.xlu1 %v4371_v10, %s4246_s19 }
  0xd6   :  { %v262_v33 = vpop.permute.xlu0 %261  ;;  %v4720_v43 = vpop.permute.xlu1 %263 }
  0xd8   :  { %309 = vrot.lane.b32.xlu0 %v4408_v12, %s4240_s28  ;;  %429 = vrot.lane.b32.xlu1 %v4368_v9, %s4247_s22  ;;  %v4748_v9 = vsel %vm466_vm7, %v460_v21, %v146_v26  ;;  %v605_v26 = vsel %vm452_vm2, %v4415_v14, %v546_v38 }
  0xd9   :  { %v611_v29 = vsel %vm473_vm12, %v4748_v9, %v574_v20  ;;  %v607_v20 = vsel %vm459_vm6, %v605_v26, %v551_v39  ;;  %v4813_v39 = vsel %vm265_vm0, %v262_v33, %v4720_v43 }
  0xda   :  { %v4743_v25 = vpop.permute.xlu0 %554  ;;  %v4745_v28 = vpop.permute.xlu1 %237  ;;  %v618_v35 = vsel %vm480_vm9, %v611_v29, %v4741_v24 }
  0xdb   :  { %v556_v58 = vsel %vm7740_vm4, %v4602_v57, %v4743_v25 }
  0xdc   :  { %427 = vrot.lane.b32.xlu0 %v4361_v8, %s4247_s22  ;;  %331 = vrot.lane.b32.xlu1 %v4359_v7, %s4241_s29  ;;  %v625_v8 = vsel %vm487_vm14, %v618_v35, %v4753_v13  ;;  %v609_v21 = vsel %vm466_vm7, %v607_v20, %v556_v58 }
  0xdd   :  { %v632_v60 = vsel %vm494_vm13, %v625_v8, %v4760_v32 }
  0xde   :  { %v4774_v49 = vpop.permute.xlu0 %239  ;;  %v4776_v50 = vpop.permute.xlu1 %571 }
  0xdf   :  { %7855 = vst [vmem:[#allocation10_spill] sm:$0xff] %v4774_v49  ;;  %v579_v18 = vsel %vm573_vm8, %v4671_v62, %v4776_v50  ;;  %v4888_v23 = vsel %vm241_vm10, %v4745_v28, %v4774_v49 }
  0xe0   :  { %425 = vrot.lane.b32.xlu1 %v4371_v10, %s4247_s22  ;;  %646 = vrot.lane.b32.xlu0 %v632_v60, %s4243_s16  ;;  %v616_v8 = vsel %vm473_vm12, %v609_v21, %v579_v18  ;;  %v4828_v21 = vsel %vm265_vm0, %v4559_v44, %v262_v33  ;;  %v126_v44 = vsel %vm7739_vm3, %v4572_v47, %v4574_v48  ;;  %vm7750_vm3 = vcmask 703488  }
  0xe1   :  { %v150_v33 = vsel %vm7740_vm4, %v4590_v54, %v4602_v57  ;;  %7859 = vst [vmem:[#allocation14_spill] sm:$0xff] %v4888_v23 }
  0xe2   :  { %v4795_v29 = vpop.permute.xlu0 %587  ;;  %v4797_v35 = vpop.permute.xlu1 %592 }
  0xe3   :  { %v589_v38 = vsel %vm7744_vm5, %v4698_v40, %v4795_v29  ;;  %v594_v10 = vsel %vm217_vm11, %v4711_v63, %v4797_v35 }
  0xe4   :  { %v623_v60 = vsel %vm480_vm9, %v616_v8, %v589_v38  ;;  %357 = vrot.lane.b32.xlu1 %v4408_v12, %s4242_s30  ;;  %333 = vrot.lane.b32.xlu0 %v4408_v12, %s4241_s29  ;;  %v102_v8 = vsel %vm7745_vm1, %v4547_v36, %v4549_v37 }
  0xe5   :  { %v630_v58 = vsel %vm487_vm14, %v623_v60, %v594_v10  ;;  %v457_v38 = vsel %vm452_vm2, %v4408_v12, %v102_v8  ;;  %v578_v10 = vsel %vm573_vm8, %v4632_v5, %v4671_v62  ;;  %v101_v60 = vsel %vm7745_vm1, %v4491_v17, %v4547_v36 }
  0xe6   :  { %v4816_v26 = vpop.permute.xlu1 %597  ;;  %v4874_v62 = vsel %vm217_vm11, %v4709_v51, %v4711_v63  ;;  %v149_v17 = vsel %vm7740_vm4, %v4529_v27, %v4590_v54  ;;  %v456_v47 = vsel %vm452_vm2, %v4359_v7, %v101_v60  ;;  %v577_v27 = vsel %vm573_vm8, %v4537_v31, %v4632_v5 }
  0xe7   :  { %v599_v18 = vsel %vm241_vm10, %v4774_v49, %v4816_v26  ;;  %7858 = vst [vmem:[#allocation13_spill] sm:$0xff] %v4874_v62  ;;  %v4911_v31 = vsel %vm217_vm11, %v4557_v41, %v4709_v51  ;;  %vm289_vm8 = vcmask 850944   ;;  %vm337_vm11 = vcmask 711680  }
  0xe8   :  { %355 = vrot.lane.b32.xlu0 %v4359_v7, %s4242_s30  ;;  %668 = vrot.lane.b32.xlu1 %v4813_v39, %s4243_s16  ;;  %v637_v20 = vsel %vm494_vm13, %v630_v58, %v599_v18  ;;  %v464_v58 = vsel %vm459_vm6, %v457_v38, %v126_v44  ;;  %v4863_v18 = vsel %vm7744_vm5, %v4673_v0, %v4698_v40  ;;  %v603_v38 = vpop.permute.xlu0 %602  ;;  %vm7749_vm4 = vcmask 695296  }
  0xe9   :  { %7856 = vst [vmem:[#allocation11_spill] sm:$0xff] %v4863_v18  ;;  %v4869_v8 = vsel %vm466_vm7, %v464_v58, %v150_v33  ;;  %v463_v44 = vsel %vm459_vm6, %v456_v47, %v125_v15  ;;  %v4901_v33 = vsel %vm7744_vm5, %v4543_v34, %v4673_v0  ;;  %v4920_v34 = vsel %vm241_vm10, %v4586_v52, %v4745_v28 }
  0xea   :  { %7857 = vst [vmem:[#allocation12_spill] sm:$0xff] %v4869_v8  ;;  %v615_v36 = vsel %vm473_vm12, %v4869_v8, %v578_v10  ;;  %v4906_v60 = vsel %vm466_vm7, %v463_v44, %v149_v17  ;;  %v7729_v52 = vmov 0.0   ;;  %v604_v28 = vsel %vm265_vm0, %v4720_v43, %v603_v38  ;;  %v4948_v47 = vpop.permute.xlu1 %281 }
  0xeb   :  { %v622_v54 = vsel %vm480_vm9, %v615_v36, %v4863_v18  ;;  %v614_v5 = vsel %vm473_vm12, %v4906_v60, %v577_v27  ;;  %776 = vmatprep.mubr.f32.mxu0 %v7729_v52  ;;  %853 = vmatprep.mubr.f32.mxu1 %v7729_v52  ;;  %v606_v17 = vsel %vm452_vm2, %v4452_v16, %v4630_v4  ;;  %vm169_vm0 = vcmask 1014784  }
  0xec   :  { %666 = vrot.lane.b32.xlu0 %v4828_v21, %s4243_s16  ;;  %379 = vrot.lane.b32.xlu1 %v4359_v7, %s4244_s17  ;;  %v629_v10 = vsel %vm487_vm14, %v622_v54, %v4874_v62  ;;  %v621_v41 = vsel %vm480_vm9, %v614_v5, %v4901_v33  ;;  %v4931_v58 = vpop.permute.xlu0 %279  ;;  %v608_v36 = vsel %vm459_vm6, %v606_v17, %v4700_v59  ;;  %vm313_vm10 = vcmask 719872  }
  0xed   :  { %v636_v15 = vsel %vm494_vm13, %v629_v10, %v4888_v23  ;;  %v628_v0 = vsel %vm487_vm14, %v621_v41, %v4911_v31  ;;  %v610_v27 = vsel %vm466_vm7, %v608_v36, %v4743_v25  ;;  %v291_v6 = vsel %vm289_vm8, %v4931_v58, %v4948_v47 }
  0xee   :  { %v635_v51 = vsel %vm494_vm13, %v628_v0, %v4920_v34  ;;  %v617_v4 = vsel %vm473_vm12, %v610_v27, %v4776_v50  ;;  %v304_v59 = vpop.permute.xlu1 %303  ;;  %vm409_vm5 = vcmask 687104   ;;  %vm7748_vm1 = vcmask 556032  }
  0xef   :  { %v624_v44 = vsel %vm480_vm9, %v617_v4, %v4795_v29 }
  0xf0   :  { %287 = vrot.lane.b32.xlu0 %v4415_v14, %s4239_s27  ;;  %163 = vrot.lane.b32.xlu1 %v4359_v7, %s4245_s18 }
  0xf4   :  { %381 = vrot.lane.b32.xlu0 %v4408_v12, %s4244_s17  ;;  %311 = vrot.lane.b32.xlu1 %v4415_v14, %s4240_s28 }
  0xf8   :  { %165 = vrot.lane.b32.xlu0 %v4408_v12, %s4245_s18  ;;  %405 = vrot.lane.b32.xlu1 %v4408_v12, %s4246_s19 }
  0xfc   :  { %403 = vrot.lane.b32.xlu0 %v4359_v7, %s4246_s19  ;;  %654 = vrot.lane.b32.xlu1 %v636_v15, %s4243_s16 }
 0x100   :  { %431 = vrot.lane.b32.xlu1 %v4359_v7, %s4247_s22  ;;  %652 = vrot.lane.b32.xlu0 %v635_v51, %s4243_s16  ;;  %v278_v7 = vpop.permute.xlu0 %277 }
 0x101   :  { %v290_v3 = vsel %vm289_vm8, %v278_v7, %v4931_v58  ;;  %v502_v58 = vsel %vm452_vm2, %v4562_v45, %v291_v6 }
 0x102   :  { %v501_v7 = vsel %vm452_vm2, %v4593_v55, %v290_v3 }
 0x104   :  { %670 = vrot.lane.b32.xlu1 %v604_v28, %s4243_s16  ;;  %335 = vrot.lane.b32.xlu0 %v4415_v14, %s4241_s29  ;;  %v4956_v54 = vpop.permute.xlu0 %305  ;;  %s4253_s29 = smov 115  }
 0x108   :  { %359 = vrot.lane.b32.xlu1 %v4415_v14, %s4242_s30  ;;  %433 = vrot.lane.b32.xlu0 %v4408_v12, %s4247_s22  ;;  %v631_v12 = vsel %vm487_vm14, %v624_v44, %v4797_v35  ;;  %v328_v25 = vpop.permute.xlu0 %327  ;;  %s4255_s30 = smov 116  }
 0x10c   :  { %672 = vrot.lane.b32.xlu0 %v603_v38, %s4243_s16  ;;  %656 = vrot.lane.b32.xlu1 %v637_v20, %s4243_s16  ;;  %v638_v20 = vsel %vm494_vm13, %v631_v12, %v4816_v26  ;;  %v302_v38 = vpop.permute.xlu1 %301  ;;  %v326_v50 = vpop.permute.xlu0 %325 }
 0x10d   :  { %v314_v63 = vsel %vm313_vm10, %v302_v38, %v304_v59  ;;  %v338_v8 = vsel %vm337_vm11, %v326_v50, %v328_v25 }
 0x10e   :  { %v507_v3 = vsel %vm459_vm6, %v501_v7, %v314_v63 }
 0x110   :  { %383 = vrot.lane.b32.xlu0 %v4415_v14, %s4244_s17  ;;  %167 = vrot.lane.b32.xlu1 %v4415_v14, %s4245_s18  ;;  %v4977_v29 = vpop.permute.xlu1 %329  ;;  %v4981_v35 = vpop.permute.xlu0 %353  ;;  %s4257_s17 = smov 117  }
 0x111   :  { %v339_v40 = vsel %vm337_vm11, %v328_v25, %v4977_v29 }
 0x114   :  { %658 = vrot.lane.b32.xlu0 %v638_v20, %s4243_s16  ;;  %435 = vrot.lane.b32.xlu1 %v4415_v14, %s4247_s22  ;;  %v352_v10 = vpop.permute.xlu1 %351  ;;  %s4256_s16 = smov 101  }
 0x118   :  { %407 = vrot.lane.b32.xlu0 %v4415_v14, %s4246_s19  ;;  %s4258_s19 = smov 102  }
 0x11c   :  { %437 = vrot.lane.b32.xlu0 %v4452_v16, %s4247_s22  ;;  %s4259_s22 = smov 103  }
 0x122   :  { %v4983_v26 = vpop.permute.xlu0 %664  ;;  %v663_v15 = vpop.permute.xlu1 %662 }
 0x123   :  { %v682_v5 = vsel %vm674_vm15, %v663_v15, %v4983_v26 }
 0x124   :  { %3981 = vmatprep.subr.msk.mxu0 %vm452_vm2, %v682_v5 }
 0x126   :  { %v350_v41 = vpop.permute.xlu1 %349  ;;  %v376_v51 = vpop.permute.xlu0 %375 }
 0x12a   :  { %v4988_v0 = vpop.permute.xlu1 %377 }
 0x12b   :  { %v387_v45 = vsel %vm7749_vm4, %v376_v51, %v4988_v0 }
 0x12e   :  { %v160_v28 = vpop.permute.xlu1 %159 }
 0x132   :  { %v661_v17 = vpop.permute.xlu0 %660  ;;  %v4990_v36 = vpop.permute.xlu1 %283 }
 0x133   :  { %v681_v16 = vsel %vm674_vm15, %v661_v17, %v663_v15 }
 0x134   :  { %3982 = vmatpush1.msk.msra.mxu0 %vm452_vm2, %v681_v16 }
 0x136   :  { %v4994_v27 = vpop.permute.xlu0 %161  ;;  %v374_v4 = vpop.permute.xlu1 %373 }
 0x137   :  { %v171_v16 = vsel %vm169_vm0, %v160_v28, %v4994_v27  ;;  %v386_v55 = vsel %vm7749_vm4, %v374_v4, %v376_v51 }
 0x138   :  { %v475_v18 = vsel %vm473_vm12, %v4678_v30, %v171_v16  ;;  %v362_v30 = vsel %vm7750_vm3, %v350_v41, %v352_v10 }
 0x139   :  { %v482_v25 = vsel %vm480_vm9, %v475_v18, %v4669_v61 }
 0x13a   :  { %v4996_v44 = vpop.permute.xlu0 %285  ;;  %v4998_v12 = vpop.permute.xlu1 %401  ;;  %v489_v4 = vsel %vm487_vm14, %v482_v25, %v4683_v53 }
 0x13e   :  { %v400_v20 = vpop.permute.xlu0 %399  ;;  %v5000_v5 = vpop.permute.xlu1 %650 }
 0x142   :  { %v649_v11 = vpop.permute.xlu0 %648  ;;  %v5002_v52 = vpop.permute.xlu1 %307 }
 0x143   :  { %v676_v1 = vsel %vm674_vm15, %v649_v11, %v5000_v5 }
 0x144   :  { %738 = vmatprep.subr.mxu0 %v676_v1  ;;  %v315_v1 = vsel %vm313_vm10, %v304_v59, %v4956_v54  ;;  %v363_v59 = vsel %vm7750_vm3, %v352_v10, %v4981_v35  ;;  %v513_v10 = vsel %vm466_vm7, %v507_v3, %v338_v8  ;;  %v7860_v3 = vmov 0.0  }
 0x145   :  { %v519_v63 = vsel %vm473_vm12, %v513_v10, %v362_v30  ;;  %v5076_v30 = vld [vmem:[%s7712_s1] sm:$0xff] }
 0x146   :  { %v158_v15 = vpop.permute.xlu0 %157  ;;  %v398_v17 = vpop.permute.xlu1 %397 }
 0x147   :  { %v170_v62 = vsel %vm169_vm0, %v158_v15, %v160_v28  ;;  %v508_v28 = vsel %vm459_vm6, %v502_v58, %v315_v1 }
 0x148   :  { %v474_v38 = vsel %vm473_vm12, %v4748_v9, %v170_v62  ;;  %v514_v50 = vsel %vm466_vm7, %v508_v28, %v339_v40  ;;  %v411_v9 = vsel %vm409_vm5, %v400_v20, %v4998_v12  ;;  %v410_v62 = vsel %vm409_vm5, %v398_v17, %v400_v20 }
 0x149   :  { %v520_v41 = vsel %vm473_vm12, %v514_v50, %v363_v59  ;;  %v481_v51 = vsel %vm480_vm9, %v474_v38, %v4741_v24  ;;  %v525_v40 = vsel %vm480_vm9, %v519_v63, %v386_v55 }
 0x14a   :  { %v5013_v23 = vpop.permute.xlu0 %309  ;;  %v5015_v49 = vpop.permute.xlu1 %429  ;;  %v526_v61 = vsel %vm480_vm9, %v520_v41, %v387_v45  ;;  %v531_v58 = vsel %vm487_vm14, %v525_v40, %v410_v62  ;;  %v488_v28 = vsel %vm487_vm14, %v481_v51, %v4753_v13 }
 0x14b   :  { %v532_v1 = vsel %vm487_vm14, %v526_v61, %v411_v9  ;;  %v495_v38 = vsel %vm494_vm13, %v488_v28, %v4760_v32 }
 0x14e   :  { %v428_v15 = vpop.permute.xlu0 %427  ;;  %v5036_v6 = vpop.permute.xlu1 %331 }
 0x14f   :  { %v441_v16 = vsel %vm7748_vm1, %v428_v15, %v5015_v49 }
 0x150   :  { %v538_v24 = vsel %vm494_vm13, %v532_v1, %v441_v16  ;;  %v317_v1 = vsel %vm313_vm10, %v5002_v52, %v5013_v23 }
 0x152   :  { %v647_v18 = vpop.permute.xlu0 %646  ;;  %v426_v8 = vpop.permute.xlu1 %425 }
 0x153   :  { %v440_v20 = vsel %vm7748_vm1, %v426_v8, %v428_v15  ;;  %v675_v17 = vsel %vm674_vm15, %v647_v18, %v649_v11  ;;  %v496_v11 = vsel %vm494_vm13, %v489_v4, %v4691_v22  ;;  %vm693_vm1 = vcmask 203776   ;;  %v5088_v22 = vld [vmem:[%s7712_s1 + $0x8] sm:$0xff]  ;;  %s4252_s1 = smov 92  }
 0x154   :  { %739 = vmatpush1.msra.mxu0 %v675_v17  ;;  %v537_v7 = vsel %vm494_vm13, %v531_v58, %v440_v20  ;;  %v293_v8 = vsel %vm289_vm8, %v4990_v36, %v4996_v44 }
 0x155   :  { %740 = vmatprep.subr.mxu0 %v538_v24 }
 0x156   :  { %v5067_v59 = vpop.permute.xlu0 %333  ;;  %741 = vmatpush1.msra.mxu0 %v537_v7  ;;  %v5069_v53 = vpop.permute.xlu1 %357 }
 0x157   :  { %742 = vmatprep.subr.mxu0 %v496_v11 }
 0x158   :  { %743 = vmatpush1.msra.mxu0 %v495_v38 }
 0x159   :  { %3983 = vmatmul.mubr.msk.f32.vlgmr.msra.gmra.mxu0 %vm693_vm1, %v5076_v30 }
 0x15a   :  { %v356_v13 = vpop.permute.xlu0 %355  ;;  %v5082_v15 = vpop.permute.xlu1 %668  ;;  %782 = vmatprep.mubr.f32.mxu0 %v7860_v3 }
 0x15d   :  { %3984 = vmatmul.mubr.msk.f32.gmra.mxu0 %vm693_vm1, %v5088_v22 }
 0x15e   :  { %v667_v45 = vpop.permute.xlu0 %666  ;;  %v380_v55 = vpop.permute.xlu1 %379  ;;  %930 = vmatprep.mubr.f32.mxu0 %v7860_v3 }
 0x15f   :  { %v684_v32 = vsel %vm674_vm15, %v667_v45, %v5082_v15  ;;  %v683_v25 = vsel %vm674_vm15, %v4983_v26, %v667_v45  ;;  %v292_v26 = vsel %vm289_vm8, %v4948_v47, %v4990_v36  ;;  %v316_v47 = vsel %vm313_vm10, %v4956_v54, %v5002_v52 }
 0x160   :  { %3985 = vmatprep.subr.msk.mxu1 %vm452_vm2, %v684_v32  ;;  %v503_v36 = vsel %vm452_vm2, %v4566_v46, %v292_v26  ;;  %v340_v54 = vsel %vm337_vm11, %v4977_v29, %v5036_v6  ;;  %v365_v52 = vsel %vm7750_vm3, %v356_v13, %v5069_v53 }
 0x161   :  { %3986 = vmatpush1.msk.msra.mxu1 %vm452_vm2, %v683_v25  ;;  %v509_v28 = vsel %vm459_vm6, %v503_v36, %v316_v47 }
 0x162   :  { %v5099_v50 = vpop.permute.xlu0 %287  ;;  %v164_v10 = vpop.permute.xlu1 %163  ;;  %v515_v45 = vsel %vm466_vm7, %v509_v28, %v340_v54  ;;  %v7866_v28 = vld [vmem:[#allocation8_spill] sm:$0xff] }
 0x163   :  { %v172_v4 = vsel %vm169_vm0, %v4994_v27, %v164_v10  ;;  %v341_v27 = vsel %vm337_vm11, %v5036_v6, %v5067_v59  ;;  %v388_v6 = vsel %vm7749_vm4, %v4988_v0, %v380_v55 }
 0x164   :  { %v476_v46 = vsel %vm473_vm12, %v4638_v42, %v172_v4 }
 0x166   :  { %v5101_v9 = vpop.permute.xlu0 %381  ;;  %v5103_v62 = vpop.permute.xlu1 %311 }
 0x167   :  { %v389_v11 = vsel %vm7749_vm4, %v380_v55, %v5101_v9  ;;  %vm7861_vm4 = vcmask 556032  }
 0x16a   :  { %v5105_v41 = vpop.permute.xlu0 %165  ;;  %v5107_v63 = vpop.permute.xlu1 %405 }
 0x16b   :  { %v173_v61 = vsel %vm169_vm0, %v164_v10, %v5105_v41 }
 0x16c   :  { %v477_v58 = vsel %vm473_vm12, %v4906_v60, %v173_v61 }
 0x16d   :  { %v484_v38 = vsel %vm480_vm9, %v477_v58, %v4901_v33 }
 0x16e   :  { %v404_v16 = vpop.permute.xlu0 %403  ;;  %v5109_v51 = vpop.permute.xlu1 %654 }
 0x16f   :  { %v413_v42 = vsel %vm409_vm5, %v404_v16, %v5107_v63 }
 0x172   :  { %v653_v40 = vpop.permute.xlu0 %652  ;;  %v432_v18 = vpop.permute.xlu1 %431 }
 0x173   :  { %v678_v20 = vsel %vm674_vm15, %v653_v40, %v5109_v51  ;;  %v677_v17 = vsel %vm674_vm15, %v5000_v5, %v653_v40  ;;  %v504_v5 = vsel %vm452_vm2, %v4828_v21, %v293_v8  ;;  %v364_v21 = vsel %vm7750_vm3, %v4981_v35, %v356_v13  ;;  %vm7862_vm3 = vmmov %vm7861_vm4 }
 0x174   :  { %815 = vmatprep.subr.mxu1 %v678_v20  ;;  %v510_v60 = vsel %vm459_vm6, %v504_v5, %v317_v1  ;;  %v412_v35 = vsel %vm409_vm5, %v4998_v12, %v404_v16  ;;  %v483_v13 = vsel %vm480_vm9, %v476_v46, %v4628_v2  ;;  %v521_v25 = vsel %vm473_vm12, %v515_v45, %v364_v21  ;;  %v7869_v45 = vld [vmem:[#allocation9_spill] sm:$0xff] }
 0x175   :  { %816 = vmatpush1.msra.mxu1 %v677_v17  ;;  %v516_v29 = vsel %vm466_vm7, %v510_v60, %v341_v27  ;;  %v442_v55 = vsel %vm7861_vm4, %v5015_v49, %v432_v18  ;;  %v527_v26 = vsel %vm480_vm9, %v521_v25, %v388_v6  ;;  %v491_v2 = vsel %vm487_vm14, %v484_v38, %v4911_v31  ;;  %v7871_v25 = vld [vmem:[#allocation13_spill] sm:$0xff] }
 0x176   :  { %v5147_v24 = vpop.permute.xlu0 %335  ;;  %v671_v7 = vpop.permute.xlu1 %670  ;;  %v522_v32 = vsel %vm473_vm12, %v516_v29, %v365_v52  ;;  %v533_v40 = vsel %vm487_vm14, %v527_v26, %v412_v35  ;;  %v490_v49 = vsel %vm487_vm14, %v483_v13, %v4643_v19  ;;  %v318_v27 = vsel %vm313_vm10, %v5013_v23, %v5103_v62  ;;  %v7865_v52 = vld [vmem:[#allocation12_spill] sm:$0xff]  ;;  %v7867_v29 = vld [vmem:[#allocation11_spill] sm:$0xff] }
 0x177   :  { %v528_v0 = vsel %vm480_vm9, %v522_v32, %v389_v11  ;;  %v539_v8 = vsel %vm494_vm13, %v533_v40, %v442_v55  ;;  %v497_v31 = vsel %vm494_vm13, %v490_v49, %v4652_v56  ;;  %v685_v47 = vsel %vm674_vm15, %v5082_v15, %v671_v7  ;;  %v7874_v40 = vld [vmem:[#allocation6_spill] sm:$0xff] }
 0x178   :  { %v534_v12 = vsel %vm487_vm14, %v528_v0, %v413_v42  ;;  %v458_v56 = vsel %vm452_vm2, %v4415_v14, %v4549_v37  ;;  %v294_v15 = vsel %vm289_vm8, %v4996_v44, %v5099_v50  ;;  %v342_v14 = vsel %vm337_vm11, %v5067_v59, %v5147_v24 }
 0x179   :  { %v465_v36 = vsel %vm459_vm6, %v458_v56, %v4574_v48  ;;  %v505_v44 = vsel %vm452_vm2, %v4813_v39, %v294_v15  ;;  %v506_v59 = vsel %vm452_vm2, %v4720_v43, %v5099_v50  ;;  %vm7864_vm4 = vcmask 695296  }
 0x17a   :  { %v5172_v10 = vpop.permute.xlu0 %433  ;;  %v360_v33 = vpop.permute.xlu1 %359  ;;  %v472_v37 = vsel %vm466_vm7, %v465_v36, %v4602_v57  ;;  %v511_v54 = vsel %vm459_vm6, %v505_v44, %v318_v27  ;;  %v512_v39 = vsel %vm459_vm6, %v506_v59, %v5103_v62 }
 0x17b   :  { %v443_v61 = vsel %vm7862_vm3, %v432_v18, %v5172_v10  ;;  %v498_v18 = vsel %vm494_vm13, %v491_v2, %v4920_v34  ;;  %vm7863_vm3 = vcmask 703488   ;;  %v518_v43 = vsel %vm466_vm7, %v512_v39, %v5147_v24  ;;  %v943_v2 = vld [vmem:[%s7715_s4] sm:$0x3f]  ;;  %s4254_s4 = smov 100  }
 0x17c   :  { %v540_v16 = vsel %vm494_vm13, %v534_v12, %v443_v61  ;;  %v366_v23 = vsel %vm7863_vm3, %v5069_v53, %v360_v33  ;;  %v517_v53 = vsel %vm466_vm7, %v511_v54, %v342_v14  ;;  %v524_v60 = vsel %vm473_vm12, %v518_v43, %v360_v33  ;;  %v7872_v33 = vld [vmem:[#allocation10_spill] sm:$0xff] }
 0x17d   :  { %817 = vmatprep.subr.mxu1 %v540_v16  ;;  %v523_v50 = vsel %vm473_vm12, %v517_v53, %v366_v23  ;;  %v7873_v61 = vld [vmem:[#allocation14_spill] sm:$0xff]  ;;  %v944_v16 = vunpack.c.l.bf16 %v943_v2 }
 0x17e   :  { %v673_v4 = vpop.permute.xlu0 %672  ;;  %818 = vmatpush1.msra.mxu1 %v539_v8  ;;  %v657_v20 = vpop.permute.xlu1 %656  ;;  %v7875_v8 = vld [vmem:[#allocation7_spill] sm:$0xff] }
 0x17f   :  { %v686_v17 = vsel %vm674_vm15, %v671_v7, %v673_v4  ;;  %819 = vmatprep.subr.mxu1 %v498_v18  ;;  %v679_v48 = vsel %vm674_vm15, %v5109_v51, %v657_v20  ;;  %v955_v49 = vrot.slane %v944_v16, %v7874_v40  ;;  %v959_v4 = vrot.slane %v944_v16, %v7875_v8  ;;  %v7876_v18 = vld [vmem:[#allocation5_spill] sm:$0xff] }
 0x180   :  { %820 = vmatpush1.msra.mxu1 %v497_v31  ;;  %3989 = vmatprep.subr.msk.mxu0 %vm452_vm2, %v686_v17  ;;  %v7877_v17 = vsub.s32 4, %v7876_v18  ;;  %v7878_v15 = vsub.s32 6, %v7876_v18  ;;  %v947_v18 = vld [vmem:[%s7713_s2 + $0x8] sm:$0xff] }
 0x181   :  { %3990 = vmatpush1.msk.msra.mxu0 %vm452_vm2, %v685_v47  ;;  %3987 = vmatmul.mubr.msk.f32.vlgmr.msra.gmra.mxu1 %vm693_vm1, %v5076_v30 }
 0x182   :  { %v384_v19 = vpop.permute.xlu0 %383  ;;  %859 = vmatprep.mubr.f32.mxu1 %v7860_v3  ;;  %v168_v34 = vpop.permute.xlu1 %167  ;;  %v963_v31 = vrot.slane %v944_v16, %v7877_v17  ;;  %v946_v17 = vld [vmem:[%s7713_s2] sm:$0xff]  ;;  %s4260_s2 = smov 113  }
 0x183   :  { %v174_v58 = vsel %vm169_vm0, %v5105_v41, %v168_v34  ;;  %v479_v41 = vsel %vm473_vm12, %v472_v37, %v168_v34  ;;  %v390_v57 = vsel %vm7864_vm4, %v5101_v9, %v384_v19  ;;  %v530_v6 = vsel %vm480_vm9, %v524_v60, %v384_v19 }
 0x184   :  { %v478_v51 = vsel %vm473_vm12, %v7865_v52, %v174_v58  ;;  %v486_v9 = vsel %vm480_vm9, %v479_v41, %v7866_v28  ;;  %v529_v21 = vsel %vm480_vm9, %v523_v50, %v390_v57  ;;  %v993_v56 = vrot.slane %v963_v31, %v7874_v40 }
 0x185   :  { %3988 = vmatmul.mubr.msk.f32.gmra.mxu1 %vm693_vm1, %v5088_v22  ;;  %v485_v62 = vsel %vm480_vm9, %v478_v51, %v7867_v29  ;;  %v493_v32 = vsel %vm487_vm14, %v486_v9, %v7869_v45  ;;  %v945_v58 = vunpack.c.h.bf16 %v943_v2  ;;  %vm7880_vm9 = vcmask 1039360  }
 0x186   :  { %v659_v1 = vpop.permute.xlu0 %658  ;;  %v436_v11 = vpop.permute.xlu1 %435  ;;  %v492_v0 = vsel %vm487_vm14, %v485_v62, %v7871_v25  ;;  %v500_v26 = vsel %vm494_vm13, %v493_v32, %v7872_v33  ;;  %vm7881_vm12 = vmmov %vm7880_vm9 }
 0x187   :  { %v680_v5 = vsel %vm674_vm15, %v657_v20, %v659_v1  ;;  %v499_v12 = vsel %vm494_vm13, %v492_v0, %v7873_v61  ;;  %v985_v20 = vrot.slane %v955_v49, %v7874_v40  ;;  %v967_v1 = vrot.slane %v944_v16, %v7878_v15  ;;  %vm7883_vm15 = vmmov %vm7880_vm9 }
 0x188   :  { %892 = vmatprep.subr.mxu0 %v680_v5  ;;  %v971_v59 = vrot.slane %v945_v58, %v7874_v40  ;;  %v975_v51 = vrot.slane %v945_v58, %v7875_v8  ;;  %vm7884_vm10 = vmmov %vm7880_vm9 }
 0x189   :  { %893 = vmatpush1.msra.mxu0 %v679_v48  ;;  %v997_v48 = vrot.slane %v967_v1, %v7874_v40  ;;  %vm7886_vm11 = vmmov %vm7880_vm9 }
 0x18a   :  { %v408_v46 = vpop.permute.xlu0 %407  ;;  %v1001_v43 = vrot.slane %v971_v59, %v7874_v40  ;;  %v1005_v60 = vrot.slane %v975_v51, %v7874_v40  ;;  %v949_v59 = vld [vmem:[%s7714_s3 + $0x8] sm:$0xff]  ;;  %vm7887_vm3 = vmmov %vm7880_vm9 }
 0x18b   :  { %v414_v7 = vsel %vm409_vm5, %v5107_v63, %v408_v46  ;;  %v536_v24 = vsel %vm487_vm14, %v530_v6, %v408_v46  ;;  %vm7868_vm5 = vcmask 556032   ;;  %vm7892_vm4 = vmmov %vm7887_vm3 }
 0x18c   :  { %v535_v63 = vsel %vm487_vm14, %v529_v21, %v414_v7  ;;  %vm7870_vm7 = vmmov %vm7868_vm5 }
 0x18d   :  { %v444_v35 = vsel %vm7870_vm7, %v5172_v10, %v436_v11  ;;  %v4249_v10 = vmov 0   ;;  %vm7882_vm14 = vmmov %vm7880_vm9 }
 0x18e   :  { %v438_v42 = vpop.permute.xlu0 %437  ;;  %v541_v55 = vsel %vm494_vm13, %v535_v63, %v444_v35  ;;  %4159 = vset.pattern.permute.xlu1 %v4249_v10  ;;  %4158 = vset.pattern.permute.xlu0 %v4249_v10  ;;  %vm7896_vm7 = vmmov %vm7887_vm3 }
 0x18f   :  { %v445_v38 = vsel %vm7868_vm5, %v436_v11, %v438_v42  ;;  %vm7893_vm5 = vmmov %vm7887_vm3 }
 0x190   :  { %v542_v13 = vsel %vm494_vm13, %v536_v24, %v445_v38 }
 0x191   :  { %894 = vmatprep.subr.mxu0 %v542_v13 }
 0x192   :  { %895 = vmatpush1.msra.mxu0 %v541_v55 }
 0x193   :  { %896 = vmatprep.subr.mxu0 %v500_v26 }
 0x194   :  { %897 = vmatpush1.msra.mxu0 %v499_v12 }
 0x195   :  { %3991 = vmatmul.mubr.msk.f32.vlgmr.msra.gmra.mxu0 %vm693_vm1, %v5076_v30 }
 0x196   :  { %936 = vmatprep.mubr.f32.mxu0 %v7860_v3 }
 0x199   :  { %3992 = vmatmul.mubr.msk.f32.gmra.mxu0 %vm693_vm1, %v5088_v22  ;;  %v989_v22 = vrot.slane %v959_v4, %v7874_v40  ;;  %vm1022_vm1 = vcmask 621568  }
 0x19a   :  { %1562 = vmatprep.mubr.f32.mxu0 %v7860_v3 }
 0x219   :  { %v5274_v30 = vpop.f32.mrf.mxu0 }
 0x21a   :  { %v1006_v19 = vmul.f32 %v985_v20, %v5274_v30 }
 0x21b   :  { %v5280_v47 = vpop.f32.mrf.mxu0 }
 0x21c   :  { %v1007_v34 = vmul.f32 %v989_v22, %v5280_v47  ;;  %v1037_v5 = vmul.f32 %v1006_v19, %v5274_v30 }
 0x21d   :  { %v5289_v27 = vpop.f32.mrf.mxu0 }
 0x21e   :  { %v1038_v14 = vmul.f32 %v1007_v34, %v5280_v47  ;;  %v1018_v23 = vadd.f32 %v1007_v34, %v1006_v19  ;;  %v1012_v46 = vmul.f32 %v985_v20, %v5289_v27 }
 0x21f   :  { %v5297_v41 = vpop.f32.mrf.mxu0 }
 0x220   :  { %v1049_v54 = vadd.f32 %v1038_v14, %v1037_v5  ;;  %v1013_v39 = vmul.f32 %v989_v22, %v5297_v41  ;;  %v948_v22 = vld [vmem:[%s7714_s3] sm:$0xff]  ;;  %v1043_v31 = vmul.f32 %v1012_v46, %v5289_v27  ;;  %s4262_s3 = smov 16  }
 0x222   :  { %v1027_v50 = vadd.f32 %v1013_v39, %v1012_v46  ;;  %v1044_v19 = vmul.f32 %v1013_v39, %v5297_v41 }
 0x224   :  { %v1057_v34 = vadd.f32 %v1044_v19, %v1043_v31 }
 0x241   :  { %v5287_v36 = vpop.f32.mrf.mxu1 }
 0x242   :  { %v1008_v37 = vmul.f32 %v993_v56, %v5287_v36 }
 0x243   :  { %v5295_v44 = vpop.f32.mrf.mxu1 }
 0x244   :  { %v1039_v57 = vmul.f32 %v1008_v37, %v5287_v36  ;;  %v1009_v52 = vmul.f32 %v997_v48, %v5295_v44  ;;  %v1019_v53 = vadd.f32 %v1018_v23, %v1008_v37 }
 0x245   :  { %v5305_v7 = vpop.f32.mrf.mxu1 }
 0x246   :  { %v1050_v28 = vadd.f32 %v1049_v54, %v1039_v57  ;;  %v1040_v9 = vmul.f32 %v1009_v52, %v5295_v44  ;;  %v1014_v21 = vmul.f32 %v993_v56, %v5305_v7  ;;  %v1020_v29 = vadd.f32 %v1019_v53, %v1009_v52 }
 0x247   :  { %v5313_v62 = vpop.f32.mrf.mxu1 }
 0x248   :  { %v1028_v42 = vadd.f32 %v1027_v50, %v1014_v21  ;;  %v1051_v24 = vadd.f32 %v1050_v28, %v1040_v9  ;;  %v1015_v35 = vmul.f32 %v997_v48, %v5313_v62  ;;  %v1045_v56 = vmul.f32 %v1014_v21, %v5305_v7 }
 0x24a   :  { %v1029_v26 = vadd.f32 %v1028_v42, %v1015_v35  ;;  %v1058_v15 = vadd.f32 %v1057_v34, %v1045_v56  ;;  %v1046_v1 = vmul.f32 %v1015_v35, %v5313_v62 }
 0x24c   :  { %v1059_v14 = vadd.f32 %v1058_v15, %v1046_v1 }
 0x255   :  { %v5311_v11 = vpop.f32.mrf.mxu0 }
 0x256   :  { %v1010_v6 = vmul.f32 %v1001_v43, %v5311_v11 }
 0x257   :  { %v5316_v63 = vpop.f32.mrf.mxu0 }
 0x258   :  { %v1021_v38 = vadd.f32 %v1020_v29, %v1010_v6  ;;  %v1041_v45 = vmul.f32 %v1010_v6, %v5311_v11  ;;  %v1011_v32 = vmul.f32 %v1005_v60, %v5316_v63 }
 0x259   :  { %v5321_v13 = vpop.f32.mrf.mxu0 }
 0x25a   :  { %v1052_v25 = vadd.f32 %v1051_v24, %v1041_v45  ;;  %v1042_v0 = vmul.f32 %v1011_v32, %v5316_v63  ;;  %v1016_v55 = vmul.f32 %v1001_v43, %v5321_v13  ;;  %v1023_v33 = vsel %vm1022_vm1, %v1011_v32, 0.0 }
 0x25b   :  { %v5326_v61 = vpop.f32.mrf.mxu0  ;;  %v1024_v12 = vadd.f32 %v1023_v33, %v1021_v38 }
 0x25c   :  { %v1017_v10 = vmul.f32 %v1005_v60, %v5326_v61  ;;  %v1053_v2 = vsel %vm1022_vm1, %v1042_v0, 0.0  ;;  %v1030_v16 = vadd.f32 %v1029_v26, %v1016_v55  ;;  %v1047_v58 = vmul.f32 %v1016_v55, %v5321_v13 }
 0x25d   :  { %1025 = vadd.xlane.f32.xlu1 %v1024_v12  ;;  %v1054_v49 = vadd.f32 %v1053_v2, %v1052_v25 }
 0x25e   :  { %v1031_v4 = vsel %vm1022_vm1, %v1017_v10, 0.0  ;;  %v1048_v5 = vmul.f32 %v1017_v10, %v5326_v61  ;;  %v1060_v37 = vadd.f32 %v1059_v14, %v1047_v58 }
 0x25f   :  { %1055 = vadd.xlane.f32.xlu0 %v1054_v49  ;;  %v1032_v20 = vadd.f32 %v1031_v4, %v1030_v16 }
 0x260   :  { %v1061_v48 = vsel %vm1022_vm1, %v1048_v5, 0.0  ;;  %vm7898_vm1 = vcmask 883712  }
 0x261   :  { %v1062_v23 = vadd.f32 %v1061_v48, %v1060_v37 }
 0x263   :  { %1033 = vadd.xlane.f32.xlu0 %v1032_v20 }
 0x26e   :  { %1125 = vperm.xlu1 %4159, %v948_v22  }
 0x272   :  { %1108 = vperm.xlu1 %4159, %v947_v18  }
 0x279   :  { %1103 = vperm.xlu0 %4158, %v946_v17  }
 0x296   :  { %1063 = vadd.xlane.f32.xlu1 %v1062_v23 }
 0x2a7   :  { %1130 = vperm.xlu1 %4159, %v949_v59  }
 0x2e6   :  { %v1026_v54 = vpop.xlane.xlu1 %1025 }
 0x2e7   :  { %v1035_v57 = vmul.f32 0.001953125, %v1026_v54 }
 0x2e8   :  { %v1056_v52 = vpop.xlane.xlu0 %1055 }
 0x2e9   :  { %v1065_v51 = vmul.f32 0.001953125, %v1056_v52  ;;  %v1067_v46 = vmul.f32 %v1035_v57, %v1035_v57  ;;  %v1075_v28 = vsub.f32 %v5287_v36, %v1035_v57  ;;  %v1076_v9 = vsub.f32 %v5295_v44, %v1035_v57 }
 0x2ea   :  { %v1073_v29 = vsub.f32 %v5274_v30, %v1035_v57  ;;  %v1074_v6 = vsub.f32 %v5280_v47, %v1035_v57  ;;  %v1077_v38 = vsub.f32 %v5311_v11, %v1035_v57  ;;  %v1126_v55 = vpop.permute.xlu1 %1125  ;;  %v1078_v36 = vsub.f32 %v5316_v63, %v1035_v57 }
 0x2eb   :  { %v1069_v39 = vsub.f32 %v1065_v51, %v1067_v46 }
 0x2ec   :  { %v1034_v50 = vpop.xlane.xlu0 %1033 }
 0x2ed   :  { %v1071_v53 = vmax.f32 %v1069_v39, 0.0  ;;  %v1036_v4 = vmul.f32 0.001953125, %v1034_v50 }
 0x2ee   :  { %v1109_v49 = vpop.permute.xlu1 %1108 }
 0x2ef   :  { %v1085_v43 = vadd.f32 1e-05, %v1071_v53  ;;  %v1068_v18 = vmul.f32 %v1036_v4, %v1036_v4  ;;  %v1084_v15 = vsub.f32 %v5326_v61, %v1036_v4  ;;  %v1083_v1 = vsub.f32 %v5321_v13, %v1036_v4 }
 0x2f0   :  { %v1082_v58 = vsub.f32 %v5313_v62, %v1036_v4  ;;  %v1079_v5 = vsub.f32 %v5289_v27, %v1036_v4  ;;  %v1080_v37 = vsub.f32 %v5297_v41, %v1036_v4  ;;  %v1081_v48 = vsub.f32 %v5305_v7, %v1036_v4  ;;  %v5459_v4 = vld [vmem:[%s7716_s5 + $0x110] sm:$0xff] }
 0x2f1   :  { %4195 = vrsqrt.f32 %v1085_v43 }
 0x2f4   :  { %v1104_v21 = vpop.permute.xlu0 %1103 }
 0x2fe   :  { %v4196_v60 = vpop.eup %4195 }
 0x2ff   :  { %v1091_v42 = vmul.f32 %v4196_v60, %v1075_v28  ;;  %v1092_v24 = vmul.f32 %v4196_v60, %v1076_v9  ;;  %v1089_v45 = vmul.f32 %v4196_v60, %v1073_v29  ;;  %v1090_v32 = vmul.f32 %v4196_v60, %v1074_v6 }
 0x300   :  { %v1093_v0 = vmul.f32 %v4196_v60, %v1077_v38  ;;  %v1094_v47 = vmul.f32 %v4196_v60, %v1078_v36 }
 0x301   :  { %v1113_v35 = vmul.f32 %v1104_v21, %v1091_v42  ;;  %v1114_v25 = vmul.f32 %v1104_v21, %v1092_v24  ;;  %v1111_v34 = vmul.f32 %v1104_v21, %v1089_v45  ;;  %v1112_v56 = vmul.f32 %v1104_v21, %v1090_v32 }
 0x302   :  { %v1115_v30 = vmul.f32 %v1104_v21, %v1093_v0  ;;  %v1116_v10 = vmul.f32 %v1104_v21, %v1094_v47  ;;  %v5431_v0 = vld [vmem:[%s7716_s5 + $0x118] sm:$0xff] }
 0x303   :  { %v5355_v33 = vadd.f32 %v1126_v55, %v1113_v35  ;;  %v5359_v26 = vadd.f32 %v1126_v55, %v1114_v25  ;;  %v5386_v52 = vadd.f32 %v1126_v55, %v1111_v34  ;;  %v5388_v51 = vadd.f32 %v1126_v55, %v1112_v56  ;;  %v5426_v25 = vld [vmem:[%s7716_s5 + $0x120] sm:$0xff] }
 0x304   :  { %v5365_v12 = vadd.f32 %v1126_v55, %v1115_v30  ;;  %v5371_v2 = vadd.f32 %v1126_v55, %v1116_v10  ;;  %v7759_v55 = vunpack.c.l.bf16 %v5426_v25  ;;  %v7816_v36 = vunpack.c.h.bf16 %v5426_v25 }
 0x305   :  { %v1147_v44 = vmax.f32 %v5355_v33, 0.0  ;;  %v1148_v11 = vmax.f32 %v5359_v26, 0.0  ;;  %v7818_v28 = vmax.f32 %v5386_v52, 0.0  ;;  %v7817_v9 = vmax.f32 %v5388_v51, 0.0 }
 0x306   :  { %v1149_v63 = vmax.f32 %v5365_v12, 0.0  ;;  %v1150_v16 = vmax.f32 %v5371_v2, 0.0  ;;  %v7758_v10 = vunpack.c.h.bf16 %v5431_v0  ;;  %3993 = vmatprep.subr.msk.mxu0 %vm494_vm13, %v7816_v36  ;;  %v5837_v36 = vld [vmem:[%s7716_s5 + $0x90] sm:$0xff]  ;;  %v5868_v12 = vld [vmem:[%s7716_s5 + $0x80] sm:$0xff] }
 0x307   :  { %1173 = vrot.lane.b32.xlu1 %v1147_v44, %s4231_s20  ;;  %v4160_v24 = vpack.i.bf16 %v7818_v28, %v7817_v9  ;;  %3994 = vmatpush1.msk.msra.mxu0 %vm494_vm13, %v7759_v55  ;;  %v1366_v8 = vunpack.c.l.bf16 %v5868_v12 }
 0x308   :  { %1522 = vmatprep.subr.mxu0 %v7758_v10 }
 0x30b   :  { %1175 = vrot.lane.b32.xlu1 %v1148_v11, %s4231_s20 }
 0x30f   :  { %1177 = vrot.lane.b32.xlu1 %v1149_v63, %s4231_s20 }
 0x313   :  { %1179 = vrot.lane.b32.xlu1 %v1150_v16, %s4231_s20 }
 0x31f   :  { %v1064_v20 = vpop.xlane.xlu1 %1063 }
 0x320   :  { %v1066_v22 = vmul.f32 0.001953125, %v1064_v20  ;;  %v5464_v20 = vld [vmem:[%s7716_s5 + $0x78] sm:$0xff] }
 0x322   :  { %v1070_v17 = vsub.f32 %v1066_v22, %v1068_v18  ;;  %v5469_v22 = vld [vmem:[%s7716_s5 + $0x108] sm:$0xff]  ;;  %v7755_v18 = vunpack.c.l.bf16 %v5459_v4 }
 0x323   :  { %v1131_v27 = vpop.permute.xlu1 %1130  ;;  %v7753_v34 = vunpack.c.l.bf16 %v5469_v22  ;;  %v7754_v56 = vunpack.c.h.bf16 %v5469_v22 }
 0x324   :  { %v1072_v31 = vmax.f32 %v1070_v17, 0.0  ;;  %v7756_v17 = vunpack.c.h.bf16 %v5459_v4 }
 0x326   :  { %v1086_v19 = vadd.f32 1e-05, %v1072_v31  ;;  %v7796_v31 = vunpack.c.l.bf16 %v5464_v20 }
 0x328   :  { %4197 = vrsqrt.f32 %v1086_v19  ;;  %v1365_v19 = vunpack.c.h.bf16 %v5464_v20 }
 0x32a   :  { %1421 = vmatprep.subr.mxu1 %v1365_v19 }
 0x32b   :  { %1422 = vmatpush1.msra.mxu1 %v7796_v31 }
 0x335   :  { %v4198_v14 = vpop.eup %4197 }
 0x336   :  { %v1100_v23 = vmul.f32 %v4198_v14, %v1084_v15  ;;  %v1099_v59 = vmul.f32 %v4198_v14, %v1083_v1  ;;  %v1098_v54 = vmul.f32 %v4198_v14, %v1082_v58  ;;  %v1095_v57 = vmul.f32 %v4198_v14, %v1079_v5  ;;  %v5486_v15 = vld [vmem:[%s7716_s5 + $0x70] sm:$0xff]  ;;  %v5491_v1 = vld [vmem:[%s7716_s5 + $0x100] sm:$0xff] }
 0x337   :  { %v1096_v61 = vmul.f32 %v4198_v14, %v1080_v37  ;;  %v1097_v46 = vmul.f32 %v4198_v14, %v1081_v48  ;;  %7879 = vst [vmem:[#allocation12_spill] sm:$0xff] %v5491_v1  ;;  %v7793_v58 = vunpack.c.h.bf16 %v5486_v15  ;;  %v7752_v5 = vunpack.c.h.bf16 %v5491_v1 }
 0x338   :  { %v1122_v13 = vmul.f32 %v1109_v49, %v1100_v23  ;;  %v1121_v39 = vmul.f32 %v1109_v49, %v1099_v59  ;;  %v1120_v62 = vmul.f32 %v1109_v49, %v1098_v54  ;;  %v1117_v53 = vmul.f32 %v1109_v49, %v1095_v57  ;;  %v5506_v23 = vld [vmem:[%s7716_s5 + $0x68] sm:$0xff]  ;;  %v5521_v57 = vld [vmem:[%s7716_s5 + $0x60] sm:$0xff] }
 0x339   :  { %v1118_v43 = vmul.f32 %v1109_v49, %v1096_v61  ;;  %v1119_v60 = vmul.f32 %v1109_v49, %v1097_v46  ;;  %v7757_v49 = vunpack.c.l.bf16 %v5431_v0  ;;  %v7790_v37 = vunpack.c.l.bf16 %v5486_v15  ;;  %1423 = vmatprep.subr.mxu1 %v7793_v58 }
 0x33a   :  { %v5390_v50 = vadd.f32 %v1131_v27, %v1122_v13  ;;  %v5392_v41 = vadd.f32 %v1131_v27, %v1121_v39  ;;  %v5394_v7 = vadd.f32 %v1131_v27, %v1120_v62  ;;  %v5400_v6 = vadd.f32 %v1131_v27, %v1117_v53  ;;  %v5532_v39 = vld [vmem:[%s7716_s5 + $0x58] sm:$0xff] }
 0x33b   :  { %v5402_v42 = vadd.f32 %v1131_v27, %v1118_v43  ;;  %v5417_v35 = vadd.f32 %v1131_v27, %v1119_v60  ;;  %1523 = vmatpush1.msra.mxu0 %v7757_v49  ;;  %v7751_v48 = vunpack.c.l.bf16 %v5491_v1  ;;  %v7784_v59 = vunpack.c.l.bf16 %v5506_v23  ;;  %1424 = vmatpush1.msra.mxu1 %v7790_v37  ;;  %v5543_v43 = vld [vmem:[%s7716_s5 + $0x50] sm:$0xff]  ;;  %v5548_v60 = vld [vmem:[%s7716_s5 + $0x48] sm:$0xff] }
 0x33c   :  { %v7820_v21 = vmax.f32 %v5390_v50, 0.0  ;;  %v1155_v29 = vmax.f32 %v5392_v41, 0.0  ;;  %v7824_v38 = vmax.f32 %v5394_v7, 0.0  ;;  %v7813_v45 = vmax.f32 %v5400_v6, 0.0  ;;  %1524 = vmatprep.subr.mxu0 %v7756_v17  ;;  %v5593_v49 = vld [vmem:[%s7716_s5 + $0x30] sm:$0xff] }
 0x33d   :  { %v7802_v32 = vmax.f32 %v5402_v42, 0.0  ;;  %v7799_v47 = vmax.f32 %v5417_v35, 0.0  ;;  %1525 = vmatpush1.msra.mxu0 %v7755_v18  ;;  %v7787_v54 = vunpack.c.h.bf16 %v5506_v23  ;;  %v7778_v61 = vunpack.c.l.bf16 %v5521_v57 }
 0x33e   :  { %1191 = vrot.lane.b32.xlu0 %v7820_v21, %s4231_s20  ;;  %1189 = vrot.lane.b32.xlu1 %v1155_v29, %s4231_s20  ;;  %v7781_v46 = vunpack.c.h.bf16 %v5521_v57  ;;  %v7772_v53 = vunpack.c.l.bf16 %v5532_v39  ;;  %v7775_v27 = vunpack.c.h.bf16 %v5532_v39  ;;  %v7767_v55 = vunpack.c.h.bf16 %v5593_v49 }
 0x33f   :  { %v4165_v30 = vpack.i.bf16 %v7813_v45, %v7802_v32  ;;  %1526 = vmatprep.subr.mxu0 %v7754_v56  ;;  %1425 = vmatprep.subr.mxu1 %v7787_v54  ;;  %v7885_v40 = vmax.f32 %v5394_v7, 0.0 }
 0x340   :  { %1527 = vmatpush1.msra.mxu0 %v7753_v34  ;;  %1426 = vmatpush1.msra.mxu1 %v7784_v59 }
 0x341   :  { %1528 = vmatprep.subr.mxu0 %v7752_v5  ;;  %1427 = vmatprep.subr.mxu1 %v7781_v46  ;;  %v7761_v5 = vunpack.c.h.bf16 %v5548_v60 }
 0x342   :  { %1187 = vrot.lane.b32.xlu1 %v7824_v38, %s4231_s20  ;;  %4161 = vrot.lane.b32.xlu0 %v4160_v24, %s4231_s20 }
 0x343   :  { %1529 = vmatpush1.msra.mxu0 %v7751_v48  ;;  %1428 = vmatpush1.msra.mxu1 %v7778_v61  ;;  %v5561_v48 = vld [vmem:[%s7716_s5 + $0x40] sm:$0xff] }
 0x344   :  { %1606 = vmatprep.subr.mxu0 %v1365_v19  ;;  %v7769_v19 = vunpack.c.h.bf16 %v5543_v43  ;;  %1429 = vmatprep.subr.mxu1 %v7775_v27  ;;  %v7764_v56 = vunpack.c.h.bf16 %v5561_v48  ;;  %v7762_v17 = vunpack.c.l.bf16 %v5561_v48 }
 0x345   :  { %1430 = vmatpush1.msra.mxu1 %v7772_v53 }
 0x346   :  { %4166 = vrot.lane.b32.xlu1 %v4165_v30, %s4231_s20  ;;  %1185 = vrot.lane.b32.xlu0 %v7799_v47, %s4231_s20  ;;  %v7766_v30 = vunpack.c.l.bf16 %v5543_v43 }
 0x347   :  { %1431 = vmatprep.subr.mxu1 %v7769_v19 }
 0x348   :  { %1432 = vmatpush1.msra.mxu1 %v7766_v30 }
 0x349   :  { %1433 = vmatprep.subr.mxu1 %v7761_v5  ;;  %v5624_v5 = vld [vmem:[%s7716_s5 + $0x20] sm:$0xff] }
 0x379   :  { %v5497_v14 = vpop.permute.xlu1 %1173 }
 0x37d   :  { %v1176_v13 = vpop.permute.xlu1 %1175 }
 0x37e   :  { %v1195_v62 = vsel %vm7880_vm9, %v5497_v14, %v1176_v13  ;;  %vm1408_vm9 = vcmask 318464  }
 0x37f   :  { %v5552_v24 = vmax.f32 %v1147_v44, %v1195_v62  ;;  %v7760_v44 = vunpack.c.l.bf16 %v5548_v60  ;;  %v5576_v62 = vld [vmem:[%s7716_s5 + $0x38] sm:$0xff] }
 0x380   :  { %v7765_v26 = vunpack.c.l.bf16 %v5576_v62 }
 0x381   :  { %1243 = vrot.lane.b32.xlu1 %v5552_v24, %s4235_s23  ;;  %v5568_v33 = vpop.permute.xlu1 %1177  ;;  %1434 = vmatpush1.msra.mxu1 %v7760_v44  ;;  %v7768_v44 = vunpack.c.l.bf16 %v5593_v49 }
 0x382   :  { %v1196_v34 = vsel %vm7881_vm12, %v1176_v13, %v5568_v33  ;;  %v7763_v13 = vunpack.c.h.bf16 %v5576_v62  ;;  %1435 = vmatprep.subr.mxu1 %v7764_v56  ;;  %v7774_v56 = vunpack.c.l.bf16 %v5624_v5  ;;  %vm7946_vm12 = vmmov %vm7898_vm1 }
 0x383   :  { %v5585_v18 = vmax.f32 %v1148_v11, %v1196_v34  ;;  %v5608_v11 = vld [vmem:[%s7716_s5 + $0x28] sm:$0xff]  ;;  %1436 = vmatpush1.msra.mxu1 %v7762_v17  ;;  %v5637_v17 = vld [vmem:[%s7716_s5 + $0x18] sm:$0xff] }
 0x384   :  { %1437 = vmatprep.subr.mxu1 %v7763_v13  ;;  %v7770_v2 = vunpack.c.h.bf16 %v5608_v11  ;;  %v7773_v13 = vunpack.c.h.bf16 %v5624_v5  ;;  %v7776_v30 = vunpack.c.h.bf16 %v5637_v17 }
 0x385   :  { %v5598_v10 = vpop.permute.xlu1 %1179  ;;  %1245 = vrot.lane.b32.xlu0 %v5585_v18, %s4235_s23  ;;  %1438 = vmatpush1.msra.mxu1 %v7765_v26  ;;  %v5648_v26 = vld [vmem:[%s7716_s5 + $0x10] sm:$0xff] }
 0x386   :  { %v5613_v34 = vmax.f32 %v1150_v16, %v5598_v10  ;;  %v7771_v16 = vunpack.c.l.bf16 %v5608_v11  ;;  %1439 = vmatprep.subr.mxu1 %v7767_v55  ;;  %v7777_v55 = vunpack.c.l.bf16 %v5637_v17  ;;  %v7779_v19 = vunpack.c.h.bf16 %v5648_v26 }
 0x387   :  { %1440 = vmatpush1.msra.mxu1 %v7768_v44  ;;  %v5659_v44 = vld [vmem:[%s7716_s5 + $0x8] sm:$0xff] }
 0x388   :  { %1441 = vmatprep.subr.mxu1 %v7770_v2  ;;  %v7780_v2 = vunpack.c.l.bf16 %v5648_v26  ;;  %v7782_v53 = vunpack.c.h.bf16 %v5659_v44 }
 0x389   :  { %1249 = vrot.lane.b32.xlu0 %v5613_v34, %s4235_s23  ;;  %1442 = vmatpush1.msra.mxu1 %v7771_v16  ;;  %v5670_v16 = vld [vmem:[%s7716_s5] sm:$0xff] }
 0x38a   :  { %1443 = vmatprep.subr.mxu1 %v7773_v13  ;;  %v7783_v13 = vunpack.c.l.bf16 %v5659_v44  ;;  %v7785_v27 = vunpack.c.h.bf16 %v5670_v16 }
 0x38b   :  { %1444 = vmatpush1.msra.mxu1 %v7774_v56  ;;  %v5681_v56 = vld [vmem:[%s7716_s5 + $0xf8] sm:$0xff] }
 0x38c   :  { %1445 = vmatprep.subr.mxu1 %v7776_v30  ;;  %v7786_v30 = vunpack.c.l.bf16 %v5670_v16  ;;  %v7788_v61 = vunpack.c.h.bf16 %v5681_v56 }
 0x38d   :  { %1446 = vmatpush1.msra.mxu1 %v7777_v55  ;;  %v5692_v55 = vld [vmem:[%s7716_s5 + $0xf0] sm:$0xff] }
 0x38e   :  { %1447 = vmatprep.subr.mxu1 %v7779_v19  ;;  %v7789_v19 = vunpack.c.l.bf16 %v5681_v56  ;;  %v7791_v46 = vunpack.c.h.bf16 %v5692_v55 }
 0x38f   :  { %1448 = vmatpush1.msra.mxu1 %v7780_v2  ;;  %v5703_v2 = vld [vmem:[%s7716_s5 + $0xe8] sm:$0xff] }
 0x390   :  { %1449 = vmatprep.subr.mxu1 %v7782_v53  ;;  %v7792_v53 = vunpack.c.l.bf16 %v5692_v55  ;;  %v7794_v59 = vunpack.c.h.bf16 %v5703_v2 }
 0x391   :  { %1450 = vmatpush1.msra.mxu1 %v7783_v13  ;;  %v5714_v13 = vld [vmem:[%s7716_s5 + $0xe0] sm:$0xff] }
 0x392   :  { %1451 = vmatprep.subr.mxu1 %v7785_v27  ;;  %v7795_v27 = vunpack.c.l.bf16 %v5703_v2  ;;  %v7797_v54 = vunpack.c.h.bf16 %v5714_v13 }
 0x393   :  { %1452 = vmatpush1.msra.mxu1 %v7786_v30  ;;  %v5725_v30 = vld [vmem:[%s7716_s5 + $0xd8] sm:$0xff] }
 0x394   :  { %1453 = vmatprep.subr.mxu1 %v7788_v61  ;;  %v7798_v61 = vunpack.c.l.bf16 %v5714_v13  ;;  %v7800_v37 = vunpack.c.h.bf16 %v5725_v30 }
 0x395   :  { %1454 = vmatpush2.msra.mxu1 %v7789_v19  ;;  %v5736_v19 = vld [vmem:[%s7716_s5 + $0xd0] sm:$0xff] }
 0x396   :  { %1455 = vmatprep.subr.mxu1 %v7791_v46  ;;  %v7801_v46 = vunpack.c.l.bf16 %v5725_v30  ;;  %v7810_v58 = vunpack.c.h.bf16 %v5736_v19 }
 0x397   :  { %1456 = vmatpush2.msra.mxu1 %v7792_v53  ;;  %v5747_v53 = vld [vmem:[%s7716_s5 + $0xc8] sm:$0xff] }
 0x398   :  { %1457 = vmatprep.subr.mxu1 %v7794_v59  ;;  %v7803_v59 = vunpack.c.l.bf16 %v5736_v19  ;;  %v7804_v31 = vunpack.c.h.bf16 %v5747_v53 }
 0x399   :  { %1458 = vmatpush2.msra.mxu1 %v7795_v27  ;;  %v5758_v27 = vld [vmem:[%s7716_s5 + $0xc0] sm:$0xff] }
 0x39a   :  { %1459 = vmatprep.subr.mxu1 %v7797_v54  ;;  %v7805_v54 = vunpack.c.l.bf16 %v5747_v53  ;;  %v7806_v47 = vunpack.c.h.bf16 %v5758_v27 }
 0x39b   :  { %1460 = vmatpush2.msra.mxu1 %v7798_v61  ;;  %v5769_v61 = vld [vmem:[%s7716_s5 + $0xb8] sm:$0xff] }
 0x39c   :  { %1461 = vmatprep.subr.mxu1 %v7800_v37  ;;  %v7807_v37 = vunpack.c.l.bf16 %v5758_v27  ;;  %v7809_v32 = vunpack.c.l.bf16 %v5769_v61 }
 0x39d   :  { %1462 = vmatpush2.msra.mxu1 %v7801_v46  ;;  %v7808_v46 = vunpack.c.h.bf16 %v5769_v61 }
 0x39e   :  { %1463 = vmatprep.subr.mxu1 %v7810_v58 }
 0x39f   :  { %1464 = vmatpush2.msra.mxu1 %v7803_v59  ;;  %v5790_v59 = vld [vmem:[%s7716_s5 + $0xb0] sm:$0xff] }
 0x3a0   :  { %1465 = vmatprep.subr.mxu1 %v7804_v31  ;;  %v7811_v31 = vunpack.c.h.bf16 %v5790_v59 }
 0x3a1   :  { %1466 = vmatpush2.msra.mxu1 %v7805_v54  ;;  %v7812_v54 = vunpack.c.l.bf16 %v5790_v59 }
 0x3a2   :  { %1467 = vmatprep.subr.mxu1 %v7806_v47  ;;  %v5801_v47 = vld [vmem:[%s7716_s5 + $0xa8] sm:$0xff] }
 0x3a3   :  { %1468 = vmatpush2.msra.mxu1 %v7807_v37  ;;  %v7814_v37 = vunpack.c.h.bf16 %v5801_v47 }
 0x3a4   :  { %1469 = vmatprep.subr.mxu1 %v7808_v46  ;;  %v7815_v46 = vunpack.c.l.bf16 %v5801_v47 }
 0x3a5   :  { %1470 = vmatpush2.msra.mxu1 %v7809_v32  ;;  %v5812_v32 = vld [vmem:[%s7716_s5 + $0xa0] sm:$0xff] }
 0x3a6   :  { %1471 = vmatprep.subr.mxu1 %v7811_v31  ;;  %v7819_v58 = vunpack.c.h.bf16 %v5812_v32  ;;  %v7821_v31 = vunpack.c.l.bf16 %v5812_v32 }
 0x3a7   :  { %1472 = vmatpush2.msra.mxu1 %v7812_v54  ;;  %v5823_v54 = vld [vmem:[%s7716_s5 + $0x98] sm:$0xff] }
 0x3a8   :  { %1473 = vmatprep.subr.mxu1 %v7814_v37  ;;  %v7822_v45 = vunpack.c.h.bf16 %v5823_v54  ;;  %v1197_v37 = vsel %vm7882_vm14, %v5568_v33, %v5598_v10  ;;  %v7825_v10 = vunpack.c.l.bf16 %v5837_v36  ;;  %v5849_v33 = vld [vmem:[%s7716_s5 + $0x88] sm:$0xff]  ;;  %s4250_s5 = smov 112   ;;  %vm7947_vm14 = vmmov %vm7898_vm1 }
 0x3a9   :  { %1474 = vmatpush2.msra.mxu1 %v7815_v46  ;;  %v7823_v46 = vunpack.c.l.bf16 %v5823_v54  ;;  %v7832_v38 = vunpack.c.l.bf16 %v5849_v33 }
 0x3aa   :  { %1475 = vmatprep.subr.mxu1 %v7819_v58  ;;  %v7826_v58 = vunpack.c.h.bf16 %v5837_v36 }
 0x3ab   :  { %1476 = vmatpush2.msra.mxu1 %v7821_v31  ;;  %v5853_v31 = vmax.f32 %v1149_v63, %v1197_v37 }
 0x3ac   :  { %1477 = vmatprep.subr.mxu1 %v7822_v45 }
 0x3ad   :  { %1478 = vmatpush2.msra.mxu1 %v7823_v46  ;;  %v7831_v46 = vunpack.c.h.bf16 %v5849_v33 }
 0x3ae   :  { %1479 = vmatprep.subr.mxu1 %v7826_v58 }
 0x3af   :  { %1480 = vmatpush2.msra.mxu1 %v7825_v10 }
 0x3b0   :  { %v1190_v9 = vpop.permute.xlu1 %1189  ;;  %v1192_v28 = vpop.permute.xlu0 %1191  ;;  %1481 = vmatprep.subr.mxu1 %v7831_v46 }
 0x3b1   :  { %v1202_v21 = vsel %vm7883_vm15, %v1190_v9, %v1192_v28  ;;  %1482 = vmatpush2.msra.mxu1 %v7832_v38  ;;  %vm7950_vm15 = vmmov %vm7898_vm1 }
 0x3b2   :  { %v5857_v45 = vmax.f32 %v1155_v29, %v1202_v21  ;;  %v7833_v29 = vunpack.c.h.bf16 %v5868_v12 }
 0x3b4   :  { %v4170_v63 = vpack.i.bf16 %v5857_v45, %v5853_v31  ;;  %v1188_v41 = vpop.permute.xlu1 %1187  ;;  %v4162_v21 = vpop.permute.xlu0 %4161  ;;  %1483 = vmatprep.subr.mxu1 %v7833_v29 }
 0x3b5   :  { %v1201_v37 = vsel %vm7884_vm10, %v1188_v41, %v1190_v9  ;;  %v4164_v10 = vunpack.i.h.bf16 %v4162_v21  ;;  %v4163_v58 = vunpack.i.l.bf16 %v4162_v21  ;;  %1484 = vmatpush2.msra.mxu1 %v1366_v8  ;;  %v7888_v21 = vmax.f32 %v5390_v50, 0.0  ;;  %vm7951_vm10 = vmmov %vm7898_vm1 }
 0x3b6   :  { %v5881_v1 = vmax.f32 %v7885_v40, %v1201_v37  ;;  %4171 = vrot.lane.b32.xlu1 %v4170_v63, %s4235_s23  ;;  %v7889_v40 = vmax.f32 %v5386_v52, 0.0  ;;  %v7890_v63 = vmax.f32 %v5388_v51, 0.0 }
 0x3b7   :  { %v1193_v46 = vsel %vm7886_vm11, %v4164_v10, %v4163_v58  ;;  %v1194_v9 = vsel %vm7887_vm3, %v4163_v58, %v5497_v14  ;;  %v5893_v38 = vmax.f32 %v7888_v21, %v1192_v28  ;;  %v7891_v58 = vunpack.c.h.bf16 %v5426_v25  ;;  %vm7958_vm11 = vmmov %vm7898_vm1 }
 0x3b8   :  { %v5897_v7 = vmax.f32 %v7889_v40, %v1193_v46  ;;  %v5901_v37 = vmax.f32 %v7890_v63, %v1194_v9  ;;  %v4167_v29 = vpop.permute.xlu1 %4166  ;;  %1257 = vrot.lane.b32.xlu0 %v5881_v1, %s4235_s23  ;;  %v1186_v28 = vpop.permute.xlu0 %1185  ;;  %v7894_v46 = vmax.f32 %v5400_v6, 0.0  ;;  %v7895_v9 = vmax.f32 %v5402_v42, 0.0  ;;  %vm7959_vm3 = vmmov %vm7898_vm1 }
 0x3b9   :  { %3997 = vmatprep.subr.msk.mxu1 %vm494_vm13, %v7891_v58  ;;  %v4169_v14 = vunpack.i.h.bf16 %v4167_v29  ;;  %v4168_v50 = vunpack.i.l.bf16 %v4167_v29  ;;  %v1200_v29 = vsel %vm7896_vm7, %v1186_v28, %v1188_v41  ;;  %v7897_v58 = vmax.f32 %v5417_v35, 0.0  ;;  %vm7965_vm7 = vmmov %vm7898_vm1 }
 0x3ba   :  { %1261 = vrot.lane.b32.xlu1 %v5893_v38, %s4235_s23  ;;  %v4175_v40 = vpack.i.bf16 %v5897_v7, %v5901_v37 }
 0x3bb   :  { %v1198_v52 = vsel %vm7892_vm4, %v4169_v14, %v4168_v50  ;;  %v1199_v51 = vsel %vm7893_vm5, %v4168_v50, %v1186_v28  ;;  %v5928_v14 = vmax.f32 %v7897_v58, %v1200_v29  ;;  %v7907_v29 = vunpack.c.l.bf16 %v5532_v39  ;;  %vm7962_vm4 = vmmov %vm7898_vm1 }
 0x3bc   :  { %v5914_v10 = vmax.f32 %v7894_v46, %v1198_v52  ;;  %v5918_v21 = vmax.f32 %v7895_v9, %v1199_v51  ;;  %v7899_v52 = vunpack.c.l.bf16 %v5464_v20  ;;  %v7900_v51 = vunpack.c.h.bf16 %v5486_v15  ;;  %vm7963_vm5 = vmmov %vm7898_vm1 }
 0x3bd   :  { %v7901_v46 = vunpack.c.l.bf16 %v5486_v15  ;;  %v7903_v9 = vunpack.c.l.bf16 %v5506_v23  ;;  %v7905_v20 = vunpack.c.l.bf16 %v5521_v57  ;;  %v7908_v15 = vunpack.c.h.bf16 %v5543_v43 }
 0x3be   :  { %v4180_v63 = vpack.i.bf16 %v5914_v10, %v5918_v21  ;;  %4176 = vrot.lane.b32.xlu1 %v4175_v40, %s4235_s23  ;;  %v7906_v40 = vunpack.c.h.bf16 %v5532_v39  ;;  %v7911_v58 = vunpack.c.l.bf16 %v5548_v60  ;;  %v7914_v39 = vunpack.c.h.bf16 %v5576_v62 }
 0x3c0   :  { %4181 = vrot.lane.b32.xlu0 %v4180_v63, %s4235_s23  ;;  %v7909_v63 = vunpack.c.l.bf16 %v5543_v43  ;;  %v7916_v43 = vunpack.c.h.bf16 %v5593_v49 }
 0x3c2   :  { %1255 = vrot.lane.b32.xlu1 %v5928_v14, %s4235_s23  ;;  %s4251_s23 = smov 114  }
 0x3f3   :  { %v5933_v6 = vpop.permute.xlu1 %1243 }
 0x3f7   :  { %v1246_v42 = vpop.permute.xlu0 %1245 }
 0x3f8   :  { %v1265_v41 = vsel %vm7898_vm1, %v5933_v6, %v1246_v42  ;;  %vm1593_vm1 = vcmask 916480  }
 0x3f9   :  { %v1287_v50 = vmax.f32 %v5552_v24, %v1265_v41  ;;  %v7902_v24 = vunpack.c.h.bf16 %v5506_v23  ;;  %v7910_v23 = vunpack.c.h.bf16 %v5548_v60  ;;  %v7913_v41 = vunpack.c.l.bf16 %v5561_v48 }
 0x3fa   :  { %v7918_v60 = vunpack.c.h.bf16 %v5608_v11 }
 0x3fb   :  { %3995 = vmatmul.mubr.msk.f32.vlgmr.msra.gmra.mxu0 %vm1408_vm9, %v1287_v50  ;;  %v1250_v28 = vpop.permute.xlu0 %1249  ;;  %v7915_v50 = vunpack.c.l.bf16 %v5576_v62  ;;  %v7922_v62 = vunpack.c.h.bf16 %v5637_v17 }
 0x3fc   :  { %v1290_v35 = vmax.f32 %v5613_v34, %v1250_v28  ;;  %1568 = vmatprep.mubr.f32.mxu0 %v7860_v3  ;;  %1607 = vmatpush1.msra.mxu0 %v7899_v52  ;;  %v7904_v34 = vunpack.c.h.bf16 %v5521_v57  ;;  %v7912_v57 = vunpack.c.h.bf16 %v5561_v48  ;;  %v7919_v52 = vunpack.c.l.bf16 %v5608_v11 }
 0x3fd   :  { %1608 = vmatprep.subr.mxu0 %v7900_v51  ;;  %v7920_v48 = vunpack.c.h.bf16 %v5624_v5  ;;  %v7921_v51 = vunpack.c.l.bf16 %v5624_v5  ;;  %v7926_v11 = vunpack.c.h.bf16 %v5659_v44  ;;  %v7928_v5 = vunpack.c.h.bf16 %v5670_v16 }
 0x3fe   :  { %1585 = vrot.lane.b32.xlu1 %v1290_v35, %s4250_s5  ;;  %1609 = vmatpush1.msra.mxu0 %v7901_v46  ;;  %v7917_v35 = vunpack.c.l.bf16 %v5593_v49  ;;  %v7923_v46 = vunpack.c.l.bf16 %v5637_v17  ;;  %v7924_v49 = vunpack.c.h.bf16 %v5648_v26  ;;  %v7930_v17 = vunpack.c.h.bf16 %v5681_v56 }
 0x3ff   :  { %1610 = vmatprep.subr.mxu0 %v7902_v24  ;;  %v7925_v24 = vunpack.c.l.bf16 %v5648_v26  ;;  %v7932_v26 = vunpack.c.h.bf16 %v5692_v55 }
 0x400   :  { %1611 = vmatpush1.msra.mxu0 %v7903_v9  ;;  %v7927_v9 = vunpack.c.l.bf16 %v5659_v44  ;;  %v7934_v44 = vunpack.c.h.bf16 %v5703_v2 }
 0x401   :  { %1612 = vmatprep.subr.mxu0 %v7904_v34  ;;  %v7929_v34 = vunpack.c.l.bf16 %v5670_v16  ;;  %v7936_v16 = vunpack.c.h.bf16 %v5714_v13 }
 0x402   :  { %1613 = vmatpush1.msra.mxu0 %v7905_v20  ;;  %v7931_v20 = vunpack.c.l.bf16 %v5681_v56  ;;  %v7938_v56 = vunpack.c.h.bf16 %v5725_v30 }
 0x403   :  { %1614 = vmatprep.subr.mxu0 %v7906_v40  ;;  %v7933_v40 = vunpack.c.l.bf16 %v5692_v55  ;;  %v7940_v55 = vunpack.c.h.bf16 %v5736_v19 }
 0x404   :  { %1615 = vmatpush1.msra.mxu0 %v7907_v29  ;;  %v7935_v29 = vunpack.c.l.bf16 %v5703_v2  ;;  %v7942_v2 = vunpack.c.h.bf16 %v5747_v53 }
 0x405   :  { %1616 = vmatprep.subr.mxu0 %v7908_v15  ;;  %v7937_v15 = vunpack.c.l.bf16 %v5714_v13 }
 0x406   :  { %1617 = vmatpush1.msra.mxu0 %v7909_v63  ;;  %v7939_v63 = vunpack.c.l.bf16 %v5725_v30 }
 0x407   :  { %1618 = vmatprep.subr.mxu0 %v7910_v23  ;;  %v7941_v23 = vunpack.c.l.bf16 %v5736_v19 }
 0x408   :  { %1619 = vmatpush1.msra.mxu0 %v7911_v58 }
 0x409   :  { %1620 = vmatprep.subr.mxu0 %v7912_v57  ;;  %v7943_v57 = vunpack.c.l.bf16 %v5747_v53 }
 0x40a   :  { %1621 = vmatpush1.msra.mxu0 %v7913_v41 }
 0x40b   :  { %1622 = vmatprep.subr.mxu0 %v7914_v39  ;;  %v7944_v39 = vunpack.c.h.bf16 %v5758_v27 }
 0x40c   :  { %1623 = vmatpush1.msra.mxu0 %v7915_v50  ;;  %v7945_v50 = vunpack.c.l.bf16 %v5758_v27 }
 0x40d   :  { %1624 = vmatprep.subr.mxu0 %v7916_v43 }
 0x40e   :  { %1625 = vmatpush1.msra.mxu0 %v7917_v35  ;;  %v7948_v35 = vunpack.c.h.bf16 %v5769_v61 }
 0x40f   :  { %1626 = vmatprep.subr.mxu0 %v7918_v60 }
 0x410   :  { %1627 = vmatpush1.msra.mxu0 %v7919_v52 }
 0x411   :  { %1628 = vmatprep.subr.mxu0 %v7920_v48  ;;  %v7949_v48 = vunpack.c.l.bf16 %v5769_v61 }
 0x412   :  { %1629 = vmatpush1.msra.mxu0 %v7921_v51 }
 0x413   :  { %1630 = vmatprep.subr.mxu0 %v7922_v62 }
 0x414   :  { %1631 = vmatpush1.msra.mxu0 %v7923_v46 }
 0x415   :  { %1632 = vmatprep.subr.mxu0 %v7924_v49 }
 0x416   :  { %1633 = vmatpush1.msra.mxu0 %v7925_v24 }
 0x417   :  { %1634 = vmatprep.subr.mxu0 %v7926_v11 }
 0x418   :  { %1635 = vmatpush1.msra.mxu0 %v7927_v9 }
 0x419   :  { %1636 = vmatprep.subr.mxu0 %v7928_v5  ;;  %v7957_v5 = vunpack.c.l.bf16 %v5812_v32 }
 0x41a   :  { %1637 = vmatpush1.msra.mxu0 %v7929_v34 }
 0x41b   :  { %1638 = vmatprep.subr.mxu0 %v7930_v17 }
 0x41c   :  { %1639 = vmatpush2.msra.mxu0 %v7931_v20 }
 0x41d   :  { %1640 = vmatprep.subr.mxu0 %v7932_v26 }
 0x41e   :  { %1641 = vmatpush2.msra.mxu0 %v7933_v40 }
 0x41f   :  { %1642 = vmatprep.subr.mxu0 %v7934_v44 }
 0x420   :  { %1643 = vmatpush2.msra.mxu0 %v7935_v29 }
 0x421   :  { %1644 = vmatprep.subr.mxu0 %v7936_v16 }
 0x422   :  { %1645 = vmatpush2.msra.mxu0 %v7937_v15  ;;  %v7964_v15 = vunpack.c.h.bf16 %v5837_v36 }
 0x423   :  { %1646 = vmatprep.subr.mxu0 %v7938_v56 }
 0x424   :  { %1647 = vmatpush2.msra.mxu0 %v7939_v63  ;;  %v7966_v63 = vunpack.c.l.bf16 %v5837_v36  ;;  %v7971_v36 = vunpack.c.h.bf16 %v5868_v12 }
 0x425   :  { %1648 = vmatprep.subr.mxu0 %v7940_v55  ;;  %v7968_v55 = vunpack.c.l.bf16 %v5426_v25  ;;  %v7973_v25 = vunpack.c.h.bf16 %v5459_v4 }
 0x426   :  { %1649 = vmatpush2.msra.mxu0 %v7941_v23  ;;  %v7972_v23 = vunpack.c.l.bf16 %v5431_v0 }
 0x427   :  { %1650 = vmatprep.subr.mxu0 %v7942_v2  ;;  %v7976_v2 = vunpack.c.l.bf16 %v5469_v22 }
 0x428   :  { %v4172_v58 = vpop.permute.xlu1 %4171  ;;  %1651 = vmatpush2.msra.mxu0 %v7943_v57 }
 0x429   :  { %v4174_v13 = vunpack.i.h.bf16 %v4172_v58  ;;  %v4173_v41 = vunpack.i.l.bf16 %v4172_v58  ;;  %1652 = vmatprep.subr.mxu0 %v7944_v39  ;;  %v7977_v58 = vld [vmem:[#allocation12_spill] sm:$0xff] }
 0x42a   :  { %v1258_v30 = vpop.permute.xlu0 %1257  ;;  %1653 = vmatpush2.msra.mxu0 %v7945_v50  ;;  %v7978_v12 = vunpack.c.h.bf16 %v7977_v58 }
 0x42b   :  { %v1266_v43 = vsel %vm7946_vm12, %v1246_v42, %v4173_v41  ;;  %v1267_v19 = vsel %vm7947_vm14, %v4173_v41, %v1250_v28  ;;  %1654 = vmatprep.subr.mxu0 %v7948_v35  ;;  %v1271_v51 = vsel %vm7950_vm15, %v1258_v30, %v4174_v13  ;;  %v7952_v42 = vunpack.c.h.bf16 %v5790_v59 }
 0x42c   :  { %v1288_v60 = vmax.f32 %v5585_v18, %v1266_v43  ;;  %v1289_v53 = vmax.f32 %v5853_v31, %v1267_v19  ;;  %v1262_v52 = vpop.permute.xlu1 %1261  ;;  %1655 = vmatpush2.msra.mxu0 %v7949_v48  ;;  %v7953_v18 = vunpack.c.l.bf16 %v5790_v59  ;;  %v7954_v31 = vunpack.c.h.bf16 %v5801_v47 }
 0x42d   :  { %v1272_v27 = vsel %vm7951_vm10, %v4174_v13, %v1262_v52  ;;  %v1296_v62 = vmax.f32 %v5893_v38, %v1262_v52  ;;  %1656 = vmatprep.subr.mxu0 %v7952_v42  ;;  %v1294_v61 = vmax.f32 %v5881_v1, %v1271_v51  ;;  %v7955_v38 = vunpack.c.l.bf16 %v5801_v47 }
 0x42e   :  { %v1295_v28 = vmax.f32 %v5857_v45, %v1272_v27  ;;  %v4185_v46 = vpack.i.bf16 %v1288_v60, %v1289_v53  ;;  %1657 = vmatpush2.msra.mxu0 %v7953_v18  ;;  %v7956_v45 = vunpack.c.h.bf16 %v5812_v32  ;;  %v7960_v47 = vunpack.c.h.bf16 %v5823_v54 }
 0x42f   :  { %1591 = vrot.lane.b32.xlu1 %v1296_v62, %s4250_s5  ;;  %1658 = vmatprep.subr.mxu0 %v7954_v31  ;;  %v7961_v32 = vunpack.c.l.bf16 %v5823_v54  ;;  %v7967_v54 = vunpack.c.h.bf16 %v5849_v33  ;;  %vm1893_vm12 = vcmask 932864   ;;  %vm1878_vm14 = vcmask 941056  }
 0x430   :  { %4186 = vrot.lane.b32.xlu0 %v4185_v46, %s4250_s5  ;;  %v4177_v49 = vpop.permute.xlu1 %4176  ;;  %1659 = vmatpush2.msra.mxu0 %v7955_v38  ;;  %v4190_v59 = vpack.i.bf16 %v1294_v61, %v1295_v28  ;;  %vm1863_vm15 = vcmask 949248   ;;  %vm2084_vm10 = vcmask 957440  }
 0x431   :  { %v4179_v24 = vunpack.i.h.bf16 %v4177_v49  ;;  %v4178_v11 = vunpack.i.l.bf16 %v4177_v49  ;;  %1660 = vmatprep.subr.mxu0 %v7956_v45 }
 0x432   :  { %v4182_v9 = vpop.permute.xlu0 %4181  ;;  %1661 = vmatpush2.msra.mxu0 %v7957_v5 }
 0x433   :  { %v1263_v34 = vsel %vm7958_vm11, %v4179_v24, %v4178_v11  ;;  %v4184_v17 = vunpack.i.h.bf16 %v4182_v9  ;;  %v4183_v1 = vunpack.i.l.bf16 %v4182_v9  ;;  %v1264_v20 = vsel %vm7959_vm3, %v4178_v11, %v5933_v6  ;;  %1662 = vmatprep.subr.mxu0 %v7960_v47 }
 0x434   :  { %v1285_v26 = vmax.f32 %v5897_v7, %v1263_v34  ;;  %4191 = vrot.lane.b32.xlu0 %v4190_v59, %s4250_s5  ;;  %v1256_v40 = vpop.permute.xlu1 %1255  ;;  %v1286_v44 = vmax.f32 %v5901_v37, %v1264_v20  ;;  %1663 = vmatpush2.msra.mxu0 %v7961_v32  ;;  %vm7984_vm11 = vcmask 1022976   ;;  %vm7986_vm3 = vcmask 1031168  }
 0x435   :  { %v1269_v29 = vsel %vm7962_vm4, %v4183_v1, %v1256_v40  ;;  %v1270_v16 = vsel %vm7963_vm5, %v1256_v40, %v1258_v30  ;;  %1664 = vmatprep.subr.mxu0 %v7964_v15  ;;  %v1268_v56 = vsel %vm7965_vm7, %v4184_v17, %v4183_v1  ;;  %vm7987_vm4 = vcmask 1039360   ;;  %vm7988_vm5 = vmmov %vm7984_vm11 }
 0x436   :  { %v1293_v6 = vmax.f32 %v5928_v14, %v1270_v16  ;;  %1485 = vmatprep.mubr.f32.mxu1 %v1286_v44  ;;  %v1292_v7 = vmax.f32 %v5918_v21, %v1269_v29  ;;  %1665 = vmatpush2.msra.mxu0 %v7966_v63  ;;  %v1291_v37 = vmax.f32 %v5914_v10, %v1268_v56  ;;  %v7969_v21 = vunpack.c.l.bf16 %v5849_v33  ;;  %vm7989_vm7 = vmmov %vm7986_vm3 }
 0x437   :  { %1486 = vmatmul.mubr.f32.vlgmr.msra.gmra.mxu1 %v1285_v26  ;;  %1666 = vmatprep.subr.mxu0 %v7967_v54  ;;  %v7970_v14 = vunpack.c.h.bf16 %v5431_v0  ;;  %v7974_v33 = vunpack.c.l.bf16 %v5459_v4  ;;  %v7975_v10 = vunpack.c.h.bf16 %v5469_v22 }
 0x438   :  { %1491 = vmatprep.mubr.f32.mxu1 %v1292_v7  ;;  %3996 = vmatmul.mubr.msk.f32.gmra.mxu0 %vm1408_vm9, %v1293_v6 }
 0x439   :  { %3998 = vmatpush1.msk.msra.mxu1 %vm494_vm13, %v7968_v55  ;;  %1667 = vmatpush2.msra.mxu0 %v7969_v21 }
 0x43a   :  { %1707 = vmatprep.subr.mxu1 %v7970_v14  ;;  %1668 = vmatprep.subr.mxu0 %v7971_v36 }
 0x43b   :  { %1492 = vmatmul.mubr.f32.gmra.mxu1 %v1291_v37  ;;  %1669 = vmatpush2.msra.mxu0 %v1366_v8  ;;  %v7979_v8 = vunpack.c.l.bf16 %v7977_v58 }
 0x43c   :  { %1708 = vmatpush1.msra.mxu1 %v7972_v23  ;;  %1747 = vmatprep.mubr.f32.mxu1 %v7860_v3 }
 0x43d   :  { %1709 = vmatprep.subr.mxu1 %v7973_v25 }
 0x43e   :  { %1710 = vmatpush1.msra.mxu1 %v7974_v33 }
 0x43f   :  { %1711 = vmatprep.subr.mxu1 %v7975_v10 }
 0x440   :  { %1712 = vmatpush1.msra.mxu1 %v7976_v2 }
 0x441   :  { %1713 = vmatprep.subr.mxu1 %v7978_v12 }
 0x442   :  { %1714 = vmatpush1.msra.mxu1 %v7979_v8 }
 0x470   :  { %v1586_v0 = vpop.permute.xlu1 %1585 }
 0x471   :  { %3999 = vmatmul.mubr.msk.f32.vlgmr.msra.gmra.mxu1 %vm1408_vm9, %v1586_v0 }
 0x472   :  { %1753 = vmatprep.mubr.f32.mxu1 %v7860_v3 }
 0x4a1   :  { %v1592_v57 = vpop.permute.xlu1 %1591 }
 0x4a2   :  { %v4187_v4 = vpop.permute.xlu0 %4186  ;;  %4000 = vmatmul.mubr.msk.f32.gmra.mxu1 %vm1408_vm9, %v1592_v57  ;;  %vm1772_vm9 = vcmask 130048  }
 0x4a3   :  { %v4189_v13 = vunpack.i.h.bf16 %v4187_v4  ;;  %v4188_v41 = vunpack.i.l.bf16 %v4187_v4 }
 0x4a5   :  { %v1595_v22 = vsel %vm1593_vm1, %v4188_v41, %v1586_v0  ;;  %v1594_v39 = vsel %vm1593_vm1, %v4189_v13, %v4188_v41 }
 0x4a6   :  { %v4192_v30 = vpop.permute.xlu0 %4191  ;;  %1670 = vmatprep.mubr.f32.mxu0 %v1595_v22 }
 0x4a7   :  { %v4194_v50 = vunpack.i.h.bf16 %v4192_v30  ;;  %v4193_v43 = vunpack.i.l.bf16 %v4192_v30  ;;  %1671 = vmatmul.mubr.f32.vlgmr.msra.gmra.mxu0 %v1594_v39 }
 0x4a9   :  { %v1597_v19 = vsel %vm1593_vm1, %v4193_v43, %v1592_v57  ;;  %v1596_v35 = vsel %vm1593_vm1, %v4194_v50, %v4193_v43 }
 0x4aa   :  { %1676 = vmatprep.mubr.f32.mxu0 %v1597_v19 }
 0x4ab   :  { %1677 = vmatmul.mubr.f32.gmra.mxu0 %v1596_v35 }
 0x4bb   :  { %v1564_v60 = vpop.f32.mrf.mxu0 }
 0x4bd   :  { %v1566_v48 = vpop.f32.mrf.mxu0 }
 0x4f7   :  { %v1487_v53 = vpop.f32.mrf.mxu1 }
 0x4f8   :  { %v6119_v52 = vadd.f32 %v1564_v60, %v1487_v53  ;;  %v1570_v42 = vpop.f32.mrf.mxu0 }
 0x4f9   :  { %v1489_v51 = vpop.f32.mrf.mxu1 }
 0x4fa   :  { %v6121_v27 = vadd.f32 %v1566_v48, %v1489_v51  ;;  %1841 = vrot.lane.b32.xlu0 %v6119_v52, %s4245_s18  ;;  %1885 = vrot.lane.b32.xlu1 %v6119_v52, %s4251_s23  ;;  %v6195_v31 = vpop.f32.mrf.mxu0 }
 0x4fb   :  { %v1493_v62 = vpop.f32.mrf.mxu1 }
 0x4fc   :  { %v6151_v28 = vadd.f32 %v1570_v42, %v1493_v62 }
 0x4fd   :  { %v6193_v46 = vpop.f32.mrf.mxu1 }
 0x4fe   :  { %2033 = vrot.lane.b32.xlu0 %v6119_v52, %s4252_s1  ;;  %1870 = vrot.lane.b32.xlu1 %v6119_v52, %s4253_s29  ;;  %v1573_v35 = vadd.f32 %v6195_v31, %v6193_v46 }
 0x502   :  { %2012 = vrot.lane.b32.xlu0 %v6119_v52, %s4254_s4  ;;  %1855 = vrot.lane.b32.xlu1 %v6119_v52, %s4255_s30 }
 0x506   :  { %1991 = vrot.lane.b32.xlu0 %v6119_v52, %s4256_s16  ;;  %2072 = vrot.lane.b32.xlu1 %v6119_v52, %s4257_s17 }
 0x50a   :  { %1970 = vrot.lane.b32.xlu0 %v6119_v52, %s4258_s19  ;;  %1827 = vrot.lane.b32.xlu1 %v6119_v52, %s4233_s21 }
 0x50e   :  { %1949 = vrot.lane.b32.xlu0 %v6119_v52, %s4259_s22  ;;  %1813 = vrot.lane.b32.xlu1 %v6119_v52, %s4232_s0 }
 0x512   :  { %1929 = vrot.lane.b32.xlu0 %v6119_v52, %s4239_s27  ;;  %1799 = vrot.lane.b32.xlu1 %v6119_v52, %s4231_s20 }
 0x516   :  { %1900 = vrot.lane.b32.xlu1 %v6119_v52, %s4260_s2  ;;  %1889 = vrot.lane.b32.xlu0 %v6151_v28, %s4251_s23 }
 0x51a   :  { %1915 = vrot.lane.b32.xlu1 %v6119_v52, %s4250_s5  ;;  %1874 = vrot.lane.b32.xlu0 %v6151_v28, %s4253_s29 }
 0x51e   :  { %2113 = vrot.lane.b32.xlu1 %v6119_v52, %s4261_s24  ;;  %1859 = vrot.lane.b32.xlu0 %v6151_v28, %s4255_s30 }
 0x522   :  { %2078 = vrot.lane.b32.xlu0 %v6151_v28, %s4257_s17 }
 0x526   :  { %1831 = vrot.lane.b32.xlu0 %v6151_v28, %s4233_s21 }
 0x52a   :  { %1817 = vrot.lane.b32.xlu0 %v6151_v28, %s4232_s0 }
 0x52e   :  { %1803 = vrot.lane.b32.xlu0 %v6151_v28, %s4231_s20 }
 0x531   :  { %v1749_v18 = vpop.f32.mrf.mxu1 }
 0x532   :  { %1904 = vrot.lane.b32.xlu0 %v6151_v28, %s4260_s2 }
 0x533   :  { %v1751_v61 = vpop.f32.mrf.mxu1 }
 0x536   :  { %1845 = vrot.lane.b32.xlu0 %v6151_v28, %s4245_s18 }
 0x53a   :  { %2039 = vrot.lane.b32.xlu0 %v6151_v28, %s4252_s1 }
 0x53e   :  { %2018 = vrot.lane.b32.xlu0 %v6151_v28, %s4254_s4 }
 0x542   :  { %1997 = vrot.lane.b32.xlu0 %v6151_v28, %s4256_s16 }
 0x546   :  { %1976 = vrot.lane.b32.xlu0 %v6151_v28, %s4258_s19 }
 0x54a   :  { %1955 = vrot.lane.b32.xlu0 %v6151_v28, %s4259_s22 }
 0x54e   :  { %1935 = vrot.lane.b32.xlu0 %v6151_v28, %s4239_s27 }
 0x552   :  { %1919 = vrot.lane.b32.xlu0 %v6151_v28, %s4250_s5 }
 0x556   :  { %2119 = vrot.lane.b32.xlu0 %v6151_v28, %s4261_s24 }
 0x562   :  { %v1755_v24 = vpop.f32.mrf.mxu1 }
 0x564   :  { %v1757_v34 = vpop.f32.mrf.mxu1 }
 0x567   :  { %v1672_v49 = vpop.f32.mrf.mxu0 }
 0x568   :  { %v1750_v38 = vadd.f32 %v1749_v18, %v1672_v49 }
 0x569   :  { %v1674_v11 = vpop.f32.mrf.mxu0 }
 0x56a   :  { %v1752_v45 = vadd.f32 %v1751_v61, %v1674_v11  ;;  %1764 = vrot.lane.b32.xlu0 %v1750_v38, %s4262_s3 }
 0x56b   :  { %v1678_v59 = vpop.f32.mrf.mxu0 }
 0x56c   :  { %v1756_v9 = vadd.f32 %v1755_v24, %v1678_v59  ;;  %v6197_v5 = vpop.permute.xlu0 %1841  ;;  %1766 = vrot.lane.b32.xlu1 %v1752_v45, %s4262_s3  ;;  %v6235_v36 = vpop.permute.xlu1 %1885 }
 0x56d   :  { %v1680_v17 = vpop.f32.mrf.mxu0 }
 0x56e   :  { %v1758_v1 = vadd.f32 %v1757_v34, %v1680_v17  ;;  %1768 = vrot.lane.b32.xlu0 %v1756_v9, %s4262_s3 }
 0x570   :  { %v6199_v20 = vpop.permute.xlu0 %2033  ;;  %1770 = vrot.lane.b32.xlu1 %v1758_v1, %s4262_s3  ;;  %v6239_v25 = vpop.permute.xlu1 %1870 }
 0x574   :  { %v6201_v47 = vpop.permute.xlu0 %2012  ;;  %v6243_v10 = vpop.permute.xlu1 %1855 }
 0x578   :  { %v6203_v26 = vpop.permute.xlu0 %1991  ;;  %v6247_v58 = vpop.permute.xlu1 %2072 }
 0x57c   :  { %v6205_v40 = vpop.permute.xlu0 %1970  ;;  %v6251_v8 = vpop.permute.xlu1 %1827 }
 0x580   :  { %v6207_v44 = vpop.permute.xlu0 %1949  ;;  %v6255_v57 = vpop.permute.xlu1 %1813 }
 0x584   :  { %v6209_v32 = vpop.permute.xlu0 %1929  ;;  %v6265_v41 = vpop.permute.xlu1 %1799 }
 0x588   :  { %v6211_v29 = vpop.permute.xlu0 %1889  ;;  %v6271_v22 = vpop.permute.xlu1 %1900 }
 0x589   :  { %7981 = vst [vmem:[#allocation11_spill] sm:$0xff] %v6271_v22 }
 0x58c   :  { %v6213_v16 = vpop.permute.xlu0 %1874  ;;  %v6281_v39 = vpop.permute.xlu1 %1915 }
 0x58d   :  { %7982 = vst [vmem:[#allocation9_spill] sm:$0xff] %v6281_v39 }
 0x590   :  { %v6215_v15 = vpop.permute.xlu0 %1859  ;;  %v6287_v30 = vpop.permute.xlu1 %2113 }
 0x591   :  { %7983 = vst [vmem:[#allocation13_spill] sm:$0xff] %v6287_v30 }
 0x594   :  { %v6217_v6 = vpop.permute.xlu0 %2078 }
 0x598   :  { %v6219_v7 = vpop.permute.xlu0 %1831 }
 0x59c   :  { %v6221_v56 = vpop.permute.xlu0 %1817 }
 0x5a0   :  { %v6223_v63 = vpop.permute.xlu0 %1803 }
 0x5a4   :  { %v6225_v54 = vpop.permute.xlu0 %1904 }
 0x5a8   :  { %v6227_v37 = vpop.permute.xlu0 %1845 }
 0x5ac   :  { %v6229_v55 = vpop.permute.xlu0 %2039 }
 0x5b0   :  { %v6231_v21 = vpop.permute.xlu0 %2018 }
 0x5b4   :  { %v6233_v14 = vpop.permute.xlu0 %1997 }
 0x5b8   :  { %v6237_v23 = vpop.permute.xlu0 %1976 }
 0x5bc   :  { %v6241_v33 = vpop.permute.xlu0 %1955 }
 0x5c0   :  { %v6245_v2 = vpop.permute.xlu0 %1935 }
 0x5c4   :  { %v6249_v12 = vpop.permute.xlu0 %1919 }
 0x5c8   :  { %v6253_v0 = vpop.permute.xlu0 %2119 }
 0x5c9   :  { %7980 = vst [vmem:[#allocation8_spill] sm:$0xff] %v6253_v0 }
 0x5dc   :  { %v1765_v4 = vpop.permute.xlu0 %1764 }
 0x5dd   :  { %v6259_v13 = vsel %vm1772_vm9, %v6121_v27, %v1765_v4 }
 0x5de   :  { %2035 = vrot.lane.b32.xlu0 %v6259_v13, %s4252_s1  ;;  %1887 = vrot.lane.b32.xlu1 %v6259_v13, %s4251_s23  ;;  %v1767_v50 = vpop.permute.xlu1 %1766 }
 0x5df   :  { %v1773_v43 = vsel %vm1772_vm9, %v1765_v4, %v1767_v50 }
 0x5e0   :  { %v1769_v19 = vpop.permute.xlu0 %1768 }
 0x5e1   :  { %v6322_v60 = vsel %vm1772_vm9, %v1573_v35, %v1769_v19 }
 0x5e2   :  { %2014 = vrot.lane.b32.xlu0 %v6259_v13, %s4254_s4  ;;  %1872 = vrot.lane.b32.xlu1 %v6259_v13, %s4253_s29  ;;  %v1771_v53 = vpop.permute.xlu1 %1770 }
 0x5e3   :  { %v1774_v48 = vsel %vm1772_vm9, %v1769_v19, %v1771_v53 }
 0x5e6   :  { %1993 = vrot.lane.b32.xlu0 %v6259_v13, %s4256_s16  ;;  %1857 = vrot.lane.b32.xlu1 %v6259_v13, %s4255_s30 }
 0x5ea   :  { %1972 = vrot.lane.b32.xlu0 %v6259_v13, %s4258_s19  ;;  %2074 = vrot.lane.b32.xlu1 %v6259_v13, %s4257_s17 }
 0x5ee   :  { %1951 = vrot.lane.b32.xlu0 %v6259_v13, %s4259_s22  ;;  %1829 = vrot.lane.b32.xlu1 %v6259_v13, %s4233_s21 }
 0x5f2   :  { %1931 = vrot.lane.b32.xlu0 %v6259_v13, %s4239_s27  ;;  %1815 = vrot.lane.b32.xlu1 %v6259_v13, %s4232_s0 }
 0x5f6   :  { %1917 = vrot.lane.b32.xlu0 %v6259_v13, %s4250_s5  ;;  %1801 = vrot.lane.b32.xlu1 %v6259_v13, %s4231_s20 }
 0x5fa   :  { %1902 = vrot.lane.b32.xlu1 %v6259_v13, %s4260_s2  ;;  %2101 = vrot.lane.b32.xlu0 %v1773_v43, %s4251_s23 }
 0x5fe   :  { %1843 = vrot.lane.b32.xlu1 %v6259_v13, %s4245_s18  ;;  %2095 = vrot.lane.b32.xlu0 %v1773_v43, %s4253_s29 }
 0x602   :  { %2115 = vrot.lane.b32.xlu1 %v6259_v13, %s4261_s24  ;;  %2089 = vrot.lane.b32.xlu0 %v1773_v43, %s4255_s30 }
 0x606   :  { %2037 = vrot.lane.b32.xlu1 %v1773_v43, %s4252_s1  ;;  %2076 = vrot.lane.b32.xlu0 %v1773_v43, %s4257_s17 }
 0x60a   :  { %2016 = vrot.lane.b32.xlu1 %v1773_v43, %s4254_s4  ;;  %2066 = vrot.lane.b32.xlu0 %v1773_v43, %s4233_s21 }
 0x60e   :  { %1995 = vrot.lane.b32.xlu1 %v1773_v43, %s4256_s16  ;;  %2060 = vrot.lane.b32.xlu0 %v1773_v43, %s4232_s0 }
 0x612   :  { %1974 = vrot.lane.b32.xlu1 %v1773_v43, %s4258_s19  ;;  %2054 = vrot.lane.b32.xlu0 %v1773_v43, %s4231_s20 }
 0x616   :  { %1953 = vrot.lane.b32.xlu1 %v1773_v43, %s4259_s22  ;;  %2107 = vrot.lane.b32.xlu0 %v1773_v43, %s4260_s2 }
 0x61a   :  { %1933 = vrot.lane.b32.xlu1 %v1773_v43, %s4239_s27  ;;  %2117 = vrot.lane.b32.xlu0 %v1773_v43, %s4261_s24 }
 0x61e   :  { %1847 = vrot.lane.b32.xlu1 %v6322_v60, %s4245_s18  ;;  %1891 = vrot.lane.b32.xlu0 %v6322_v60, %s4251_s23 }
 0x622   :  { %1921 = vrot.lane.b32.xlu1 %v6322_v60, %s4250_s5  ;;  %1876 = vrot.lane.b32.xlu0 %v6322_v60, %s4253_s29 }
 0x626   :  { %2103 = vrot.lane.b32.xlu1 %v1774_v48, %s4251_s23  ;;  %1861 = vrot.lane.b32.xlu0 %v6322_v60, %s4255_s30 }
 0x62a   :  { %2097 = vrot.lane.b32.xlu1 %v1774_v48, %s4253_s29  ;;  %2080 = vrot.lane.b32.xlu0 %v6322_v60, %s4257_s17 }
 0x62e   :  { %2091 = vrot.lane.b32.xlu1 %v1774_v48, %s4255_s30  ;;  %1833 = vrot.lane.b32.xlu0 %v6322_v60, %s4233_s21 }
 0x632   :  { %2082 = vrot.lane.b32.xlu1 %v1774_v48, %s4257_s17  ;;  %1819 = vrot.lane.b32.xlu0 %v6322_v60, %s4232_s0 }
 0x636   :  { %2068 = vrot.lane.b32.xlu1 %v1774_v48, %s4233_s21  ;;  %1805 = vrot.lane.b32.xlu0 %v6322_v60, %s4231_s20 }
 0x63a   :  { %2062 = vrot.lane.b32.xlu1 %v1774_v48, %s4232_s0  ;;  %1906 = vrot.lane.b32.xlu0 %v6322_v60, %s4260_s2 }
 0x63e   :  { %2056 = vrot.lane.b32.xlu1 %v1774_v48, %s4231_s20  ;;  %2041 = vrot.lane.b32.xlu0 %v6322_v60, %s4252_s1 }
 0x642   :  { %2109 = vrot.lane.b32.xlu1 %v1774_v48, %s4260_s2  ;;  %2020 = vrot.lane.b32.xlu0 %v6322_v60, %s4254_s4 }
 0x646   :  { %2043 = vrot.lane.b32.xlu1 %v1774_v48, %s4252_s1  ;;  %1999 = vrot.lane.b32.xlu0 %v6322_v60, %s4256_s16 }
 0x64a   :  { %2022 = vrot.lane.b32.xlu1 %v1774_v48, %s4254_s4  ;;  %1978 = vrot.lane.b32.xlu0 %v6322_v60, %s4258_s19 }
 0x64e   :  { %2001 = vrot.lane.b32.xlu1 %v1774_v48, %s4256_s16  ;;  %1957 = vrot.lane.b32.xlu0 %v6322_v60, %s4259_s22 }
 0x650   :  { %v6366_v51 = vpop.permute.xlu1 %1887  ;;  %v6368_v27 = vpop.permute.xlu0 %2035 }
 0x651   :  { %v6395_v24 = vsel %vm1893_vm12, %v6235_v36, %v6366_v51 }
 0x652   :  { %1980 = vrot.lane.b32.xlu1 %v1774_v48, %s4258_s19  ;;  %1937 = vrot.lane.b32.xlu0 %v6322_v60, %s4239_s27 }
 0x654   :  { %v6373_v62 = vpop.permute.xlu1 %1872  ;;  %v6375_v42 = vpop.permute.xlu0 %2014 }
 0x655   :  { %v6406_v59 = vsel %vm1878_vm14, %v6239_v25, %v6373_v62 }
 0x656   :  { %1959 = vrot.lane.b32.xlu1 %v1774_v48, %s4259_s22  ;;  %2121 = vrot.lane.b32.xlu0 %v6322_v60, %s4261_s24 }
 0x658   :  { %v6380_v46 = vpop.permute.xlu1 %1857  ;;  %v6382_v18 = vpop.permute.xlu0 %1993 }
 0x659   :  { %v6417_v17 = vsel %vm1863_vm15, %v6243_v10, %v6380_v46 }
 0x65a   :  { %1939 = vrot.lane.b32.xlu1 %v1774_v48, %s4239_s27 }
 0x65c   :  { %v2075_v31 = vpop.permute.xlu1 %2074  ;;  %v6385_v61 = vpop.permute.xlu0 %1972 }
 0x65d   :  { %v2085_v25 = vsel %vm2084_vm10, %v6247_v58, %v2075_v31 }
 0x65e   :  { %2123 = vrot.lane.b32.xlu1 %v1774_v48, %s4261_s24 }
 0x660   :  { %v6388_v49 = vpop.permute.xlu1 %1829  ;;  %v6390_v38 = vpop.permute.xlu0 %1951 }
 0x661   :  { %v6432_v10 = vsel %vm7984_vm11, %v6251_v8, %v6388_v49  ;;  %vm7990_vm11 = vmmov %vm7987_vm4 }
 0x662   :  { %2197 = vrot.lane.b32.xlu1 %v6395_v24, %s4261_s24 }
 0x664   :  { %v6399_v11 = vpop.permute.xlu1 %1815  ;;  %v6401_v45 = vpop.permute.xlu0 %1931 }
 0x665   :  { %v6444_v35 = vsel %vm7986_vm3, %v6255_v57, %v6399_v11 }
 0x666   :  { %2185 = vrot.lane.b32.xlu1 %v6406_v59, %s4261_s24 }
 0x668   :  { %v6410_v9 = vpop.permute.xlu1 %1801  ;;  %v6412_v34 = vpop.permute.xlu0 %1917 }
 0x66a   :  { %2173 = vrot.lane.b32.xlu1 %v6417_v17, %s4261_s24 }
 0x66c   :  { %v6421_v1 = vpop.permute.xlu1 %1902  ;;  %v2102_v36 = vpop.permute.xlu0 %2101 }
 0x66d   :  { %2201 = vrot.lane.b32.xlu0 %v2102_v36, %s4261_s24 }
 0x66e   :  { %2161 = vrot.lane.b32.xlu1 %v2085_v25, %s4261_s24  ;;  %v6456_v25 = vsel %vm7987_vm4, %v6265_v41, %v6410_v9 }
 0x670   :  { %v6427_v4 = vpop.permute.xlu1 %1843  ;;  %v2096_v50 = vpop.permute.xlu0 %2095 }
 0x671   :  { %v2099_v43 = vsel %vm1878_vm14, %v6373_v62, %v2096_v50 }
 0x672   :  { %2149 = vrot.lane.b32.xlu1 %v6432_v10, %s4261_s24  ;;  %2187 = vrot.lane.b32.xlu0 %v2099_v43, %s4261_s24 }
 0x674   :  { %v6439_v19 = vpop.permute.xlu1 %2115  ;;  %v2090_v58 = vpop.permute.xlu0 %2089 }
 0x675   :  { %7985 = vst [vmem:[#allocation10_spill] sm:$0xff] %v6439_v19  ;;  %v2093_v8 = vsel %vm1863_vm15, %v6380_v46, %v2090_v58 }
 0x676   :  { %2137 = vrot.lane.b32.xlu1 %v6444_v35, %s4261_s24  ;;  %2175 = vrot.lane.b32.xlu0 %v2093_v8, %s4261_s24 }
 0x678   :  { %v6451_v53 = vpop.permute.xlu1 %2037  ;;  %v2077_v48 = vpop.permute.xlu0 %2076 }
 0x679   :  { %v2086_v43 = vsel %vm2084_vm10, %v2075_v31, %v2077_v48 }
 0x67a   :  { %2125 = vrot.lane.b32.xlu1 %v6456_v25, %s4261_s24  ;;  %2163 = vrot.lane.b32.xlu0 %v2086_v43, %s4261_s24 }
 0x67c   :  { %v6462_v57 = vpop.permute.xlu1 %2016  ;;  %v2067_v30 = vpop.permute.xlu0 %2066 }
 0x67d   :  { %v2070_v8 = vsel %vm7988_vm5, %v6388_v49, %v2067_v30 }
 0x67e   :  { %2189 = vrot.lane.b32.xlu1 %v2096_v50, %s4261_s24  ;;  %2151 = vrot.lane.b32.xlu0 %v2070_v8, %s4261_s24 }
 0x680   :  { %v6468_v19 = vpop.permute.xlu1 %1995  ;;  %v2061_v41 = vpop.permute.xlu0 %2060 }
 0x681   :  { %v2064_v31 = vsel %vm7989_vm7, %v6399_v11, %v2061_v41  ;;  %vm2045_vm7 = vcmask 752640  }
 0x682   :  { %2177 = vrot.lane.b32.xlu1 %v2090_v58, %s4261_s24  ;;  %2139 = vrot.lane.b32.xlu0 %v2064_v31, %s4261_s24 }
 0x684   :  { %v6474_v43 = vpop.permute.xlu1 %1974  ;;  %v2055_v0 = vpop.permute.xlu0 %2054 }
 0x685   :  { %v2058_v3 = vsel %vm7990_vm11, %v6410_v9, %v2055_v0  ;;  %vm2024_vm11 = vcmask 818176  }
 0x686   :  { %2165 = vrot.lane.b32.xlu1 %v2077_v48, %s4261_s24  ;;  %2127 = vrot.lane.b32.xlu0 %v2058_v3, %s4261_s24 }
 0x688   :  { %v6480_v50 = vpop.permute.xlu1 %1953  ;;  %v6482_v8 = vpop.permute.xlu0 %2107 }
 0x68a   :  { %2153 = vrot.lane.b32.xlu1 %v2067_v30, %s4261_s24 }
 0x68c   :  { %v6485_v22 = vpop.permute.xlu1 %1933  ;;  %v6487_v58 = vpop.permute.xlu0 %2117 }
 0x68d   :  { %7991 = vst [vmem:[#allocation14_spill] sm:$0xff] %v6487_v58 }
 0x68e   :  { %2141 = vrot.lane.b32.xlu1 %v2061_v41, %s4261_s24  ;;  %v2105_v41 = vsel %vm1893_vm12, %v6366_v51, %v2102_v36 }
 0x690   :  { %v1848_v31 = vpop.permute.xlu1 %1847  ;;  %v1892_v39 = vpop.permute.xlu0 %1891 }
 0x691   :  { %2306 = vmatprep.subr.mxu1 %v1892_v39  ;;  %v1895_v48 = vsel %vm1893_vm12, %v6211_v29, %v1892_v39 }
 0x692   :  { %2129 = vrot.lane.b32.xlu1 %v2055_v0, %s4261_s24  ;;  %2203 = vrot.lane.b32.xlu0 %v1895_v48, %s4261_s24 }
 0x693   :  { %2307 = vmatpush1.msra.mxu1 %v1895_v48 }
 0x694   :  { %2308 = vmatprep.subr.mxu1 %v6366_v51  ;;  %v6495_v3 = vpop.permute.xlu1 %1921  ;;  %v1877_v30 = vpop.permute.xlu0 %1876 }
 0x695   :  { %2309 = vmatpush1.msra.mxu1 %v6395_v24  ;;  %v1880_v58 = vsel %vm1878_vm14, %v6213_v16, %v1877_v30 }
 0x696   :  { %2310 = vmatprep.subr.mxu1 %v1877_v30  ;;  %2199 = vrot.lane.b32.xlu1 %v2105_v41, %s4261_s24 }
 0x697   :  { %2311 = vmatpush1.msra.mxu1 %v1880_v58 }
 0x698   :  { %2312 = vmatprep.subr.mxu1 %v6373_v62  ;;  %v6504_v29 = vpop.permute.xlu1 %2103  ;;  %v1862_v0 = vpop.permute.xlu0 %1861 }
 0x699   :  { %2313 = vmatpush1.msra.mxu1 %v6406_v59  ;;  %v2106_v24 = vsel %vm1893_vm12, %v1892_v39, %v6504_v29  ;;  %v1865_v51 = vsel %vm1863_vm15, %v6215_v15, %v1862_v0  ;;  %v1850_v15 = vsel %vm169_vm0, %v6227_v37, %v1848_v31  ;;  %vm7992_vm12 = vmmov %vm7988_vm5 }
 0x69a   :  { %2314 = vmatprep.subr.mxu1 %v1862_v0  ;;  %2205 = vrot.lane.b32.xlu0 %v2106_v24, %s4261_s24 }
 0x69b   :  { %2191 = vrot.lane.b32.xlu1 %v1880_v58, %s4261_s24  ;;  %2315 = vmatpush1.msra.mxu1 %v1865_v51 }
 0x69c   :  { %2316 = vmatprep.subr.mxu1 %v6380_v46  ;;  %v2098_v16 = vpop.permute.xlu1 %2097  ;;  %v2081_v62 = vpop.permute.xlu0 %2080  ;;  %v1849_v46 = vsel %vm169_vm0, %v6197_v5, %v6427_v4  ;;  %vm7993_vm0 = vmmov %vm7986_vm3 }
 0x69d   :  { %2317 = vmatpush1.msra.mxu1 %v6417_v17  ;;  %v2100_v59 = vsel %vm1878_vm14, %v1877_v30, %v2098_v16  ;;  %v2087_v37 = vsel %vm2084_vm10, %v6217_v6, %v2081_v62  ;;  %vm7994_vm14 = vmmov %vm7988_vm5  ;;  %vm1908_vm5 = vcmask 924672  }
 0x69e   :  { %2318 = vmatprep.subr.mxu1 %v1848_v31  ;;  %2193 = vrot.lane.b32.xlu0 %v2100_v59, %s4261_s24  ;;  %vm7996_vm3 = vmmov %vm7993_vm0 }
 0x69f   :  { %2179 = vrot.lane.b32.xlu1 %v1865_v51, %s4261_s24  ;;  %2319 = vmatpush1.msra.mxu1 %v1850_v15  ;;  %v2046_v51 = vsel %vm2045_vm7, %v6199_v20, %v6368_v27  ;;  %v2490_v20 = vld [vmem:[%s7719_s8] sm:$0xff] }
 0x6a0   :  { %2320 = vmatprep.subr.mxu1 %v6427_v4  ;;  %v2092_v39 = vpop.permute.xlu1 %2091  ;;  %v1834_v36 = vpop.permute.xlu0 %1833 }
 0x6a1   :  { %2321 = vmatpush1.msra.mxu1 %v1849_v46  ;;  %v2094_v17 = vsel %vm1863_vm15, %v1862_v0, %v2092_v39  ;;  %v1836_v58 = vsel %vm7992_vm12, %v6219_v7, %v1834_v36  ;;  %vm2003_vm12 = vcmask 826368  }
 0x6a2   :  { %2322 = vmatprep.subr.mxu1 %v1834_v36  ;;  %2181 = vrot.lane.b32.xlu0 %v2094_v17, %s4261_s24 }
 0x6a3   :  { %2167 = vrot.lane.b32.xlu1 %v2087_v37, %s4261_s24  ;;  %2323 = vmatpush1.msra.mxu1 %v1836_v58 }
 0x6a4   :  { %2324 = vmatprep.subr.mxu1 %v6388_v49  ;;  %v2083_v31 = vpop.permute.xlu1 %2082  ;;  %v1820_v5 = vpop.permute.xlu0 %1819 }
 0x6a5   :  { %2325 = vmatpush1.msra.mxu1 %v6432_v10  ;;  %v2088_v4 = vsel %vm2084_vm10, %v2081_v62, %v2083_v31  ;;  %v1822_v7 = vsel %vm7993_vm0, %v6221_v56, %v1820_v5  ;;  %vm7995_vm10 = vmmov %vm7987_vm4  ;;  %vm1982_vm0 = vcmask 834560  }
 0x6a6   :  { %2326 = vmatprep.subr.mxu1 %v1820_v5  ;;  %2169 = vrot.lane.b32.xlu0 %v2088_v4, %s4261_s24  ;;  %v1983_v17 = vsel %vm1982_vm0, %v6205_v40, %v6385_v61  ;;  %v2111_v4 = vsel %vm1908_vm5, %v6421_v1, %v6482_v8 }
 0x6a7   :  { %2155 = vrot.lane.b32.xlu1 %v1836_v58, %s4261_s24  ;;  %2327 = vmatpush1.msra.mxu1 %v1822_v7 }
 0x6a8   :  { %2328 = vmatprep.subr.mxu1 %v6399_v11  ;;  %v6539_v6 = vpop.permute.xlu1 %2068  ;;  %v1806_v49 = vpop.permute.xlu0 %1805 }
 0x6a9   :  { %2329 = vmatpush1.msra.mxu1 %v6444_v35  ;;  %v2071_v10 = vsel %vm7994_vm14, %v1834_v36, %v6539_v6  ;;  %v1808_v48 = vsel %vm7995_vm10, %v6223_v63, %v1806_v49  ;;  %vm1961_vm14 = vcmask 842752   ;;  %vm2221_vm10 = vcmask 744448  }
 0x6aa   :  { %2330 = vmatprep.subr.mxu1 %v1806_v49  ;;  %2157 = vrot.lane.b32.xlu0 %v2071_v10, %s4261_s24  ;;  %v1963_v40 = vsel %vm1961_vm14, %v6390_v38, %v6480_v50  ;;  %v1942_v50 = vsel %vm289_vm8, %v6401_v45, %v6485_v22  ;;  %v1924_v22 = vsel %vm1593_vm1, %v6249_v12, %v6495_v3  ;;  %v1779_v12 = vld [vmem:[%s7717_s6] sm:$0xff]  ;;  %v2487_v10 = vld [vmem:[%s7718_s7 + $0x8] sm:$0xff] }
 0x6ab   :  { %2143 = vrot.lane.b32.xlu1 %v1822_v7, %s4261_s24  ;;  %2331 = vmatpush1.msra.mxu1 %v1808_v48 }
 0x6ac   :  { %2332 = vmatprep.subr.mxu1 %v6410_v9  ;;  %v6549_v56 = vpop.permute.xlu1 %2062  ;;  %v6551_v11 = vpop.permute.xlu0 %1906 }
 0x6ad   :  { %2333 = vmatpush1.msra.mxu1 %v6456_v25  ;;  %v2065_v35 = vsel %vm7996_vm3, %v1820_v5, %v6549_v56 }
 0x6ae   :  { %2334 = vmatprep.subr.mxu1 %v6322_v60  ;;  %2145 = vrot.lane.b32.xlu0 %v2065_v35, %s4261_s24  ;;  %v2491_v35 = vld [vmem:[%s7719_s8 + $0x8] sm:$0xff] }
 0x6af   :  { %2131 = vrot.lane.b32.xlu1 %v1808_v48, %s4261_s24  ;;  %2335 = vmatpush1.msra.mxu1 %v6151_v28  ;;  %v6574_v28 = vsel %vm1908_vm5, %v6225_v54, %v6551_v11  ;;  %v2047_v54 = vsel %vm2045_vm7, %v6368_v27, %v6451_v53  ;;  %v2026_v53 = vsel %vm2024_vm11, %v6375_v42, %v6462_v57  ;;  %v1784_v48 = vld [vmem:[%s7717_s6 + $0x28] sm:$0xff] }
 0x6b0   :  { %2336 = vmatprep.subr.mxu1 %v6259_v13  ;;  %v6561_v63 = vpop.permute.xlu1 %2056  ;;  %v2042_v9 = vpop.permute.xlu0 %2041  ;;  %v2005_v57 = vsel %vm2003_vm12, %v6382_v18, %v6468_v19  ;;  %v1984_v19 = vsel %vm1982_vm0, %v6385_v61, %v6474_v43  ;;  %v1782_v43 = vld [vmem:[%s7717_s6 + $0x18] sm:$0xff] }
 0x6b1   :  { %2337 = vmatpush1.msra.mxu1 %v6119_v52  ;;  %v2059_v25 = vsel %vm7987_vm4, %v1806_v49, %v6561_v63  ;;  %v2048_v0 = vsel %vm2045_vm7, %v6229_v55, %v2042_v9  ;;  %4001 = vmatprep.mubr.msk.f32.mxu0 %vm1772_vm9, %v1782_v43 }
 0x6b2   :  { %2133 = vrot.lane.b32.xlu0 %v2059_v25, %s4261_s24 }
 0x6b3   :  { %2207 = vrot.lane.b32.xlu1 %v6504_v29, %s4261_s24 }
 0x6b4   :  { %v6569_v60 = vpop.permute.xlu1 %2109  ;;  %v2021_v30 = vpop.permute.xlu0 %2020 }
 0x6b5   :  { %v2112_v41 = vsel %vm1908_vm5, %v6551_v11, %v6569_v60  ;;  %v2027_v55 = vsel %vm2024_vm11, %v6231_v21, %v2021_v30  ;;  %v2025_v21 = vsel %vm2024_vm11, %v6201_v47, %v6375_v42  ;;  %v2004_v47 = vsel %vm2003_vm12, %v6203_v26, %v6382_v18  ;;  %v1780_v26 = vld [vmem:[%s7717_s6 + $0x8] sm:$0xff] }
 0x6b6   :  { %2215 = vrot.lane.b32.xlu0 %v6574_v28, %s4261_s24  ;;  %2370 = vmatprep.mubr.f32.mxu1 %v1780_v26 }
 0x6b7   :  { %2195 = vrot.lane.b32.xlu1 %v2098_v16, %s4261_s24 }
 0x6b8   :  { %v2044_v52 = vpop.permute.xlu1 %2043  ;;  %v2000_v13 = vpop.permute.xlu0 %1999 }
 0x6b9   :  { %v2049_v29 = vsel %vm2045_vm7, %v2042_v9, %v2044_v52  ;;  %v2006_v15 = vsel %vm2003_vm12, %v6233_v14, %v2000_v13  ;;  %v1792_v9 = vld [vmem:[%s7717_s6 + $0x68] sm:$0xff]  ;;  %v7999_v52 = vmov 0.0  }
 0x6ba   :  { %2217 = vrot.lane.b32.xlu0 %v2112_v41, %s4261_s24  ;;  %2338 = vmatprep.subr.mxu1 %v2049_v29 }
 0x6bb   :  { %2183 = vrot.lane.b32.xlu1 %v2092_v39, %s4261_s24  ;;  %2339 = vmatpush2.msra.mxu1 %v2048_v0 }
 0x6bc   :  { %v2023_v24 = vpop.permute.xlu1 %2022  ;;  %2340 = vmatprep.subr.mxu1 %v2047_v54  ;;  %v1979_v62 = vpop.permute.xlu0 %1978 }
 0x6bd   :  { %2341 = vmatpush2.msra.mxu1 %v2046_v51  ;;  %v2028_v16 = vsel %vm2024_vm11, %v2021_v30, %v2023_v24  ;;  %v1985_v42 = vsel %vm1982_vm0, %v6237_v23, %v1979_v62  ;;  %v1791_v30 = vld [vmem:[%s7717_s6 + $0x60] sm:$0xff] }
 0x6be   :  { %2213 = vrot.lane.b32.xlu0 %v6482_v8, %s4261_s24  ;;  %2342 = vmatprep.subr.mxu1 %v2028_v16  ;;  %v7998_v8 = vld [vmem:[#allocation11_spill] sm:$0xff] }
 0x6bf   :  { %2171 = vrot.lane.b32.xlu1 %v2083_v31, %s4261_s24  ;;  %2343 = vmatpush2.msra.mxu1 %v2027_v55 }
 0x6c0   :  { %v2002_v27 = vpop.permute.xlu1 %2001  ;;  %2344 = vmatprep.subr.mxu1 %v2026_v53  ;;  %v1958_v39 = vpop.permute.xlu0 %1957 }
 0x6c1   :  { %2345 = vmatpush2.msra.mxu1 %v2025_v21  ;;  %v2007_v59 = vsel %vm2003_vm12, %v2000_v13, %v2002_v27  ;;  %v1964_v18 = vsel %vm1961_vm14, %v6241_v33, %v1958_v39  ;;  %v1962_v33 = vsel %vm1961_vm14, %v6207_v44, %v6390_v38  ;;  %v1941_v38 = vsel %vm289_vm8, %v6209_v32, %v6401_v45  ;;  %v7997_v32 = vld [vmem:[#allocation9_spill] sm:$0xff] }
 0x6c2   :  { %2635 = vperm.xlu0 %4158, %v2490_v20   ;;  %2346 = vmatprep.subr.mxu1 %v2007_v59  ;;  %v1923_v45 = vsel %vm1593_vm1, %v7997_v32, %v6412_v34  ;;  %vm8014_vm12 = vcmask 1039360  }
 0x6c3   :  { %2159 = vrot.lane.b32.xlu1 %v6539_v6, %s4261_s24  ;;  %2347 = vmatpush2.msra.mxu1 %v2006_v15  ;;  %v1909_v6 = vsel %vm1908_vm5, %v7998_v8, %v6421_v1 }
 0x6c4   :  { %v1981_v46 = vpop.permute.xlu1 %1980  ;;  %2348 = vmatprep.subr.mxu1 %v2005_v57  ;;  %v1938_v58 = vpop.permute.xlu0 %1937 }
 0x6c5   :  { %2349 = vmatpush2.msra.mxu1 %v2004_v47  ;;  %v1986_v14 = vsel %vm1982_vm0, %v1979_v62, %v1981_v46  ;;  %v1943_v31 = vsel %vm289_vm8, %v6245_v2, %v1938_v58  ;;  %vm8015_vm0 = vmmov %vm8014_vm12 }
 0x6c6   :  { %2350 = vmatprep.subr.mxu1 %v1986_v14 }
 0x6c7   :  { %2147 = vrot.lane.b32.xlu1 %v6549_v56, %s4261_s24  ;;  %2351 = vmatpush2.msra.mxu1 %v1985_v42  ;;  %v1788_v56 = vld [vmem:[%s7717_s6 + $0x48] sm:$0xff] }
 0x6c8   :  { %v1960_v36 = vpop.permute.xlu1 %1959  ;;  %2352 = vmatprep.subr.mxu1 %v1984_v19  ;;  %v6648_v5 = vpop.permute.xlu0 %2121 }
 0x6c9   :  { %2353 = vmatpush2.msra.mxu1 %v1983_v17  ;;  %v1965_v23 = vsel %vm1961_vm14, %v1958_v39, %v1960_v36  ;;  %vm8016_vm14 = vmmov %vm8015_vm0 }
 0x6ca   :  { %2354 = vmatprep.subr.mxu1 %v1965_v23 }
 0x6cb   :  { %2135 = vrot.lane.b32.xlu1 %v6561_v63, %s4261_s24  ;;  %2355 = vmatpush2.msra.mxu1 %v1964_v18  ;;  %v1787_v63 = vld [vmem:[%s7717_s6 + $0x40] sm:$0xff] }
 0x6cc   :  { %v1940_v61 = vpop.permute.xlu1 %1939  ;;  %2356 = vmatprep.subr.mxu1 %v1963_v40 }
 0x6cd   :  { %2357 = vmatpush2.msra.mxu1 %v1962_v33  ;;  %v1944_v37 = vsel %vm289_vm8, %v1938_v58, %v1940_v61  ;;  %vm8006_vm8 = vcmask 883712  }
 0x6ce   :  { %2358 = vmatprep.subr.mxu1 %v1944_v37  ;;  %vm8007_vm1 = vmmov %vm8006_vm8 }
 0x6cf   :  { %2219 = vrot.lane.b32.xlu1 %v6569_v60, %s4261_s24  ;;  %2359 = vmatpush2.msra.mxu1 %v1943_v31  ;;  %vm8009_vm3 = vmmov %vm8007_vm1 }
 0x6d0   :  { %v2124_v44 = vpop.permute.xlu1 %2123  ;;  %2360 = vmatprep.subr.mxu1 %v1942_v50  ;;  %vm8010_vm4 = vmmov %vm8007_vm1 }
 0x6d1   :  { %2361 = vmatpush2.msra.mxu1 %v1941_v38  ;;  %v6655_v2 = vsel %vm2221_vm10, %v6648_v5, %v2124_v44  ;;  %vm8011_vm5 = vmmov %vm8007_vm1 }
 0x6d2   :  { %2362 = vmatprep.subr.mxu1 %v6495_v3  ;;  %vm8012_vm7 = vmmov %vm8007_vm1 }
 0x6d3   :  { %2211 = vrot.lane.b32.xlu1 %v2111_v4, %s4261_s24  ;;  %2363 = vmatpush2.msra.mxu1 %v1924_v22  ;;  %vm8013_vm11 = vmmov %vm8007_vm1 }
 0x6d4   :  { %v6665_v7 = vpop.permute.xlu1 %2197  ;;  %2364 = vmatprep.subr.mxu1 %v6412_v34  ;;  %v2486_v34 = vld [vmem:[%s7718_s7] sm:$0xff] }
 0x6d5   :  { %2365 = vmatpush2.msra.mxu1 %v1923_v45 }
 0x6d6   :  { %2366 = vmatprep.subr.mxu1 %v6551_v11 }
 0x6d7   :  { %2209 = vrot.lane.b32.xlu1 %v1909_v6, %s4261_s24  ;;  %2367 = vmatpush2.msra.mxu1 %v6574_v28 }
 0x6d8   :  { %v6680_v3 = vpop.permute.xlu1 %2185  ;;  %2368 = vmatprep.subr.mxu1 %v6421_v1  ;;  %v1783_v1 = vld [vmem:[%s7717_s6 + $0x20] sm:$0xff] }
 0x6d9   :  { %2369 = vmatpush2.msra.mxu1 %v1909_v6 }
 0x6da   :  { %2371 = vmatmul.mubr.f32.vlgmr.msra.gmra.mxu1 %v1779_v12 }
 0x6db   :  { %2607 = vperm.xlu1 %4159, %v2486_v34   ;;  %2376 = vmatprep.mubr.f32.mxu1 %v1784_v48 }
 0x6dc   :  { %v6686_v49 = vpop.permute.xlu1 %2173 }
 0x6de   :  { %2377 = vmatmul.mubr.f32.gmra.mxu1 %v1783_v1 }
 0x6df   :  { %2612 = vperm.xlu1 %4159, %v2487_v10   ;;  %2382 = vmatprep.mubr.f32.mxu1 %v1788_v56  ;;  %v2202_v60 = vpop.permute.xlu0 %2201 }
 0x6e0   :  { %v6700_v11 = vpop.permute.xlu1 %2161 }
 0x6e2   :  { %2383 = vmatmul.mubr.f32.gmra.mxu1 %v1787_v63 }
 0x6e3   :  { %2640 = vperm.xlu1 %4159, %v2491_v35   ;;  %2388 = vmatprep.mubr.f32.mxu1 %v1792_v9 }
 0x6e4   :  { %v6711_v25 = vpop.permute.xlu1 %2149  ;;  %v2188_v13 = vpop.permute.xlu0 %2187 }
 0x6e5   :  { %v2246_v50 = vsel %vm2221_vm10, %v6680_v3, %v2188_v13 }
 0x6e6   :  { %2389 = vmatmul.mubr.f32.gmra.mxu1 %v1791_v30 }
 0x6e7   :  { %3128 = vmatprep.mubr.f32.mxu1 %v7999_v52 }
 0x6e8   :  { %v6716_v28 = vpop.permute.xlu1 %2137  ;;  %v2176_v0 = vpop.permute.xlu0 %2175 }
 0x6e9   :  { %v2242_v32 = vsel %vm2221_vm10, %v6686_v49, %v2176_v0 }
 0x6ec   :  { %v6719_v41 = vpop.permute.xlu1 %2125  ;;  %v2164_v24 = vpop.permute.xlu0 %2163 }
 0x6ed   :  { %v2238_v3 = vsel %vm2221_vm10, %v6700_v11, %v2164_v24 }
 0x6f0   :  { %v2190_v29 = vpop.permute.xlu1 %2189  ;;  %v6723_v55 = vpop.permute.xlu0 %2151 }
 0x6f1   :  { %v2247_v31 = vsel %vm2221_vm10, %v2188_v13, %v2190_v29  ;;  %v2234_v56 = vsel %vm2221_vm10, %v6711_v25, %v6723_v55 }
 0x6f4   :  { %v2178_v54 = vpop.permute.xlu1 %2177  ;;  %v6727_v53 = vpop.permute.xlu0 %2139 }
 0x6f5   :  { %v2230_v30 = vsel %vm2221_vm10, %v6716_v28, %v6727_v53 }
 0x6f8   :  { %v2166_v51 = vpop.permute.xlu1 %2165  ;;  %v6731_v21 = vpop.permute.xlu0 %2127 }
 0x6f9   :  { %v2239_v12 = vsel %vm2221_vm10, %v2164_v24, %v2166_v51  ;;  %v8000_v51 = vld [vmem:[#allocation8_spill] sm:$0xff] }
 0x6fc   :  { %v6721_v16 = vpop.permute.xlu1 %2153 }
 0x6fd   :  { %v2235_v1 = vsel %vm2221_vm10, %v6723_v55, %v6721_v16  ;;  %v2224_v16 = vsel %vm2221_vm10, %v8000_v51, %v6648_v5  ;;  %v8001_v55 = vld [vmem:[#allocation14_spill] sm:$0xff] }
 0x700   :  { %v6725_v62 = vpop.permute.xlu1 %2141 }
 0x704   :  { %v6729_v20 = vpop.permute.xlu1 %2129  ;;  %v2204_v59 = vpop.permute.xlu0 %2203 }
 0x708   :  { %v2200_v27 = vpop.permute.xlu1 %2199 }
 0x709   :  { %v2251_v58 = vsel %vm2221_vm10, %v2200_v27, %v2202_v60  ;;  %v2250_v43 = vsel %vm2221_vm10, %v6665_v7, %v2200_v27  ;;  %v2243_v7 = vsel %vm2221_vm10, %v2176_v0, %v2178_v54  ;;  %v2231_v60 = vsel %vm2221_vm10, %v6727_v53, %v6725_v62  ;;  %v8002_v62 = vld [vmem:[#allocation10_spill] sm:$0xff]  ;;  %v8003_v27 = vld [vmem:[#allocation13_spill] sm:$0xff] }
 0x70a   :  { %v2227_v0 = vsel %vm2221_vm10, %v6731_v21, %v6729_v20  ;;  %v2226_v54 = vsel %vm2221_vm10, %v6719_v41, %v6731_v21  ;;  %v2223_v53 = vsel %vm2221_vm10, %v8002_v62, %v8001_v55  ;;  %v2222_v41 = vsel %vm2221_vm10, %v8003_v27, %v8002_v62 }
 0x70c   :  { %v2206_v57 = vpop.permute.xlu0 %2205 }
 0x70d   :  { %v2192_v15 = vpop.permute.xlu1 %2191  ;;  %v2252_v18 = vsel %vm2221_vm10, %v2204_v59, %v2206_v57 }
 0x710   :  { %v2194_v47 = vpop.permute.xlu0 %2193 }
 0x711   :  { %v2180_v39 = vpop.permute.xlu1 %2179  ;;  %v2248_v37 = vsel %vm2221_vm10, %v2192_v15, %v2194_v47 }
 0x714   :  { %v2182_v42 = vpop.permute.xlu0 %2181 }
 0x715   :  { %v2168_v46 = vpop.permute.xlu1 %2167  ;;  %v2244_v4 = vsel %vm2221_vm10, %v2180_v39, %v2182_v42 }
 0x718   :  { %v2170_v17 = vpop.permute.xlu0 %2169 }
 0x719   :  { %v2156_v14 = vpop.permute.xlu1 %2155  ;;  %v2240_v6 = vsel %vm2221_vm10, %v2168_v46, %v2170_v17  ;;  %v1786_v46 = vld [vmem:[%s7717_s6 + $0x38] sm:$0xff] }
 0x71c   :  { %v2158_v40 = vpop.permute.xlu0 %2157 }
 0x71d   :  { %v2144_v19 = vpop.permute.xlu1 %2143  ;;  %v2236_v48 = vsel %vm2221_vm10, %v2156_v14, %v2158_v40  ;;  %v1790_v14 = vld [vmem:[%s7717_s6 + $0x58] sm:$0xff] }
 0x720   :  { %v2146_v22 = vpop.permute.xlu0 %2145 }
 0x721   :  { %v6733_v36 = vpop.permute.xlu1 %2131  ;;  %v2232_v63 = vsel %vm2221_vm10, %v2144_v19, %v2146_v22  ;;  %v1794_v19 = vld [vmem:[%s7717_s6 + $0x78] sm:$0xff] }
 0x724   :  { %v2134_v34 = vpop.permute.xlu0 %2133 }
 0x725   :  { %v2208_v26 = vpop.permute.xlu1 %2207  ;;  %v2228_v29 = vsel %vm2221_vm10, %v6733_v36, %v2134_v34  ;;  %v1793_v36 = vld [vmem:[%s7717_s6 + $0x70] sm:$0xff] }
 0x726   :  { %v2253_v23 = vsel %vm2221_vm10, %v2206_v57, %v2208_v26  ;;  %v1781_v57 = vld [vmem:[%s7717_s6 + $0x10] sm:$0xff] }
 0x727   :  { %2395 = vmatprep.subr.mxu0 %v2253_v23  ;;  %v8004_v23 = vld [vmem:[#allocation6_spill] sm:$0xff] }
 0x728   :  { %2396 = vmatpush1.msra.mxu0 %v2252_v18  ;;  %v2216_v9 = vpop.permute.xlu0 %2215 }
 0x729   :  { %v2196_v61 = vpop.permute.xlu1 %2195  ;;  %2397 = vmatprep.subr.mxu0 %v2251_v58  ;;  %v8005_v58 = vld [vmem:[#allocation7_spill] sm:$0xff] }
 0x72a   :  { %2398 = vmatpush1.msra.mxu0 %v2250_v43  ;;  %v2249_v33 = vsel %vm2221_vm10, %v2194_v47, %v2196_v61  ;;  %v1785_v47 = vld [vmem:[%s7717_s6 + $0x30] sm:$0xff] }
 0x72b   :  { %2399 = vmatprep.subr.mxu0 %v2249_v33 }
 0x72c   :  { %2400 = vmatpush1.msra.mxu0 %v2248_v37  ;;  %v2218_v24 = vpop.permute.xlu0 %2217 }
 0x72d   :  { %v2184_v44 = vpop.permute.xlu1 %2183  ;;  %2401 = vmatprep.subr.mxu0 %v2247_v31  ;;  %v2256_v59 = vsel %vm2221_vm10, %v2216_v9, %v2218_v24 }
 0x72e   :  { %2402 = vmatpush1.msra.mxu0 %v2246_v50  ;;  %v2245_v38 = vsel %vm2221_vm10, %v2182_v42, %v2184_v44  ;;  %v1789_v42 = vld [vmem:[%s7717_s6 + $0x50] sm:$0xff] }
 0x72f   :  { %2403 = vmatprep.subr.mxu0 %v2245_v38 }
 0x730   :  { %2404 = vmatpush1.msra.mxu0 %v2244_v4  ;;  %v2214_v15 = vpop.permute.xlu0 %2213 }
 0x731   :  { %v2172_v45 = vpop.permute.xlu1 %2171  ;;  %2405 = vmatprep.subr.mxu0 %v2243_v7 }
 0x732   :  { %2406 = vmatpush1.msra.mxu0 %v2242_v32  ;;  %v2241_v8 = vsel %vm2221_vm10, %v2170_v17, %v2172_v45  ;;  %v2484_v17 = vld [vmem:[%s7720_s9] sm:$0x3] }
 0x733   :  { %2407 = vmatprep.subr.mxu0 %v2241_v8  ;;  %v2485_v26 = vunpack.c.l.bf16 %v2484_v17 }
 0x734   :  { %2408 = vmatpush1.msra.mxu0 %v2240_v6 }
 0x735   :  { %v2160_v10 = vpop.permute.xlu1 %2159  ;;  %2409 = vmatprep.subr.mxu0 %v2239_v12  ;;  %v2498_v18 = vrot.slane %v2485_v26, %v8004_v23  ;;  %v2502_v43 = vrot.slane %v2485_v26, %v8005_v58  ;;  %v2493_v58 = vld [vmem:[%s7719_s8 + $0x18] sm:$0xff] }
 0x736   :  { %2410 = vmatpush1.msra.mxu0 %v2238_v3  ;;  %v2237_v49 = vsel %vm2221_vm10, %v2158_v40, %v2160_v10  ;;  %v2492_v3 = vld [vmem:[%s7719_s8 + $0x10] sm:$0xff] }
 0x737   :  { %2411 = vmatprep.subr.mxu0 %v2237_v49  ;;  %v2508_v33 = vrot.slane %v2498_v18, %v8004_v23  ;;  %v2512_v31 = vrot.slane %v2502_v43, %v8004_v23  ;;  %v2489_v43 = vld [vmem:[%s7718_s7 + $0x18] sm:$0xff] }
 0x738   :  { %2412 = vmatpush1.msra.mxu0 %v2236_v48 }
 0x739   :  { %v2148_v35 = vpop.permute.xlu1 %2147  ;;  %2413 = vmatprep.subr.mxu0 %v2235_v1 }
 0x73a   :  { %2414 = vmatpush1.msra.mxu0 %v2234_v56  ;;  %v2233_v11 = vsel %vm2221_vm10, %v2146_v22, %v2148_v35 }
 0x73b   :  { %2415 = vmatprep.subr.mxu0 %v2233_v11 }
 0x73c   :  { %2416 = vmatpush1.msra.mxu0 %v2232_v63 }
 0x73d   :  { %v2136_v13 = vpop.permute.xlu1 %2135  ;;  %2417 = vmatprep.subr.mxu0 %v2231_v60 }
 0x73e   :  { %2418 = vmatpush1.msra.mxu0 %v2230_v30  ;;  %v2229_v25 = vsel %vm2221_vm10, %v2134_v34, %v2136_v13  ;;  %v2488_v34 = vld [vmem:[%s7718_s7 + $0x10] sm:$0xff] }
 0x73f   :  { %2419 = vmatprep.subr.mxu0 %v2229_v25 }
 0x740   :  { %2420 = vmatpush1.msra.mxu0 %v2228_v29 }
 0x741   :  { %v2220_v28 = vpop.permute.xlu1 %2219  ;;  %2421 = vmatprep.subr.mxu0 %v2227_v0 }
 0x742   :  { %2422 = vmatpush1.msra.mxu0 %v2226_v54  ;;  %v2257_v21 = vsel %vm2221_vm10, %v2218_v24, %v2220_v28 }
 0x743   :  { %2423 = vmatprep.subr.mxu0 %v6655_v2 }
 0x744   :  { %2424 = vmatpush1.msra.mxu0 %v2224_v16 }
 0x745   :  { %v2212_v20 = vpop.permute.xlu1 %2211  ;;  %2425 = vmatprep.subr.mxu0 %v2223_v53 }
 0x746   :  { %2426 = vmatpush1.msra.mxu0 %v2222_v41  ;;  %v2255_v5 = vsel %vm2221_vm10, %v2212_v20, %v2214_v15 }
 0x747   :  { %2455 = vmatprep.subr.mxu0 %v2257_v21 }
 0x748   :  { %2456 = vmatpush2.msra.mxu0 %v2256_v59 }
 0x749   :  { %v2210_v2 = vpop.permute.xlu1 %2209  ;;  %2457 = vmatprep.subr.mxu0 %v2255_v5 }
 0x74a   :  { %v2254_v39 = vsel %vm2221_vm10, %v2210_v2, %v2212_v20  ;;  %vm8017_vm10 = vmmov %vm8015_vm0 }
 0x74b   :  { %2458 = vmatpush2.msra.mxu0 %v2254_v39 }
 0x74c   :  { %2460 = vmatmul.mubr.f32.vlgmr.msra.gmra.mxu0 %v1781_v57 }
 0x74d   :  { %4002 = vmatprep.mubr.msk.f32.mxu0 %vm1772_vm9, %v1786_v46 }
 0x750   :  { %2466 = vmatmul.mubr.f32.gmra.mxu0 %v1785_v47 }
 0x751   :  { %4003 = vmatprep.mubr.msk.f32.mxu0 %vm1772_vm9, %v1790_v14 }
 0x754   :  { %2472 = vmatmul.mubr.f32.gmra.mxu0 %v1789_v42 }
 0x755   :  { %4004 = vmatprep.mubr.msk.f32.mxu0 %vm1772_vm9, %v1794_v19  ;;  %vm8008_vm9 = vmmov %vm8007_vm1 }
 0x758   :  { %2478 = vmatmul.mubr.f32.gmra.mxu0 %v1793_v36 }
 0x759   :  { %2930 = vmatprep.mubr.f32.mxu0 %v7999_v52 }
 0x79a   :  { %v2372_v40 = vpop.f32.mrf.mxu1 }
 0x79c   :  { %v2374_v50 = vpop.f32.mrf.mxu1 }
 0x79e   :  { %v2378_v10 = vpop.f32.mrf.mxu1 }
 0x7a0   :  { %v2380_v48 = vpop.f32.mrf.mxu1 }
 0x7a2   :  { %v2384_v56 = vpop.f32.mrf.mxu1 }
 0x7a4   :  { %v2386_v11 = vpop.f32.mrf.mxu1 }
 0x7a6   :  { %v2390_v9 = vpop.f32.mrf.mxu1 }
 0x7a8   :  { %v2392_v25 = vpop.f32.mrf.mxu1 }
 0x80c   :  { %v2461_v61 = vpop.f32.mrf.mxu0 }
 0x80d   :  { %v6825_v37 = vadd.f32 %v2461_v61, %v2372_v40  ;;  %v2608_v40 = vpop.permute.xlu1 %2607 }
 0x80e   :  { %v2463_v44 = vpop.f32.mrf.mxu0 }
 0x80f   :  { %v6828_v38 = vadd.f32 %v2463_v44, %v2374_v50  ;;  %v2513_v4 = vmul.f32 %v2508_v33, %v6825_v37 }
 0x810   :  { %v2467_v49 = vpop.f32.mrf.mxu0 }
 0x811   :  { %v2514_v22 = vmul.f32 %v2512_v31, %v6828_v38  ;;  %v2541_v45 = vmul.f32 %v2513_v4, %v6825_v37  ;;  %v6846_v0 = vadd.f32 %v2467_v49, %v2378_v10  ;;  %v2613_v61 = vpop.permute.xlu1 %2612 }
 0x812   :  { %v2469_v1 = vpop.f32.mrf.mxu0 }
 0x813   :  { %v2542_v7 = vmul.f32 %v2514_v22, %v6828_v38  ;;  %v2521_v32 = vsel %vm8006_vm8, %v2514_v22, 0.0  ;;  %v6842_v30 = vadd.f32 %v2469_v1, %v2380_v48  ;;  %v2515_v16 = vmul.f32 %v2508_v33, %v6846_v0 }
 0x814   :  { %v2522_v8 = vadd.f32 %v2521_v32, %v2513_v4  ;;  %v2473_v35 = vpop.f32.mrf.mxu0  ;;  %vm2841_vm8 = vcmask 646144  }
 0x815   :  { %v2549_v6 = vsel %vm8007_vm1, %v2542_v7, 0.0  ;;  %v6848_v54 = vadd.f32 %v2473_v35, %v2384_v56  ;;  %v2516_v24 = vmul.f32 %v2512_v31, %v6842_v30  ;;  %v2543_v21 = vmul.f32 %v2515_v16, %v6846_v0 }
 0x816   :  { %2523 = vadd.xlane.f32.xlu0 %v2522_v8  ;;  %v2550_v12 = vadd.f32 %v2549_v6, %v2541_v45  ;;  %v2475_v63 = vpop.f32.mrf.mxu0  ;;  %vm3782_vm1 = vcmask 15360  }
 0x817   :  { %v6844_v13 = vadd.f32 %v2475_v63, %v2386_v11  ;;  %v2517_v55 = vmul.f32 %v2508_v33, %v6848_v54  ;;  %v2544_v53 = vmul.f32 %v2516_v24, %v6842_v30  ;;  %v2525_v27 = vsel %vm8008_vm9, %v2516_v24, 0.0 }
 0x818   :  { %2551 = vadd.xlane.f32.xlu1 %v2550_v12  ;;  %v2479_v60 = vpop.f32.mrf.mxu0  ;;  %v2526_v15 = vadd.f32 %v2525_v27, %v2515_v16 }
 0x819   :  { %v2518_v28 = vmul.f32 %v2512_v31, %v6844_v13  ;;  %v6856_v62 = vadd.f32 %v2479_v60, %v2390_v9  ;;  %v2553_v57 = vsel %vm8010_vm4, %v2544_v53, 0.0  ;;  %v2545_v46 = vmul.f32 %v2517_v55, %v6848_v54 }
 0x81a   :  { %v2481_v29 = vpop.f32.mrf.mxu0  ;;  %v2554_v47 = vadd.f32 %v2553_v57, %v2543_v21 }
 0x81b   :  { %v6852_v51 = vadd.f32 %v2481_v29, %v2392_v25  ;;  %v2529_v41 = vsel %vm8009_vm3, %v2518_v28, 0.0  ;;  %v2519_v59 = vmul.f32 %v2508_v33, %v6856_v62  ;;  %v2546_v2 = vmul.f32 %v2518_v28, %v6844_v13  ;;  %v2636_v33 = vpop.permute.xlu0 %2635 }
 0x81c   :  { %v2530_v5 = vadd.f32 %v2529_v41, %v2517_v55 }
 0x81d   :  { %v2520_v20 = vmul.f32 %v2512_v31, %v6852_v51  ;;  %v2557_v19 = vsel %vm8012_vm7, %v2546_v2, 0.0  ;;  %v2547_v36 = vmul.f32 %v2519_v59, %v6856_v62  ;;  %v6878_v31 = vpop.permute.xlu1 %2640 }
 0x81e   :  { %v2558_v17 = vadd.f32 %v2557_v19, %v2545_v46 }
 0x81f   :  { %v2533_v39 = vsel %vm8011_vm5, %v2520_v20, 0.0  ;;  %v2548_v42 = vmul.f32 %v2520_v20, %v6852_v51 }
 0x820   :  { %v2534_v14 = vadd.f32 %v2533_v39, %v2519_v59 }
 0x821   :  { %v2561_v26 = vsel %vm8013_vm11, %v2548_v42, 0.0 }
 0x822   :  { %v2562_v18 = vadd.f32 %v2561_v26, %v2547_v36 }
 0x829   :  { %2645 = vperm.xlu1 %4159, %v2492_v3  }
 0x82c   :  { %2617 = vperm.xlu0 %4158, %v2488_v34  }
 0x84b   :  { %2527 = vadd.xlane.f32.xlu0 %v2526_v15 }
 0x84d   :  { %2531 = vadd.xlane.f32.xlu1 %v2530_v5 }
 0x84f   :  { %2555 = vadd.xlane.f32.xlu0 %v2554_v47 }
 0x851   :  { %2535 = vadd.xlane.f32.xlu1 %v2534_v14 }
 0x853   :  { %2559 = vadd.xlane.f32.xlu0 %v2558_v17 }
 0x857   :  { %2563 = vadd.xlane.f32.xlu0 %v2562_v18 }
 0x862   :  { %2650 = vperm.xlu1 %4159, %v2493_v58  }
 0x86d   :  { %2622 = vperm.xlu0 %4158, %v2489_v43  }
 0x89f   :  { %v2524_v50 = vpop.xlane.xlu0 %2523 }
 0x8a0   :  { %v2537_v44 = vmul.f32 0.0078125, %v2524_v50 }
 0x8a1   :  { %v2552_v4 = vpop.xlane.xlu1 %2551 }
 0x8a2   :  { %v2565_v22 = vmul.f32 0.0078125, %v2552_v4  ;;  %v2569_v7 = vmul.f32 %v2537_v44, %v2537_v44  ;;  %v2581_v6 = vsub.f32 %v6825_v37, %v2537_v44  ;;  %v2582_v12 = vsub.f32 %v6828_v38, %v2537_v44 }
 0x8a4   :  { %v2573_v32 = vsub.f32 %v2565_v22, %v2569_v7 }
 0x8a5   :  { %v2646_v38 = vpop.permute.xlu1 %2645 }
 0x8a6   :  { %v2577_v45 = vmax.f32 %v2573_v32, 0.0 }
 0x8a7   :  { %v2618_v37 = vpop.permute.xlu0 %2617 }
 0x8a8   :  { %v2589_v8 = vadd.f32 1e-05, %v2577_v45 }
 0x8aa   :  { %4199 = vrsqrt.f32 %v2589_v8  ;;  %v6911_v8 = vld [vmem:[%s7721_s10 + $0x90] sm:$0xff] }
 0x8b7   :  { %v4200_v3 = vpop.eup %4199 }
 0x8b8   :  { %v2598_v34 = vmul.f32 %v4200_v3, %v2582_v12  ;;  %v2597_v10 = vmul.f32 %v4200_v3, %v2581_v6  ;;  %v2813_v12 = vunpack.c.l.bf16 %v6911_v8  ;;  %v6930_v3 = vld [vmem:[%s7721_s10 + $0x70] sm:$0xff] }
 0x8ba   :  { %v2626_v49 = vmul.f32 %v2608_v40, %v2598_v34  ;;  %v2625_v48 = vmul.f32 %v2608_v40, %v2597_v10 }
 0x8bc   :  { %v6882_v1 = vadd.f32 %v2636_v33, %v2626_v49  ;;  %v6884_v56 = vadd.f32 %v2636_v33, %v2625_v48  ;;  %v2814_v49 = vunpack.c.h.bf16 %v6911_v8 }
 0x8be   :  { %v2662_v35 = vmax.f32 %v6882_v1, 0.0  ;;  %v2661_v11 = vmax.f32 %v6884_v56, 0.0  ;;  %4005 = vmatprep.subr.msk.mxu0 %vm494_vm13, %v2814_v49 }
 0x8bf   :  { %4006 = vmatpush1.msk.msra.mxu0 %vm494_vm13, %v2813_v12 }
 0x8c0   :  { %2679 = vrot.lane.b32.xlu1 %v2662_v35, %s4231_s20  ;;  %2677 = vrot.lane.b32.xlu0 %v2661_v11, %s4231_s20 }
 0x8d4   :  { %v2528_v63 = vpop.xlane.xlu0 %2527 }
 0x8d5   :  { %v2538_v9 = vmul.f32 0.0078125, %v2528_v63 }
 0x8d6   :  { %v2532_v60 = vpop.xlane.xlu1 %2531 }
 0x8d7   :  { %v2539_v29 = vmul.f32 0.0078125, %v2532_v60  ;;  %v2570_v24 = vmul.f32 %v2538_v9, %v2538_v9  ;;  %v2583_v19 = vsub.f32 %v6846_v0, %v2538_v9  ;;  %v2584_v36 = vsub.f32 %v6842_v30, %v2538_v9 }
 0x8d8   :  { %v2556_v25 = vpop.xlane.xlu0 %2555 }
 0x8d9   :  { %v2566_v28 = vmul.f32 0.0078125, %v2556_v25  ;;  %v2571_v41 = vmul.f32 %v2539_v29, %v2539_v29  ;;  %v2585_v58 = vsub.f32 %v6848_v54, %v2539_v29  ;;  %v2586_v43 = vsub.f32 %v6844_v13, %v2539_v29  ;;  %v6941_v25 = vld [vmem:[%s7721_s10 + $0x60] sm:$0xff] }
 0x8da   :  { %v2536_v16 = vpop.xlane.xlu1 %2535 }
 0x8db   :  { %v2574_v55 = vsub.f32 %v2566_v28, %v2570_v24  ;;  %v2540_v27 = vmul.f32 0.0078125, %v2536_v16 }
 0x8dc   :  { %v2560_v53 = vpop.xlane.xlu0 %2559 }
 0x8dd   :  { %v2578_v20 = vmax.f32 %v2574_v55, 0.0  ;;  %v2567_v21 = vmul.f32 0.0078125, %v2560_v53  ;;  %v2572_v57 = vmul.f32 %v2540_v27, %v2540_v27  ;;  %v2587_v30 = vsub.f32 %v6856_v62, %v2540_v27  ;;  %v6962_v53 = vld [vmem:[%s7721_s10 + $0x50] sm:$0xff] }
 0x8de   :  { %v2588_v7 = vsub.f32 %v6852_v51, %v2540_v27  ;;  %v2651_v29 = vpop.permute.xlu1 %2650  ;;  %v2805_v55 = vunpack.c.l.bf16 %v6930_v3 }
 0x8df   :  { %v2590_v59 = vadd.f32 1e-05, %v2578_v20  ;;  %v2575_v15 = vsub.f32 %v2567_v21, %v2571_v41  ;;  %v2802_v20 = vunpack.c.h.bf16 %v6941_v25  ;;  %v2801_v21 = vunpack.c.l.bf16 %v6941_v25 }
 0x8e0   :  { %v2564_v5 = vpop.xlane.xlu0 %2563 }
 0x8e1   :  { %4201 = vrsqrt.f32 %v2590_v59  ;;  %v2579_v2 = vmax.f32 %v2575_v15, 0.0  ;;  %v2568_v39 = vmul.f32 0.0078125, %v2564_v5  ;;  %v6978_v59 = vld [vmem:[%s7721_s10 + $0x40] sm:$0xff]  ;;  %v2798_v15 = vunpack.c.h.bf16 %v6962_v53 }
 0x8e2   :  { %v2797_v5 = vunpack.c.l.bf16 %v6962_v53  ;;  %v7303_v53 = vld [vmem:[%s7722_s11 + $0x30] sm:$0xff] }
 0x8e3   :  { %v2591_v46 = vadd.f32 1e-05, %v2579_v2  ;;  %v2576_v47 = vsub.f32 %v2568_v39, %v2572_v57  ;;  %v6990_v2 = vld [vmem:[%s7721_s10 + $0x30] sm:$0xff]  ;;  %v2794_v57 = vunpack.c.h.bf16 %v6978_v59  ;;  %v2793_v39 = vunpack.c.l.bf16 %v6978_v59 }
 0x8e4   :  { %v2838_v59 = vunpack.c.h.bf16 %v7303_v53 }
 0x8e5   :  { %4203 = vrsqrt.f32 %v2591_v46  ;;  %v2580_v14 = vmax.f32 %v2576_v47, 0.0  ;;  %v7004_v46 = vld [vmem:[%s7721_s10 + $0x20] sm:$0xff]  ;;  %v2790_v47 = vunpack.c.h.bf16 %v6990_v2 }
 0x8e7   :  { %v2592_v42 = vadd.f32 1e-05, %v2580_v14  ;;  %v2789_v14 = vunpack.c.l.bf16 %v6990_v2  ;;  %v7315_v2 = vld [vmem:[%s7722_s11 + $0x10] sm:$0xff] }
 0x8e8   :  { %v2623_v34 = vpop.permute.xlu0 %2622 }
 0x8e9   :  { %4205 = vrsqrt.f32 %v2592_v42  ;;  %v2786_v42 = vunpack.c.h.bf16 %v7004_v46 }
 0x8ee   :  { %v4202_v17 = vpop.eup %4201 }
 0x8ef   :  { %v2600_v26 = vmul.f32 %v4202_v17, %v2584_v36  ;;  %v2599_v18 = vmul.f32 %v4202_v17, %v2583_v19  ;;  %v2785_v19 = vunpack.c.l.bf16 %v7004_v46  ;;  %v7029_v36 = vld [vmem:[%s7721_s10 + $0x10] sm:$0xff] }
 0x8f0   :  { %v2782_v17 = vunpack.c.h.bf16 %v7029_v36 }
 0x8f1   :  { %v2628_v40 = vmul.f32 %v2613_v61, %v2600_v26  ;;  %v2627_v33 = vmul.f32 %v2613_v61, %v2599_v18  ;;  %v2781_v26 = vunpack.c.l.bf16 %v7029_v36  ;;  %v7036_v18 = vld [vmem:[%s7721_s10] sm:$0xff] }
 0x8f2   :  { %v4204_v50 = vpop.eup %4203 }
 0x8f3   :  { %v6899_v44 = vadd.f32 %v6878_v31, %v2628_v40  ;;  %v6902_v4 = vadd.f32 %v6878_v31, %v2627_v33  ;;  %v2602_v22 = vmul.f32 %v4204_v50, %v2586_v43  ;;  %v2601_v0 = vmul.f32 %v4204_v50, %v2585_v58  ;;  %v6916_v31 = vld [vmem:[%s7721_s10 + $0x80] sm:$0xff]  ;;  %v7051_v40 = vld [vmem:[%s7721_s10 + $0x98] sm:$0xff] }
 0x8f4   :  { %v2810_v48 = vunpack.c.h.bf16 %v6916_v31  ;;  %v2809_v60 = vunpack.c.l.bf16 %v6916_v31  ;;  %v2778_v58 = vunpack.c.h.bf16 %v7036_v18  ;;  %v2777_v43 = vunpack.c.l.bf16 %v7036_v18 }
 0x8f5   :  { %v2664_v32 = vmax.f32 %v6899_v44, 0.0  ;;  %v2663_v54 = vmax.f32 %v6902_v4, 0.0  ;;  %v2630_v13 = vmul.f32 %v2618_v37, %v2602_v22  ;;  %v2629_v45 = vmul.f32 %v2618_v37, %v2601_v0 }
 0x8f6   :  { %v4206_v61 = vpop.eup %4205  ;;  %2880 = vmatprep.subr.mxu0 %v2810_v48  ;;  %v2816_v33 = vunpack.c.h.bf16 %v7051_v40 }
 0x8f7   :  { %v2603_v62 = vmul.f32 %v4206_v61, %v2587_v30  ;;  %v2604_v6 = vmul.f32 %v4206_v61, %v2588_v7  ;;  %2683 = vrot.lane.b32.xlu1 %v2664_v32, %s4231_s20  ;;  %2681 = vrot.lane.b32.xlu0 %v2663_v54, %s4231_s20  ;;  %v6924_v51 = vadd.f32 %v2646_v38, %v2630_v13 }
 0x8f8   :  { %v6932_v10 = vadd.f32 %v2646_v38, %v2629_v45  ;;  %v2806_v38 = vunpack.c.h.bf16 %v6930_v3  ;;  %2881 = vmatpush1.msra.mxu0 %v2809_v60 }
 0x8f9   :  { %v2631_v37 = vmul.f32 %v2623_v34, %v2603_v62  ;;  %v2632_v63 = vmul.f32 %v2623_v34, %v2604_v6  ;;  %v2666_v9 = vmax.f32 %v6924_v51, 0.0 }
 0x8fa   :  { %v2665_v24 = vmax.f32 %v6932_v10, 0.0  ;;  %2882 = vmatprep.subr.mxu0 %v2806_v38 }
 0x8fb   :  { %v6948_v28 = vadd.f32 %v2651_v29, %v2631_v37  ;;  %v6950_v16 = vadd.f32 %v2651_v29, %v2632_v63  ;;  %2687 = vrot.lane.b32.xlu1 %v2666_v9, %s4231_s20  ;;  %2883 = vmatpush1.msra.mxu0 %v2805_v55  ;;  %v7104_v37 = vld [vmem:[%s7721_s10 + $0x88] sm:$0xff] }
 0x8fc   :  { %2685 = vrot.lane.b32.xlu0 %v2665_v24, %s4231_s20  ;;  %2884 = vmatprep.subr.mxu0 %v2802_v20 }
 0x8fd   :  { %v2667_v27 = vmax.f32 %v6948_v28, 0.0  ;;  %v2668_v41 = vmax.f32 %v6950_v16, 0.0  ;;  %2885 = vmatpush1.msra.mxu0 %v2801_v21  ;;  %v7111_v28 = vld [vmem:[%s7721_s10 + $0x78] sm:$0xff] }
 0x8fe   :  { %2886 = vmatprep.subr.mxu0 %v2798_v15 }
 0x8ff   :  { %2691 = vrot.lane.b32.xlu1 %v2668_v41, %s4231_s20  ;;  %2887 = vmatpush1.msra.mxu0 %v2797_v5 }
 0x900   :  { %2689 = vrot.lane.b32.xlu0 %v2667_v27, %s4231_s20  ;;  %2888 = vmatprep.subr.mxu0 %v2794_v57 }
 0x901   :  { %2889 = vmatpush1.msra.mxu0 %v2793_v39 }
 0x902   :  { %2890 = vmatprep.subr.mxu0 %v2790_v47 }
 0x903   :  { %2891 = vmatpush1.msra.mxu0 %v2789_v14 }
 0x904   :  { %2892 = vmatprep.subr.mxu0 %v2786_v42 }
 0x905   :  { %2893 = vmatpush1.msra.mxu0 %v2785_v19 }
 0x906   :  { %2894 = vmatprep.subr.mxu0 %v2782_v17 }
 0x907   :  { %2895 = vmatpush1.msra.mxu0 %v2781_v26 }
 0x908   :  { %2896 = vmatprep.subr.mxu0 %v2778_v58 }
 0x909   :  { %2897 = vmatpush1.msra.mxu0 %v2777_v43 }
 0x90a   :  { %4011 = vmatprep.subr.msk.mxu0 %vm494_vm13, %v2816_v33 }
 0x932   :  { %v2680_v50 = vpop.permute.xlu1 %2679  ;;  %v2678_v22 = vpop.permute.xlu0 %2677 }
 0x933   :  { %v2706_v0 = vmax.f32 %v2662_v35, %v2680_v50  ;;  %v2693_v30 = vsel %vm8014_vm12, %v2678_v22, %v2680_v50  ;;  %v7121_v50 = vld [vmem:[%s7721_s10 + $0x68] sm:$0xff]  ;;  %v2808_v22 = vunpack.c.h.bf16 %v7111_v28 }
 0x934   :  { %v2705_v7 = vmax.f32 %v2661_v11, %v2693_v30  ;;  %v7134_v30 = vld [vmem:[%s7721_s10 + $0x58] sm:$0xff] }
 0x935   :  { %2723 = vrot.lane.b32.xlu1 %v2706_v0, %s4255_s30 }
 0x936   :  { %2721 = vrot.lane.b32.xlu0 %v2705_v7, %s4255_s30 }
 0x969   :  { %v2684_v13 = vpop.permute.xlu1 %2683  ;;  %v2682_v45 = vpop.permute.xlu0 %2681 }
 0x96a   :  { %v7066_v61 = vmax.f32 %v2664_v32, %v2684_v13  ;;  %v2694_v62 = vsel %vm8015_vm0, %v2682_v45, %v2684_v13  ;;  %v7840_v13 = vunpack.c.l.bf16 %v7121_v50  ;;  %v7145_v45 = vld [vmem:[%s7721_s10 + $0x48] sm:$0xff] }
 0x96b   :  { %v7071_v1 = vmax.f32 %v2663_v54, %v2694_v62  ;;  %v7837_v62 = vunpack.c.h.bf16 %v7134_v30 }
 0x96c   :  { %2727 = vrot.lane.b32.xlu1 %v7066_v61, %s4255_s30 }
 0x96d   :  { %v2688_v56 = vpop.permute.xlu1 %2687  ;;  %2725 = vrot.lane.b32.xlu0 %v7071_v1, %s4255_s30 }
 0x96e   :  { %v7079_v35 = vmax.f32 %v2666_v9, %v2688_v56  ;;  %v2686_v11 = vpop.permute.xlu0 %2685 }
 0x96f   :  { %v2695_v44 = vsel %vm8016_vm14, %v2686_v11, %v2688_v56  ;;  %v7836_v56 = vunpack.c.l.bf16 %v7134_v30  ;;  %v7156_v11 = vld [vmem:[%s7721_s10 + $0x38] sm:$0xff] }
 0x970   :  { %v7084_v32 = vmax.f32 %v2665_v24, %v2695_v44  ;;  %2731 = vrot.lane.b32.xlu1 %v7079_v35, %s4255_s30  ;;  %v2815_v24 = vunpack.c.l.bf16 %v7051_v40  ;;  %v7838_v44 = vunpack.c.h.bf16 %v7145_v45  ;;  %v8019_v40 = vunpack.c.l.bf16 %v7121_v50 }
 0x971   :  { %v2692_v4 = vpop.permute.xlu1 %2691 }
 0x972   :  { %v7088_v54 = vmax.f32 %v2668_v41, %v2692_v4  ;;  %2729 = vrot.lane.b32.xlu0 %v7084_v32, %s4255_s30  ;;  %v2690_v6 = vpop.permute.xlu0 %2689  ;;  %v2811_v41 = vunpack.c.l.bf16 %v7104_v37 }
 0x973   :  { %v2696_v51 = vsel %vm8017_vm10, %v2690_v6, %v2692_v4  ;;  %v7839_v4 = vunpack.c.l.bf16 %v7145_v45  ;;  %v7167_v6 = vld [vmem:[%s7721_s10 + $0x28] sm:$0xff] }
 0x974   :  { %v7095_v34 = vmax.f32 %v2667_v27, %v2696_v51  ;;  %2735 = vrot.lane.b32.xlu1 %v7088_v54, %s4255_s30  ;;  %v2812_v27 = vunpack.c.h.bf16 %v7104_v37  ;;  %v7844_v51 = vunpack.c.h.bf16 %v7156_v11  ;;  %v8022_v37 = vunpack.c.h.bf16 %v7145_v45 }
 0x976   :  { %2733 = vrot.lane.b32.xlu0 %v7095_v34, %s4255_s30  ;;  %s4265_s30 = smov [#allocation2]  }
 0x977   :  { %s3973_s19 = sshll.u32 %s4265_s30, 4  ;;  %s3974_s19 = int_to_ptr.vmem [resolvable:$true] %s3973_s19 }
 0x978   :  { %s4209_s22 = scalar_lea.vmem %s3974_s19, 32  ;;  %p4214_p1 = scmp.lt.s32.totalorder %s3974_s19, %s3974_s19 }
 0x979   :  { %p4210_p0 = scmp.ne.s32.totalorder %s3974_s19, %s4209_s22  ;;  %p4215_p2 = scmp.lt.s32.totalorder %s4209_s22, %s4209_s22 }
 0x97b   :  { %p4216_p3 = por %p4215_p2, %p4214_p1 }
 0x97d   :  { %p4217_p4 = pnand %p4216_p3, %p4210_p0 }
 0x9a7   :  { %v2724_v10 = vpop.permute.xlu1 %2723 }
 0x9a8   :  { %v2750_v63 = vmax.f32 %v2706_v0, %v2724_v10  ;;  %v2722_v9 = vpop.permute.xlu0 %2721  ;;  %v2807_v0 = vunpack.c.l.bf16 %v7111_v28  ;;  %v8024_v28 = vunpack.c.h.bf16 %v7156_v11 }
 0x9a9   :  { %v2737_v29 = vsel %vm1863_vm15, %v2722_v9, %v2724_v10  ;;  %v7843_v10 = vunpack.c.l.bf16 %v7156_v11  ;;  %v7841_v9 = vunpack.c.h.bf16 %v7167_v6 }
 0x9aa   :  { %v7113_v16 = vmax.f32 %v2705_v7, %v2737_v29  ;;  %3210 = vrot.lane.b32.xlu0 %v2750_v63, %s4250_s5  ;;  %v7849_v7 = vunpack.c.h.bf16 %v7121_v50  ;;  %v7178_v63 = vld [vmem:[%s7721_s10 + $0x18] sm:$0xff]  ;;  %v7842_v29 = vunpack.c.l.bf16 %v7167_v6 }
 0x9ac   :  { %4007 = vmatmul.mubr.msk.f32.vlgmr.msra.gmra.mxu0 %vm2841_vm8, %v7113_v16 }
 0x9ad   :  { %4012 = vmatpush1.msk.msra.mxu0 %vm494_vm13, %v2815_v24  ;;  %2936 = vmatprep.mubr.f32.mxu0 %v7999_v52 }
 0x9ae   :  { %2969 = vmatprep.subr.mxu0 %v2812_v27 }
 0x9af   :  { %2970 = vmatpush1.msra.mxu0 %v2811_v41 }
 0x9b0   :  { %2971 = vmatprep.subr.mxu0 %v2808_v22 }
 0x9b1   :  { %2972 = vmatpush1.msra.mxu0 %v2807_v0 }
 0x9b2   :  { %2973 = vmatprep.subr.mxu0 %v7849_v7 }
 0x9b3   :  { %2974 = vmatpush1.msra.mxu0 %v7840_v13 }
 0x9b4   :  { %2975 = vmatprep.subr.mxu0 %v7837_v62  ;;  %v7845_v62 = vunpack.c.h.bf16 %v7178_v63 }
 0x9b5   :  { %2976 = vmatpush1.msra.mxu0 %v7836_v56  ;;  %v7189_v56 = vld [vmem:[%s7721_s10 + $0x8] sm:$0xff] }
 0x9b6   :  { %2977 = vmatprep.subr.mxu0 %v7838_v44  ;;  %v7846_v44 = vunpack.c.l.bf16 %v7178_v63  ;;  %v7848_v13 = vunpack.c.l.bf16 %v7189_v56 }
 0x9b7   :  { %2978 = vmatpush1.msra.mxu0 %v7839_v4  ;;  %v7847_v4 = vunpack.c.h.bf16 %v7189_v56 }
 0x9b8   :  { %2979 = vmatprep.subr.mxu0 %v7844_v51 }
 0x9b9   :  { %2980 = vmatpush1.msra.mxu0 %v7843_v10 }
 0x9ba   :  { %2981 = vmatprep.subr.mxu0 %v7841_v9 }
 0x9bb   :  { %2982 = vmatpush1.msra.mxu0 %v7842_v29 }
 0x9bc   :  { %2983 = vmatprep.subr.mxu0 %v7845_v62 }
 0x9bd   :  { %2984 = vmatpush1.msra.mxu0 %v7846_v44 }
 0x9be   :  { %2985 = vmatprep.subr.mxu0 %v7847_v4 }
 0x9bf   :  { %2986 = vmatpush1.msra.mxu0 %v7848_v13 }
 0x9c0   :  { %4019 = vmatprep.subr.msk.mxu0 %vm494_vm13, %v2814_v49 }
 0x9de   :  { %v2728_v9 = vpop.permute.xlu1 %2727 }
 0x9df   :  { %v2752_v29 = vmax.f32 %v7066_v61, %v2728_v9  ;;  %v2726_v10 = vpop.permute.xlu0 %2725 }
 0x9e0   :  { %v2738_v51 = vsel %vm1863_vm15, %v2726_v10, %v2728_v9  ;;  %v4263_v9 = vmov 1.0  }
 0x9e1   :  { %v2751_v62 = vmax.f32 %v7071_v1, %v2738_v51  ;;  %3212 = vrot.lane.b32.xlu1 %v2752_v29, %s4250_s5 }
 0x9e2   :  { %v2732_v44 = vpop.permute.xlu1 %2731 }
 0x9e3   :  { %v2754_v4 = vmax.f32 %v7079_v35, %v2732_v44  ;;  %4008 = vmatmul.mubr.msk.f32.gmra.mxu0 %vm2841_vm8, %v2751_v62 }
 0x9e4   :  { %v2730_v13 = vpop.permute.xlu0 %2729  ;;  %2942 = vmatprep.mubr.f32.mxu0 %v7999_v52 }
 0x9e5   :  { %v2739_v49 = vsel %vm1863_vm15, %v2730_v13, %v2732_v44  ;;  %3214 = vrot.lane.b32.xlu0 %v2754_v4, %s4250_s5  ;;  %v7347_v4 = vld [vmem:[%s7722_s11 + $0x38] sm:$0xff] }
 0x9e6   :  { %v2753_v61 = vmax.f32 %v7084_v32, %v2739_v49  ;;  %v2736_v7 = vpop.permute.xlu1 %2735  ;;  %v7355_v49 = vld [vmem:[%s7722_s11 + $0x28] sm:$0xff] }
 0x9e7   :  { %v2756_v10 = vmax.f32 %v7088_v54, %v2736_v7 }
 0x9e8   :  { %4009 = vmatmul.mubr.msk.f32.gmra.mxu0 %vm2841_vm8, %v2753_v61  ;;  %v2734_v1 = vpop.permute.xlu0 %2733 }
 0x9e9   :  { %v2740_v51 = vsel %vm1863_vm15, %v2734_v1, %v2736_v7  ;;  %3216 = vrot.lane.b32.xlu1 %v2756_v10, %s4250_s5  ;;  %2948 = vmatprep.mubr.f32.mxu0 %v7999_v52  ;;  %vm3060_vm15 = vcmask 261120   ;;  %v2839_v10 = vunpack.c.l.bf16 %v7347_v4 }
 0x9ea   :  { %v2755_v35 = vmax.f32 %v7095_v34, %v2740_v51  ;;  %v7362_v51 = vld [vmem:[%s7722_s11 + $0x18] sm:$0xff] }
 0x9ec   :  { %4010 = vmatmul.mubr.msk.f32.gmra.mxu0 %vm2841_vm8, %v2755_v35 }
 0x9ed   :  { %3019 = vmatprep.mubr.f32.mxu0 %v7999_v52 }
 0x9f0   :  { %4013 = vmatmul.mubr.msk.f32.vlgmr.msra.gmra.mxu0 %vm2841_vm8, %v7113_v16 }
 0x9f1   :  { %3025 = vmatprep.mubr.f32.mxu0 %v7999_v52  ;;  %4020 = vmatpush1.msk.msra.mxu0 %vm494_vm13, %v2813_v12 }
 0x9f2   :  { %3240 = vmatprep.subr.mxu0 %v2810_v48 }
 0x9f3   :  { %3241 = vmatpush1.msra.mxu0 %v2809_v60 }
 0x9f4   :  { %4014 = vmatmul.mubr.msk.f32.gmra.mxu0 %vm2841_vm8, %v2751_v62  ;;  %3242 = vmatprep.subr.mxu0 %v2806_v38 }
 0x9f5   :  { %3031 = vmatprep.mubr.f32.mxu0 %v7999_v52  ;;  %3243 = vmatpush1.msra.mxu0 %v2805_v55 }
 0x9f6   :  { %3244 = vmatprep.subr.mxu0 %v2802_v20 }
 0x9f7   :  { %3245 = vmatpush1.msra.mxu0 %v2801_v21  ;;  %v7308_v21 = vld [vmem:[%s7722_s11 + $0x20] sm:$0xff] }
 0x9f8   :  { %4015 = vmatmul.mubr.msk.f32.gmra.mxu0 %vm2841_vm8, %v2753_v61  ;;  %3246 = vmatprep.subr.mxu0 %v2798_v15  ;;  %v2837_v15 = vunpack.c.l.bf16 %v7303_v53  ;;  %v2840_v61 = vunpack.c.h.bf16 %v7347_v4 }
 0x9f9   :  { %3037 = vmatprep.mubr.f32.mxu0 %v7999_v52  ;;  %3247 = vmatpush1.msra.mxu0 %v2797_v5 }
 0x9fa   :  { %3248 = vmatprep.subr.mxu0 %v2794_v57  ;;  %v2834_v57 = vunpack.c.h.bf16 %v7308_v21 }
 0x9fb   :  { %3249 = vmatpush1.msra.mxu0 %v2793_v39  ;;  %v2833_v39 = vunpack.c.l.bf16 %v7308_v21  ;;  %v3609_v21 = vld [vmem:[%s7723_s12 + $0xf8] sm:$0xff] }
 0x9fc   :  { %4016 = vmatmul.mubr.msk.f32.gmra.mxu0 %vm2841_vm8, %v2755_v35  ;;  %3250 = vmatprep.subr.mxu0 %v2790_v47  ;;  %v7322_v47 = vld [vmem:[%s7722_s11] sm:$0xff]  ;;  %v2836_v35 = vunpack.c.h.bf16 %v7355_v49 }
 0x9fd   :  { %3251 = vmatpush1.msra.mxu0 %v2789_v14  ;;  %3290 = vmatprep.mubr.f32.mxu0 %v7999_v52  ;;  %v2830_v14 = vunpack.c.h.bf16 %v7315_v2 }
 0x9fe   :  { %3252 = vmatprep.subr.mxu0 %v2786_v42 }
 0x9ff   :  { %3253 = vmatpush1.msra.mxu0 %v2785_v19  ;;  %v2829_v19 = vunpack.c.l.bf16 %v7315_v2  ;;  %v3608_v2 = vld [vmem:[%s7723_s12 + $0xf0] sm:$0xff] }
 0xa00   :  { %3254 = vmatprep.subr.mxu0 %v2782_v17 }
 0xa01   :  { %3255 = vmatpush1.msra.mxu0 %v2781_v26  ;;  %v2826_v26 = vunpack.c.h.bf16 %v7322_v47 }
 0xa02   :  { %3256 = vmatprep.subr.mxu0 %v2778_v58  ;;  %v2825_v58 = vunpack.c.l.bf16 %v7322_v47  ;;  %v3591_v47 = vld [vmem:[%s7723_s12 + $0x68] sm:$0xff] }
 0xa03   :  { %3257 = vmatpush1.msra.mxu0 %v2777_v43 }
 0xa1c   :  { %v7280_v8 = vpop.permute.xlu0 %3210 }
 0xa1d   :  { %4021 = vmatmul.mubr.msk.f32.vlgmr.msra.gmra.mxu0 %vm2841_vm8, %v7280_v8 }
 0xa1e   :  { %3296 = vmatprep.mubr.f32.mxu0 %v7999_v52 }
 0xa53   :  { %v7285_v31 = vpop.permute.xlu1 %3212 }
 0xa54   :  { %4022 = vmatmul.mubr.msk.f32.gmra.mxu0 %vm2841_vm8, %v7285_v31 }
 0xa55   :  { %3302 = vmatprep.mubr.f32.mxu0 %v7999_v52 }
 0xa57   :  { %v7290_v12 = vpop.permute.xlu0 %3214 }
 0xa58   :  { %4023 = vmatmul.mubr.msk.f32.gmra.mxu0 %vm2841_vm8, %v7290_v12 }
 0xa59   :  { %3308 = vmatprep.mubr.f32.mxu0 %v7999_v52 }
 0xa5b   :  { %v7295_v3 = vpop.permute.xlu1 %3216 }
 0xa5c   :  { %4024 = vmatmul.mubr.msk.f32.gmra.mxu0 %vm2841_vm8, %v7295_v3 }
 0xa5d   :  { %3484 = vmatprep.mubr.f32.mxu0 %v7999_v52 }
 0xa6c   :  { %v2932_v48 = vpop.f32.mrf.mxu0 }
 0xa6d   :  { %v3044_v13 = vmul.f32 %v2932_v48, %v2825_v58  ;;  %v2835_v48 = vunpack.c.l.bf16 %v7355_v49  ;;  %v3641_v49 = vld [vmem:[%s7723_s12 + $0x1f8] sm:$0xff] }
 0xa6e   :  { %v2934_v60 = vpop.f32.mrf.mxu0 }
 0xa6f   :  { %v3045_v7 = vmul.f32 %v2934_v60, %v2826_v26 }
 0xaa3   :  { %v2938_v25 = vpop.f32.mrf.mxu0 }
 0xaa4   :  { %v3048_v34 = vmul.f32 %v2938_v25, %v2829_v19  ;;  %v7369_v25 = vld [vmem:[%s7722_s11 + $0x8] sm:$0xff] }
 0xaa5   :  { %v2940_v38 = vpop.f32.mrf.mxu0 }
 0xaa6   :  { %v3049_v54 = vmul.f32 %v2940_v38, %v2830_v14  ;;  %v2832_v38 = vunpack.c.h.bf16 %v7362_v51 }
 0xaa8   :  { %v2944_v55 = vpop.f32.mrf.mxu0 }
 0xaa9   :  { %v3052_v43 = vmul.f32 %v2944_v55, %v2833_v39 }
 0xaaa   :  { %v2946_v20 = vpop.f32.mrf.mxu0 }
 0xaab   :  { %v3053_v18 = vmul.f32 %v2946_v20, %v2834_v57  ;;  %v2831_v20 = vunpack.c.l.bf16 %v7362_v51  ;;  %v3640_v51 = vld [vmem:[%s7723_s12 + $0x1f0] sm:$0xff] }
 0xaac   :  { %v2950_v5 = vpop.f32.mrf.mxu0 }
 0xaad   :  { %v3056_v36 = vmul.f32 %v2950_v5, %v2837_v15 }
 0xaae   :  { %v2952_v46 = vpop.f32.mrf.mxu0 }
 0xaaf   :  { %v3057_v42 = vmul.f32 %v2952_v46, %v2838_v59  ;;  %v2828_v46 = vunpack.c.h.bf16 %v7369_v25 }
 0xab0   :  { %v3021_v17 = vpop.f32.mrf.mxu0 }
 0xab1   :  { %3088 = vmatprep.subr.mxu1 %v3057_v42 }
 0xab2   :  { %v3023_v32 = vpop.f32.mrf.mxu0  ;;  %3089 = vmatpush1.msra.mxu1 %v3056_v36  ;;  %v2827_v36 = vunpack.c.l.bf16 %v7369_v25  ;;  %v3623_v25 = vld [vmem:[%s7723_s12 + $0x168] sm:$0xff] }
 0xab3   :  { %3090 = vmatprep.subr.mxu1 %v3053_v18 }
 0xab4   :  { %v3027_v16 = vpop.f32.mrf.mxu0  ;;  %3091 = vmatpush1.msra.mxu1 %v3052_v43 }
 0xab5   :  { %3092 = vmatprep.subr.mxu1 %v3049_v54  ;;  %v3050_v54 = vmul.f32 %v3027_v16, %v2831_v20 }
 0xab6   :  { %v3029_v62 = vpop.f32.mrf.mxu0  ;;  %3093 = vmatpush1.msra.mxu1 %v3048_v34  ;;  %v3047_v34 = vmul.f32 %v3023_v32, %v2828_v46  ;;  %v8031_v32 = vunpack.c.l.bf16 %v7189_v56 }
 0xab7   :  { %3094 = vmatprep.subr.mxu1 %v3045_v7  ;;  %v3051_v43 = vmul.f32 %v3029_v62, %v2832_v38  ;;  %v3046_v7 = vmul.f32 %v3021_v17, %v2827_v36  ;;  %v8029_v17 = vunpack.c.l.bf16 %v7178_v63 }
 0xab8   :  { %v3033_v44 = vpop.f32.mrf.mxu0  ;;  %3095 = vmatpush1.msra.mxu1 %v3044_v13 }
 0xab9   :  { %4017 = vmatmul.mubr.msk.f32.vlgmr.msra.gmra.mxu1 %vm3060_vm15, %v4263_v9  ;;  %v3054_v18 = vmul.f32 %v3033_v44, %v2835_v48 }
 0xaba   :  { %v3035_v29 = vpop.f32.mrf.mxu0  ;;  %3199 = vmatprep.mubr.f32.mxu1 %v7999_v52 }
 0xabb   :  { %v3055_v42 = vmul.f32 %v3035_v29, %v2836_v35 }
 0xabc   :  { %v3039_v1 = vpop.f32.mrf.mxu0 }
 0xabd   :  { %v3058_v5 = vmul.f32 %v3039_v1, %v2839_v10 }
 0xabe   :  { %v3041_v60 = vpop.f32.mrf.mxu0 }
 0xabf   :  { %v3059_v55 = vmul.f32 %v3041_v60, %v2840_v61  ;;  %v3604_v60 = vld [vmem:[%s7723_s12 + $0xd0] sm:$0xff] }
 0xac1   :  { %3159 = vmatprep.subr.mxu1 %v3059_v55  ;;  %v3588_v55 = vld [vmem:[%s7723_s12 + $0x50] sm:$0xff] }
 0xac2   :  { %3160 = vmatpush1.msra.mxu1 %v3058_v5  ;;  %v3603_v5 = vld [vmem:[%s7723_s12 + $0xc8] sm:$0xff] }
 0xac3   :  { %3161 = vmatprep.subr.mxu1 %v3055_v42  ;;  %v3587_v42 = vld [vmem:[%s7723_s12 + $0x48] sm:$0xff] }
 0xac4   :  { %3162 = vmatpush1.msra.mxu1 %v3054_v18  ;;  %v3602_v18 = vld [vmem:[%s7723_s12 + $0xc0] sm:$0xff] }
 0xac5   :  { %3163 = vmatprep.subr.mxu1 %v3051_v43  ;;  %v3586_v43 = vld [vmem:[%s7723_s12 + $0x40] sm:$0xff] }
 0xac6   :  { %3164 = vmatpush1.msra.mxu1 %v3050_v54  ;;  %v3601_v54 = vld [vmem:[%s7723_s12 + $0xb8] sm:$0xff] }
 0xac7   :  { %3165 = vmatprep.subr.mxu1 %v3047_v34  ;;  %v3585_v34 = vld [vmem:[%s7723_s12 + $0x38] sm:$0xff] }
 0xac8   :  { %3166 = vmatpush1.msra.mxu1 %v3046_v7  ;;  %v3600_v7 = vld [vmem:[%s7723_s12 + $0xb0] sm:$0xff] }
 0xac9   :  { %4018 = vmatmul.mubr.msk.f32.vlgmr.msra.gmra.mxu1 %vm3060_vm15, %v4263_v9  ;;  %4025 = vmatprep.subr.msk.mxu1 %vm494_vm13, %v2816_v33  ;;  %v8018_v33 = vunpack.c.h.bf16 %v7121_v50  ;;  %v8026_v50 = vunpack.c.h.bf16 %v7167_v6 }
 0xaca   :  { %4026 = vmatpush1.msk.msra.mxu1 %vm494_vm13, %v2815_v24  ;;  %3379 = vmatprep.mubr.f32.mxu1 %v7999_v52  ;;  %v8020_v24 = vunpack.c.h.bf16 %v7134_v30  ;;  %vm4264_vm13 = vmmov 0  }
 0xacb   :  { %3329 = vmatprep.subr.mxu1 %v2812_v27  ;;  %v8021_v27 = vunpack.c.l.bf16 %v7134_v30  ;;  %v8028_v30 = vunpack.c.h.bf16 %v7178_v63 }
 0xacc   :  { %3330 = vmatpush1.msra.mxu1 %v2811_v41  ;;  %v8023_v41 = vunpack.c.l.bf16 %v7145_v45  ;;  %v8030_v45 = vunpack.c.h.bf16 %v7189_v56 }
 0xacd   :  { %3331 = vmatprep.subr.mxu1 %v2808_v22  ;;  %v8025_v22 = vunpack.c.l.bf16 %v7156_v11 }
 0xace   :  { %3332 = vmatpush1.msra.mxu1 %v2807_v0  ;;  %v8027_v0 = vunpack.c.l.bf16 %v7167_v6 }
 0xacf   :  { %3333 = vmatprep.subr.mxu1 %v8018_v33  ;;  %v3584_v33 = vld [vmem:[%s7723_s12 + $0x30] sm:$0xff] }
 0xad0   :  { %3334 = vmatpush1.msra.mxu1 %v8019_v40  ;;  %v3599_v40 = vld [vmem:[%s7723_s12 + $0xa8] sm:$0xff] }
 0xad1   :  { %3335 = vmatprep.subr.mxu1 %v8020_v24  ;;  %v3583_v24 = vld [vmem:[%s7723_s12 + $0x28] sm:$0xff] }
 0xad2   :  { %3336 = vmatpush1.msra.mxu1 %v8021_v27  ;;  %v3598_v27 = vld [vmem:[%s7723_s12 + $0xa0] sm:$0xff] }
 0xad3   :  { %3337 = vmatprep.subr.mxu1 %v8022_v37  ;;  %v3582_v37 = vld [vmem:[%s7723_s12 + $0x20] sm:$0xff] }
 0xad4   :  { %3338 = vmatpush1.msra.mxu1 %v8023_v41  ;;  %v3597_v41 = vld [vmem:[%s7723_s12 + $0x98] sm:$0xff] }
 0xad5   :  { %3339 = vmatprep.subr.mxu1 %v8024_v28  ;;  %v3581_v28 = vld [vmem:[%s7723_s12 + $0x18] sm:$0xff] }
 0xad6   :  { %3340 = vmatpush1.msra.mxu1 %v8025_v22  ;;  %v3596_v22 = vld [vmem:[%s7723_s12 + $0x90] sm:$0xff] }
 0xad7   :  { %3341 = vmatprep.subr.mxu1 %v8026_v50  ;;  %v3580_v50 = vld [vmem:[%s7723_s12 + $0x10] sm:$0xff] }
 0xad8   :  { %3342 = vmatpush1.msra.mxu1 %v8027_v0  ;;  %v3595_v0 = vld [vmem:[%s7723_s12 + $0x88] sm:$0xff] }
 0xad9   :  { %3343 = vmatprep.subr.mxu1 %v8028_v30  ;;  %v3579_v30 = vld [vmem:[%s7723_s12 + $0x8] sm:$0xff] }
 0xada   :  { %3344 = vmatpush1.msra.mxu1 %v8029_v17  ;;  %v3594_v17 = vld [vmem:[%s7723_s12 + $0x80] sm:$0xff] }
 0xadb   :  { %3345 = vmatprep.subr.mxu1 %v8030_v45  ;;  %v3578_v45 = vld [vmem:[%s7723_s12] sm:$0xff] }
 0xadc   :  { %3346 = vmatpush1.msra.mxu1 %v8031_v32 }
 0xadd   :  { %4027 = vmatmul.mubr.msk.f32.vlgmr.msra.gmra.mxu1 %vm2841_vm8, %v7280_v8  ;;  %v3292_v56 = vpop.f32.mrf.mxu0 }
 0xade   :  { %3385 = vmatprep.mubr.f32.mxu1 %v7999_v52 }
 0xadf   :  { %v3294_v11 = vpop.f32.mrf.mxu0 }
 0xae0   :  { %v3405_v53 = vmul.f32 %v3294_v11, %v2826_v26  ;;  %v3605_v26 = vld [vmem:[%s7723_s12 + $0xd8] sm:$0xff] }
 0xae1   :  { %4028 = vmatmul.mubr.msk.f32.gmra.mxu1 %vm2841_vm8, %v7285_v31 }
 0xae2   :  { %3391 = vmatprep.mubr.f32.mxu1 %v7999_v52 }
 0xae5   :  { %4029 = vmatmul.mubr.msk.f32.gmra.mxu1 %vm2841_vm8, %v7290_v12 }
 0xae6   :  { %3397 = vmatprep.mubr.f32.mxu1 %v7999_v52 }
 0xae9   :  { %4030 = vmatmul.mubr.msk.f32.gmra.mxu1 %vm2841_vm8, %v7295_v3 }
 0xaea   :  { %3555 = vmatprep.mubr.f32.mxu1 %v7999_v52 }
 0xb14   :  { %v3298_v6 = vpop.f32.mrf.mxu0 }
 0xb15   :  { %v3408_v1 = vmul.f32 %v3298_v6, %v2829_v19  ;;  %v3590_v19 = vld [vmem:[%s7723_s12 + $0x60] sm:$0xff] }
 0xb16   :  { %v3300_v63 = vpop.f32.mrf.mxu0 }
 0xb17   :  { %v3409_v29 = vmul.f32 %v3300_v63, %v2830_v14  ;;  %v3606_v14 = vld [vmem:[%s7723_s12 + $0xe0] sm:$0xff] }
 0xb18   :  { %v3304_v8 = vpop.f32.mrf.mxu0 }
 0xb19   :  { %v3412_v3 = vmul.f32 %v3304_v8, %v2833_v39  ;;  %v3607_v39 = vld [vmem:[%s7723_s12 + $0xe8] sm:$0xff] }
 0xb1a   :  { %v3306_v16 = vpop.f32.mrf.mxu0 }
 0xb1b   :  { %v3413_v44 = vmul.f32 %v3306_v16, %v2834_v57  ;;  %v3592_v57 = vld [vmem:[%s7723_s12 + $0x70] sm:$0xff] }
 0xb1c   :  { %v3310_v13 = vpop.f32.mrf.mxu0 }
 0xb1d   :  { %v3416_v12 = vmul.f32 %v3310_v13, %v2837_v15  ;;  %v3593_v15 = vld [vmem:[%s7723_s12 + $0x78] sm:$0xff] }
 0xb1e   :  { %v3312_v31 = vpop.f32.mrf.mxu0 }
 0xb1f   :  { %v3417_v62 = vmul.f32 %v3312_v31, %v2838_v59  ;;  %v3404_v59 = vmul.f32 %v3292_v56, %v2825_v58  ;;  %v3589_v58 = vld [vmem:[%s7723_s12 + $0x58] sm:$0xff] }
 0xb21   :  { %3444 = vmatprep.subr.mxu0 %v3417_v62 }
 0xb22   :  { %3445 = vmatpush1.msra.mxu0 %v3416_v12 }
 0xb23   :  { %3446 = vmatprep.subr.mxu0 %v3413_v44 }
 0xb24   :  { %3447 = vmatpush1.msra.mxu0 %v3412_v3 }
 0xb25   :  { %3448 = vmatprep.subr.mxu0 %v3409_v29 }
 0xb26   :  { %3449 = vmatpush1.msra.mxu0 %v3408_v1 }
 0xb27   :  { %3450 = vmatprep.subr.mxu0 %v3405_v53 }
 0xb28   :  { %3451 = vmatpush1.msra.mxu0 %v3404_v59 }
 0xb29   :  { %4031 = vmatmul.mubr.msk.f32.vlgmr.msra.gmra.mxu0 %vm3060_vm15, %v4263_v9  ;;  %4039 = vmatprep.subr.mxu0 %v3609_v21 }
 0xb2a   :  { %4040 = vmatpush3.msra.mxu0 %v3593_v15  ;;  %v3636_v15 = vld [vmem:[%s7723_s12 + $0x1d0] sm:$0xff] }
 0xb2b   :  { %4041 = vmatprep.subr.mxu0 %v3608_v2  ;;  %v3620_v2 = vld [vmem:[%s7723_s12 + $0x150] sm:$0xff] }
 0xb2c   :  { %4042 = vmatpush3.msra.mxu0 %v3592_v57  ;;  %v3635_v57 = vld [vmem:[%s7723_s12 + $0x1c8] sm:$0xff] }
 0xb2d   :  { %4043 = vmatprep.subr.mxu0 %v3607_v39  ;;  %v3619_v39 = vld [vmem:[%s7723_s12 + $0x148] sm:$0xff] }
 0xb2e   :  { %4044 = vmatpush3.msra.mxu0 %v3591_v47  ;;  %v3634_v47 = vld [vmem:[%s7723_s12 + $0x1c0] sm:$0xff] }
 0xb2f   :  { %4045 = vmatprep.subr.mxu0 %v3606_v14  ;;  %v3618_v14 = vld [vmem:[%s7723_s12 + $0x140] sm:$0xff] }
 0xb30   :  { %4046 = vmatpush3.msra.mxu0 %v3590_v19  ;;  %v3633_v19 = vld [vmem:[%s7723_s12 + $0x1b8] sm:$0xff] }
 0xb31   :  { %4047 = vmatprep.subr.mxu0 %v3605_v26  ;;  %v3617_v26 = vld [vmem:[%s7723_s12 + $0x138] sm:$0xff] }
 0xb32   :  { %4048 = vmatpush3.msra.mxu0 %v3589_v58  ;;  %v3632_v58 = vld [vmem:[%s7723_s12 + $0x1b0] sm:$0xff] }
 0xb33   :  { %4049 = vmatprep.subr.mxu0 %v3604_v60  ;;  %v3616_v60 = vld [vmem:[%s7723_s12 + $0x130] sm:$0xff] }
 0xb34   :  { %4050 = vmatpush3.msra.mxu0 %v3588_v55  ;;  %v3631_v55 = vld [vmem:[%s7723_s12 + $0x1a8] sm:$0xff] }
 0xb35   :  { %4051 = vmatprep.subr.mxu0 %v3603_v5  ;;  %v3615_v5 = vld [vmem:[%s7723_s12 + $0x128] sm:$0xff] }
 0xb36   :  { %4052 = vmatpush3.msra.mxu0 %v3587_v42  ;;  %v3630_v42 = vld [vmem:[%s7723_s12 + $0x1a0] sm:$0xff] }
 0xb37   :  { %4053 = vmatprep.subr.mxu0 %v3602_v18  ;;  %v3614_v18 = vld [vmem:[%s7723_s12 + $0x120] sm:$0xff] }
 0xb38   :  { %4054 = vmatpush3.msra.mxu0 %v3586_v43  ;;  %v3629_v43 = vld [vmem:[%s7723_s12 + $0x198] sm:$0xff] }
 0xb39   :  { %4055 = vmatprep.subr.mxu0 %v3601_v54 }
 0xb3a   :  { %4056 = vmatpush3.msra.mxu0 %v3585_v34 }
 0xb3b   :  { %4057 = vmatprep.subr.mxu0 %v3600_v7 }
 0xb3c   :  { %4058 = vmatpush3.msra.mxu0 %v3584_v33 }
 0xb3d   :  { %4059 = vmatprep.subr.mxu0 %v3599_v40 }
 0xb3e   :  { %4060 = vmatpush3.msra.mxu0 %v3583_v24 }
 0xb3f   :  { %4061 = vmatprep.subr.mxu0 %v3598_v27  ;;  %v3613_v27 = vld [vmem:[%s7723_s12 + $0x118] sm:$0xff] }
 0xb40   :  { %4062 = vmatpush3.msra.mxu0 %v3582_v37  ;;  %v3628_v37 = vld [vmem:[%s7723_s12 + $0x190] sm:$0xff] }
 0xb41   :  { %4063 = vmatprep.subr.mxu0 %v3597_v41  ;;  %v3612_v41 = vld [vmem:[%s7723_s12 + $0x110] sm:$0xff] }
 0xb42   :  { %4064 = vmatpush3.msra.mxu0 %v3581_v28  ;;  %v3627_v28 = vld [vmem:[%s7723_s12 + $0x188] sm:$0xff] }
 0xb43   :  { %4065 = vmatprep.subr.mxu0 %v3596_v22  ;;  %v3611_v22 = vld [vmem:[%s7723_s12 + $0x108] sm:$0xff] }
 0xb44   :  { %4066 = vmatpush3.msra.mxu0 %v3580_v50  ;;  %v3626_v50 = vld [vmem:[%s7723_s12 + $0x180] sm:$0xff] }
 0xb45   :  { %4067 = vmatprep.subr.mxu0 %v3595_v0  ;;  %v3610_v0 = vld [vmem:[%s7723_s12 + $0x100] sm:$0xff] }
 0xb46   :  { %4068 = vmatpush3.msra.mxu0 %v3579_v30 }
 0xb47   :  { %4069 = vmatprep.subr.mxu0 %v3594_v17 }
 0xb48   :  { %4070 = vmatpush3.msra.mxu0 %v3578_v45 }
 0xb49   :  { %4113 = vmatprep.subr.mxu0 %v7999_v52 }
 0xb79   :  { %v7563_v32 = vpop.f32.mrf.mxu1 }
 0xb7b   :  { %v7565_v56 = vpop.f32.mrf.mxu1 }
 0xb89   :  { %v7567_v11 = vpop.f32.mrf.mxu1 }
 0xb8b   :  { %v7569_v6 = vpop.f32.mrf.mxu1 }
 0xb9d   :  { %v3381_v63 = vpop.f32.mrf.mxu1 }
 0xb9f   :  { %v3383_v8 = vpop.f32.mrf.mxu1 }
 0xba0   :  { %v3407_v4 = vmul.f32 %v3383_v8, %v2828_v46  ;;  %v3637_v46 = vld [vmem:[%s7723_s12 + $0x1d8] sm:$0xff] }
 0xba1   :  { %v3387_v16 = vpop.f32.mrf.mxu1 }
 0xba2   :  { %v3410_v21 = vmul.f32 %v3387_v16, %v2831_v20  ;;  %v3622_v20 = vld [vmem:[%s7723_s12 + $0x160] sm:$0xff] }
 0xba3   :  { %v3389_v13 = vpop.f32.mrf.mxu1 }
 0xba4   :  { %v3411_v59 = vmul.f32 %v3389_v13, %v2832_v38  ;;  %v3638_v38 = vld [vmem:[%s7723_s12 + $0x1e0] sm:$0xff] }
 0xba5   :  { %v3393_v31 = vpop.f32.mrf.mxu1 }
 0xba6   :  { %v3414_v53 = vmul.f32 %v3393_v31, %v2835_v48  ;;  %v3639_v48 = vld [vmem:[%s7723_s12 + $0x1e8] sm:$0xff] }
 0xba7   :  { %v3395_v62 = vpop.f32.mrf.mxu1 }
 0xba8   :  { %v3415_v1 = vmul.f32 %v3395_v62, %v2836_v35  ;;  %v3624_v35 = vld [vmem:[%s7723_s12 + $0x170] sm:$0xff] }
 0xba9   :  { %v3399_v12 = vpop.f32.mrf.mxu1 }
 0xbaa   :  { %v3418_v29 = vmul.f32 %v3399_v12, %v2839_v10  ;;  %v3625_v10 = vld [vmem:[%s7723_s12 + $0x178] sm:$0xff] }
 0xbab   :  { %v3401_v44 = vpop.f32.mrf.mxu1 }
 0xbac   :  { %v3419_v3 = vmul.f32 %v3401_v44, %v2840_v61  ;;  %v3406_v61 = vmul.f32 %v3381_v63, %v2827_v36  ;;  %v3621_v36 = vld [vmem:[%s7723_s12 + $0x158] sm:$0xff] }
 0xbae   :  { %3515 = vmatprep.subr.mxu1 %v3419_v3 }
 0xbaf   :  { %3516 = vmatpush1.msra.mxu1 %v3418_v29 }
 0xbb0   :  { %3517 = vmatprep.subr.mxu1 %v3415_v1 }
 0xbb1   :  { %3518 = vmatpush1.msra.mxu1 %v3414_v53 }
 0xbb2   :  { %3519 = vmatprep.subr.mxu1 %v3411_v59 }
 0xbb3   :  { %3520 = vmatpush1.msra.mxu1 %v3410_v21 }
 0xbb4   :  { %3521 = vmatprep.subr.mxu1 %v3407_v4 }
 0xbb5   :  { %3522 = vmatpush1.msra.mxu1 %v3406_v61 }
 0xbb6   :  { %4032 = vmatmul.mubr.msk.f32.vlgmr.msra.gmra.mxu1 %vm3060_vm15, %v4263_v9  ;;  %4074 = vmatprep.subr.mxu1 %v3641_v49 }
 0xbb7   :  { %4075 = vmatpush3.msra.mxu1 %v3625_v10 }
 0xbb8   :  { %4076 = vmatprep.subr.mxu1 %v3640_v51 }
 0xbb9   :  { %4077 = vmatpush3.msra.mxu1 %v3624_v35 }
 0xbba   :  { %4078 = vmatprep.subr.mxu1 %v3639_v48 }
 0xbbb   :  { %4079 = vmatpush3.msra.mxu1 %v3623_v25  ;;  %v4038_v25 = vld [vmem:[%s7725_s14] ss:$0 sm:$0xff] }
 0xbbc   :  { %4080 = vmatprep.subr.mxu1 %v3638_v38 }
 0xbbd   :  { %4081 = vmatpush3.msra.mxu1 %v3622_v20 }
 0xbbe   :  { %4082 = vmatprep.subr.mxu1 %v3637_v46 }
 0xbbf   :  { %4083 = vmatpush3.msra.mxu1 %v3621_v36 }
 0xbc0   :  { %4084 = vmatprep.subr.mxu1 %v3636_v15 }
 0xbc1   :  { %4085 = vmatpush3.msra.mxu1 %v3620_v2 }
 0xbc2   :  { %4086 = vmatprep.subr.mxu1 %v3635_v57 }
 0xbc3   :  { %4087 = vmatpush3.msra.mxu1 %v3619_v39 }
 0xbc4   :  { %4088 = vmatprep.subr.mxu1 %v3634_v47 }
 0xbc5   :  { %4089 = vmatpush3.msra.mxu1 %v3618_v14 }
 0xbc6   :  { %4090 = vmatprep.subr.mxu1 %v3633_v19 }
 0xbc7   :  { %4091 = vmatpush3.msra.mxu1 %v3617_v26 }
 0xbc8   :  { %4092 = vmatprep.subr.mxu1 %v3632_v58 }
 0xbc9   :  { %4093 = vmatpush3.msra.mxu1 %v3616_v60 }
 0xbca   :  { %4094 = vmatprep.subr.mxu1 %v3631_v55 }
 0xbcb   :  { %4095 = vmatpush3.msra.mxu1 %v3615_v5 }
 0xbcc   :  { %4096 = vmatprep.subr.mxu1 %v3630_v42 }
 0xbcd   :  { %4097 = vmatpush3.msra.mxu1 %v3614_v18 }
 0xbce   :  { %4098 = vmatprep.subr.mxu1 %v3629_v43 }
 0xbcf   :  { %4099 = vmatpush3.msra.mxu1 %v3613_v27 }
 0xbd0   :  { %4100 = vmatprep.subr.mxu1 %v3628_v37 }
 0xbd1   :  { %4101 = vmatpush3.msra.mxu1 %v3612_v41 }
 0xbd2   :  { %4102 = vmatprep.subr.mxu1 %v3627_v28 }
 0xbd3   :  { %4103 = vmatpush3.msra.mxu1 %v3611_v22 }
 0xbd4   :  { %4104 = vmatprep.subr.mxu1 %v3626_v50 }
 0xbd5   :  { %4105 = vmatpush3.msra.mxu1 %v3610_v0 }
 0xbe9   :  { %v3486_v54 = vpop.f32.mrf.mxu0 }
 0xbea   :  { %v3566_v34 = vrot.slane %v3486_v54, 7 }
 0xbeb   :  { %v3488_v7 = vpop.f32.mrf.mxu0 }
 0xbec   :  { %v3567_v33 = vrot.slane %v3488_v7, 7  ;;  %v3574_v24 = vsel %vm452_vm2, %v7563_v32, %v3566_v34 }
 0xbee   :  { %v3575_v40 = vsel %vm452_vm2, %v7565_v56, %v3567_v33 }
 0xbef   :  { %3706 = vmatprep.mubr.f32.mxu0 %v3575_v40 }
 0xbf0   :  { %3707 = vmatmul.mubr.f32.vlgmr.msra.gmra.mxu0 %v3574_v24 }
 0xbf1   :  { %4115 = vmatprep.mubr.msk.f32.mxu0 %vm4264_vm13, %v7999_v52 }
 0xc76   :  { %v3557_v30 = vpop.f32.mrf.mxu1 }
 0xc77   :  { %v3568_v17 = vrot.slane %v3557_v30, 7 }
 0xc78   :  { %v3559_v45 = vpop.f32.mrf.mxu1 }
 0xc79   :  { %v3569_v32 = vrot.slane %v3559_v45, 7  ;;  %v3576_v63 = vsel %vm452_vm2, %v7567_v11, %v3568_v17 }
 0xc7b   :  { %v3577_v56 = vsel %vm452_vm2, %v7569_v6, %v3569_v32  ;;  %vm3965_vm2 = vcmask 74752  }
 0xc7c   :  { %3776 = vmatprep.mubr.f32.mxu1 %v3577_v56 }
 0xc7d   :  { %3777 = vmatmul.mubr.f32.vlgmr.msra.gmra.mxu1 %v3576_v63 }
 0xcb0   :  { %v4071_v8 = vpop.f32.mrf.mxu0 }
 0xcb2   :  { %v4072_v16 = vpop.f32.mrf.mxu0 }
 0xcb3   :  { %v4073_v62 = vadd.f32 %v4072_v16, %v4071_v8 }
 0xd3d   :  { %v4106_v13 = vpop.f32.mrf.mxu1 }
 0xd3f   :  { %v4107_v31 = vpop.f32.mrf.mxu1 }
 0xd40   :  { %v4108_v12 = vadd.f32 %v4107_v31, %v4106_v13 }
 0xd42   :  { %v3779_v44 = vadd.f32 %v4108_v12, %v4073_v62 }
 0xd44   :  { %v3859_v3 = vmul.f32 %v3779_v44, %v3779_v44  ;;  %4114 = vmatpush3.msk.msra.mxu0 %vm459_vm6, %v3779_v44 }
 0xd45   :  { %4116 = vmatmul.mubr.msk.f32.vlgmr.msra.gmra.mxu0 %vm3782_vm1, %v4263_v9  ;;  %4118 = vmatprep.subr.mxu0 %v7999_v52 }
 0xd46   :  { %4119 = vmatpush3.msk.msra.mxu0 %vm459_vm6, %v3859_v3  ;;  %4120 = vmatprep.mubr.msk.f32.mxu0 %vm4264_vm13, %v7999_v52  ;;  %v4037_v52 = vld [vmem:[%s7724_s13] ss:$0 sm:$0xff] }
 0xd49   :  { %4121 = vmatmul.mubr.msk.f32.vlgmr.msra.gmra.mxu0 %vm3782_vm1, %v4263_v9 }
 0xe05   :  { %v3854_v11 = vpop.f32.mrf.mxu0 }
 0xe06   :  { %v3858_v6 = vmul.f32 0.5, %v3854_v11 }
 0xe07   :  { %v4117_v29 = vpop.f32.mrf.mxu0 }
 0xe08   :  { %v3934_v53 = vmul.f32 %v3858_v6, %v3858_v6  ;;  %v3940_v10 = vrot.slane %v3858_v6, %v8004_v23 }
 0xe09   :  { %v3929_v1 = vpop.f32.mrf.mxu0 }
 0xe0a   :  { %v3933_v59 = vmul.f32 0.5, %v3929_v1  ;;  %v3941_v35 = vsub.f32 %v3779_v44, %v3940_v10 }
 0xe0b   :  { %v4122_v21 = vpop.f32.mrf.mxu0 }
 0xe0c   :  { %v3935_v4 = vsub.f32 %v3933_v59, %v3934_v53 }
 0xe0e   :  { %v3936_v61 = vmax.f32 %v3935_v4, 0.0 }
 0xe10   :  { %v3942_v49 = vadd.f32 1e-05, %v3936_v61 }
 0xe12   :  { %4207 = vrsqrt.f32 %v3942_v49 }
 0xe1f   :  { %v4208_v51 = vpop.eup %4207 }
 0xe20   :  { %v3947_v48 = vrot.slane %v4208_v51, %v8004_v23 }
 0xe22   :  { %v3948_v9 = vmul.f32 %v3947_v48, %v3941_v35 }
 0xe24   :  { %v3956_v38 = vmul.f32 %v4037_v52, %v3948_v9 }
 0xe26   :  { %v3964_v20 = vadd.f32 %v4038_v25, %v3956_v38 }
 0xe28   :  { %3966 = vst.msk [vmem:[#allocation2] sm:$0x3] %vm3965_vm2, %v3964_v20 }
 0xe29   :  { %4220 = shalt.err (!%p4217_p4)
}
 0xe2a   :  { %3976 = dma.vmem_to_hbm [thread:$0]  %s3974_s19, 32, %s7726_s15, [#allocation3]  }
 0xe2b   :  { %4229 = dma.done.wait [#allocation3], 32  }
 0xe2c   :  { %4230 = vsyncadd [#allocation3], 4294967264 }
 0xe2d   :  { %3980 = vsyncpa [#allocation3], 1 }

</bundles_post_ra>
